<compile_context>
chip_gen: v5e
topology: v5e:2x2
jax: 0.10.0
libtpu: 0.0.40
codegen_flags: <defaults>
</compile_context>

<pallas_src>
import numpy as np

import jax
import jax.numpy as jnp
from jax import lax
from jax.experimental import pallas as pl
from jax.experimental.pallas import tpu as pltpu

NEG_SLOPE = 0.01   # torch.nn.LeakyReLU default negative_slope
BN_EPS = 1e-5      # torch BatchNorm default eps


# ---------------------------------------------------------------------------
# The fused kernel: one grid step = one batch chunk; weights stay VMEM-resident
# ---------------------------------------------------------------------------
def _lenet5_kernel(x_ref,
                   w1_ref, sh1_ref, pl1_ref, pr1_ref,
                   w2_ref, sh2_ref, pl2_ref, pr2_ref,
                   w3_ref, sh3_ref, s3_ref,
                   wfc1_ref, sh4_ref,
                   wfc2_ref, bfc2_ref,
                   o_ref):
    bf16 = jnp.bfloat16
    lrelu = lambda v: jnp.where(v >= 0, v, NEG_SLOPE * v)
    dot = lambda a, b: jnp.dot(a, b, preferred_element_type=jnp.float32)

    rows = x_ref.shape[0]          # chunk * 32  (row-padded, row-packed input slab)
    chunk = rows // 32

    # Input arrives bf16 (half the DMA); upcast once so the per-tap row slices are
    # plain f32 slices (bf16 -> f32 -> bf16 round-trip is exact, so no extra error).
    x2d = x_ref[...].astype(jnp.float32)                      # (chunk*32, 28)

    # ---- conv1 (1->6, k5, pad=2) + BN(scale folded into weight) + LeakyReLU ----
    # 5 banded matmuls, one per row tap; column taps + column padding + BN scale
    # are baked into w1.  Uninterrupted accumulation chain.
    r1 = rows - 4
    acc1 = dot(x2d[0:r1, :].astype(bf16), w1_ref[0])
    for di in range(1, 5):
        acc1 += dot(x2d[di:di + r1, :].astype(bf16), w1_ref[di])
    act1 = lrelu(acc1 + sh1_ref[...])                         # (r1, 168) rows=s*32+h, lanes=w*6+c

    # ---- AvgPool2d(2,2) + LeakyReLU : col-pool then row-pool selection matmuls ----
    p1 = dot(act1.astype(bf16), pr1_ref[...]).astype(bf16)    # (r1, 84)
    h2 = lrelu(dot(pl1_ref[...], p1))                         # (chunk*14, 84) rows=s*14+h

    # ---- conv2 (6->16, k5, no pad) + BN + LeakyReLU ----
    r2 = chunk * 14 - 4
    acc2 = dot(h2[0:r2, :].astype(bf16), w2_ref[0])
    for di in range(1, 5):
        acc2 += dot(h2[di:di + r2, :].astype(bf16), w2_ref[di])
    act2 = lrelu(acc2 + sh2_ref[...])                         # (r2, 160) lanes=w*16+c

    # ---- AvgPool2d(2,2) + LeakyReLU ----
    p2 = dot(act2.astype(bf16), pr2_ref[...]).astype(bf16)    # (r2, 80)
    h3 = lrelu(dot(pl2_ref[...], p2))                         # (chunk*5, 80) rows=s*5+h

    # ---- conv3 (16->120, k5, 5x5 -> 1x1) + BN + LeakyReLU ----
    r3 = chunk * 5 - 4
    acc3 = dot(h3[0:r3, :].astype(bf16), w3_ref[0])
    for di in range(1, 5):
        acc3 += dot(h3[di:di + r3, :].astype(bf16), w3_ref[di])
    feat = dot(s3_ref[...], acc3.astype(bf16))                # (chunk, 120): pick row s*5 per sample
    feat = lrelu(feat + sh3_ref[...])

    # ---- fc1 (120->84) + BN1d(scale folded) + LeakyReLU ----
    z = lrelu(dot(feat.astype(bf16), wfc1_ref[...]) + sh4_ref[...])

    # TODO(synk): Dropout(p=0.3) train-mode randomness not reproduced (eval-mode identity).

    # ---- fc2 (84->10) ----
    o_ref[...] = (dot(z.astype(bf16), wfc2_ref[...]) + bfc2_ref[...]).astype(o_ref.dtype)


def lenet5_forward(x, kp, *, chunk):
    n, c, h, w = x.shape
    assert (c, h, w) == (1, 28, 28), "LeNet5 expects 1x28x28 inputs"
    assert n % chunk == 0 and chunk % 8 == 0

    # Row-pad each sample to 32 rows (conv1 padding=2 in H) and pack samples along
    # the sublane axis; column padding is folded into the conv1 banded weight.
    xp = jnp.pad(x[:, 0], ((0, 0), (2, 2), (0, 0)))           # (n, 32, 28)
    xp = xp.reshape(n * 32, 28).astype(jnp.bfloat16)

    weights = (kp["w1"], kp["sh1"], kp["pl1"], kp["pr1"],
               kp["w2"], kp["sh2"], kp["pl2"], kp["pr2"],
               kp["w3"], kp["sh3"], kp["s3"],
               kp["wfc1"], kp["sh4"], kp["wfc2"], kp["bfc2"])

    def resident(a):   # whole array, constant block index -> stays resident in VMEM
        nd = a.ndim
        return pl.BlockSpec(a.shape, lambda i, nd=nd: (0,) * nd)

    return pl.pallas_call(
        _lenet5_kernel,
        out_shape=jax.ShapeDtypeStruct((n, 10), jnp.float32),
        grid_spec=pltpu.PrefetchScalarGridSpec(
            num_scalar_prefetch=0,
            grid=(n // chunk,),
            in_specs=[pl.BlockSpec((chunk * 32, 28), lambda i: (i, 0))]
                     + [resident(a) for a in weights],
            out_specs=pl.BlockSpec((chunk, 10), lambda i: (i, 0)),
        ),
        compiler_params=pltpu.CompilerParams(
            # v7x: shard batch chunks across both TensorCores; no-op on v5e/v6e.
            dimension_semantics=("parallel",),
        ),
    )(xp, *weights)


# ---------------------------------------------------------------------------
# Parameter setup (torch-layout params) and one-time kernel-operand packing
# ---------------------------------------------------------------------------
def init_params(key):
    keys = iter(jax.random.split(key, 32))
    nk = lambda: next(keys)
    normal = lambda shape, s=0.1: (s * jax.random.normal(nk(), shape)).astype(jnp.float32)

    def conv_bn(cout, cin, k):
        return dict(w=normal((cout, cin, k, k)), b=normal((cout,)),
                    gamma=1.0 + normal((cout,)), beta=normal((cout,)),
                    mean=normal((cout,)), var=1.0 + jnp.abs(normal((cout,))))

    def linear_bn(cout, cin):
        return dict(w=normal((cout, cin)), b=normal((cout,)),
                    gamma=1.0 + normal((cout,)), beta=normal((cout,)),
                    mean=normal((cout,)), var=1.0 + jnp.abs(normal((cout,))))

    return dict(conv1=conv_bn(6, 1, 5), conv2=conv_bn(16, 6, 5),
                conv3=conv_bn(120, 16, 5), fc1=linear_bn(84, 120),
                fc2=dict(w=normal((10, 84)), b=normal((10,))))


def _fold_bn(p):
    scale = p["gamma"] / jnp.sqrt(p["var"] + BN_EPS)
    shift = p["beta"] + scale * (p["b"] - p["mean"])
    return scale.astype(jnp.float32), shift.astype(jnp.float32)


def _conv_banded_weights(w, scale, w_in, w_out, pad):
    """torch conv weight (Cout,Cin,K,K) -> (K, w_in*Cin, w_out*Cout) per-row-tap
    banded weights.  Column taps (dj), zero column-padding, and the folded BN
    per-channel scale are all baked into the band."""
    cout, cin, kh, kw = w.shape
    wn = np.asarray(w, np.float32)
    sn = np.asarray(scale, np.float32)
    band = np.zeros((kh, w_in * cin, w_out * cout), np.float32)
    for di in range(kh):
        for dj in range(kw):
            blk = wn[:, :, di, dj].T                          # (Cin, Cout)
            for wo in range(w_out):
                wi = wo + dj - pad
                if 0 <= wi < w_in:
                    band[di, wi * cin:(wi + 1) * cin, wo * cout:(wo + 1) * cout] += blk
    band *= np.tile(sn, w_out)[None, None, :]
    return jnp.asarray(band, jnp.bfloat16)


def _col_pool(w_valid, c):
    """Lanes (2j+b)*c + ch -> lanes j*c + ch, factor 0.5."""
    wp = w_valid // 2
    m = np.zeros((w_valid * c, wp * c), np.float32)
    for j in range(wp):
        for b in range(2):
            m[(2 * j + b) * c:(2 * j + b + 1) * c, j * c:(j + 1) * c] = 0.5 * np.eye(c)
    return jnp.asarray(m, jnp.bfloat16)


def _row_pool(chunk, stride, h_valid):
    """Rows s*stride + 2i+a (a=0,1) -> rows s*(h_valid//2) + i, factor 0.5.
    Never selects the cross-sample garbage rows of the row-packed layout."""
    hp = h_valid // 2
    m = np.zeros((chunk * hp, chunk * stride - 4), np.float32)
    for s in range(chunk):
        for i in range(hp):
            m[s * hp + i, s * stride + 2 * i] = 0.5
            m[s * hp + i, s * stride + 2 * i + 1] = 0.5
    return jnp.asarray(m, jnp.bfloat16)


def _row_select(chunk, stride):
    m = np.zeros((chunk, chunk * stride - 4), np.float32)
    for s in range(chunk):
        m[s, s * stride] = 1.0
    return jnp.asarray(m, jnp.bfloat16)


def prepare_params(params, chunk):
    """Pack torch-layout params into kernel operands for a given batch-chunk size."""
    kp = {}
    # conv1 (1->6, k5, pad2): 28x28 -> 28x28
    sc, sh = _fold_bn(params["conv1"])
    kp["w1"] = _conv_banded_weights(params["conv1"]["w"], sc, w_in=28, w_out=28, pad=2)
    kp["sh1"] = jnp.tile(sh, 28).reshape(1, -1)               # (1, 168)
    kp["pl1"] = _row_pool(chunk, 32, 28)                      # (chunk*14, chunk*32-4)
    kp["pr1"] = _col_pool(28, 6)                              # (168, 84)
    # conv2 (6->16, k5): 14x14 -> 10x10
    sc, sh = _fold_bn(params["conv2"])
    kp["w2"] = _conv_banded_weights(params["conv2"]["w"], sc, w_in=14, w_out=10, pad=0)
    kp["sh2"] = jnp.tile(sh, 10).reshape(1, -1)               # (1, 160)
    kp["pl2"] = _row_pool(chunk, 14, 10)                      # (chunk*5, chunk*14-4)
    kp["pr2"] = _col_pool(10, 16)                             # (160, 80)
    # conv3 (16->120, k5): 5x5 -> 1x1
    sc, sh = _fold_bn(params["conv3"])
    kp["w3"] = _conv_banded_weights(params["conv3"]["w"], sc, w_in=5, w_out=1, pad=0)
    kp["sh3"] = sh.reshape(1, -1)                             # (1, 120)
    kp["s3"] = _row_select(chunk, 5)                          # (chunk, chunk*5-4)
    # fc1 (120->84) + BN1d  (BN scale folded into weight columns)
    sc, sh = _fold_bn(params["fc1"])
    kp["wfc1"] = (params["fc1"]["w"].T * sc[None, :]).astype(jnp.bfloat16)   # (120, 84)
    kp["sh4"] = sh.reshape(1, -1)                             # (1, 84)
    # fc2 (84->10), no BN / activation
    kp["wfc2"] = params["fc2"]["w"].T.astype(jnp.bfloat16)    # (84, 10)
    kp["bfc2"] = params["fc2"]["b"].reshape(1, -1).astype(jnp.float32)
    return kp


# ---------------------------------------------------------------------------
# Pure-JAX f32 reference (eval-mode torch semantics) for a correctness check
# ---------------------------------------------------------------------------
def lenet5_reference(x, params):
    lrelu = lambda v: jnp.where(v >= 0, v, NEG_SLOPE * v)

    def bn(v, p, axis):
        shape = [1] * v.ndim
        shape[axis] = -1
        sc = (p["gamma"] / jnp.sqrt(p["var"] + BN_EPS)).reshape(shape)
        return sc * (v - p["mean"].reshape(shape)) + p["beta"].reshape(shape)

    def conv(v, p, pad):
        out = lax.conv_general_dilated(
            v, p["w"], window_strides=(1, 1), padding=[(pad, pad), (pad, pad)],
            dimension_numbers=("NCHW", "OIHW", "NCHW"),
            precision=lax.Precision.HIGHEST)
        return out + p["b"].reshape(1, -1, 1, 1)

    def pool(v):
        n, c, hh, ww = v.shape
        return v.reshape(n, c, hh // 2, 2, ww // 2, 2).mean(axis=(3, 5))

    h = lrelu(bn(conv(x, params["conv1"], 2), params["conv1"], 1))
    h = lrelu(pool(h))
    h = lrelu(bn(conv(h, params["conv2"], 0), params["conv2"], 1))
    h = lrelu(pool(h))
    h = lrelu(bn(conv(h, params["conv3"], 0), params["conv3"], 1))
    h = h.reshape(h.shape[0], -1)
    h = lrelu(bn(jnp.dot(h, params["fc1"]["w"].T, precision=lax.Precision.HIGHEST)
                 + params["fc1"]["b"], params["fc1"], 1))
    # Dropout is identity in eval mode.
    return jnp.dot(h, params["fc2"]["w"].T, precision=lax.Precision.HIGHEST) + params["fc2"]["b"]


if __name__ == "__main__":
    key = jax.random.PRNGKey(0)
    k_param, k_x = jax.random.split(key)
    params = init_params(k_param)

    chunk = 8      # images per grid step (pl1/pl2/s3 are built for this chunk size)
    n = 16         # total batch; LeNet5 fixes the spatial size at 1x28x28 (MNIST)
    kernel_params = prepare_params(params, chunk)
    x = jax.random.normal(k_x, (n, 1, 28, 28), dtype=jnp.float32)

    fwd = jax.jit(lenet5_forward, static_argnames=("chunk",))
    logits = fwd(x, kernel_params, chunk=chunk)
    jax.block_until_ready(logits)

    assert logits.shape == (n, 10) and logits.dtype == jnp.float32
    assert bool(jnp.all(jnp.isfinite(logits)))

    # bf16-matmul kernel vs f32 reference: expect ~1e-2-level relative deviation.
    ref = lenet5_reference(x, params)
    rel = float(jnp.linalg.norm(logits - ref) / (jnp.linalg.norm(ref) + 1e-12))
    assert rel < 6e-2, f"kernel deviates from f32 reference: rel_err={rel:.4f}"
    print("KERNEL_OK")
</pallas_src>

<mosaic_0001>
module attributes {stable_mosaic.version = 11 : i64} {
  func.func @_lenet5_kernel(%arg0: i32, %arg1: memref<256x28xbf16, #tpu.memory_space<vmem>>, %arg2: memref<5x28x168xbf16, #tpu.memory_space<vmem>>, %arg3: memref<1x168xf32, #tpu.memory_space<vmem>>, %arg4: memref<112x252xbf16, #tpu.memory_space<vmem>>, %arg5: memref<168x84xbf16, #tpu.memory_space<vmem>>, %arg6: memref<5x84x160xbf16, #tpu.memory_space<vmem>>, %arg7: memref<1x160xf32, #tpu.memory_space<vmem>>, %arg8: memref<40x108xbf16, #tpu.memory_space<vmem>>, %arg9: memref<160x80xbf16, #tpu.memory_space<vmem>>, %arg10: memref<5x80x120xbf16, #tpu.memory_space<vmem>>, %arg11: memref<1x120xf32, #tpu.memory_space<vmem>>, %arg12: memref<8x36xbf16, #tpu.memory_space<vmem>>, %arg13: memref<120x84xbf16, #tpu.memory_space<vmem>>, %arg14: memref<1x84xf32, #tpu.memory_space<vmem>>, %arg15: memref<84x10xbf16, #tpu.memory_space<vmem>>, %arg16: memref<1x10xf32, #tpu.memory_space<vmem>>, %arg17: memref<8x10xf32, #tpu.memory_space<vmem>>) attributes {dimension_semantics = [#tpu.dimension_semantics<parallel>], iteration_bounds = array<i64: 2>, scalar_prefetch = 0 : i64, scratch_operands = 0 : i64, tpu.core_type = #tpu.core_type<tc>, window_params = [{transform_indices = @transform_0, window_bounds = array<i64: 256, 28>}, {pipeline_mode = #tpu.pipeline_mode<synchronous>, transform_indices = @transform_1, window_bounds = array<i64: 5, 28, 168>}, {pipeline_mode = #tpu.pipeline_mode<synchronous>, transform_indices = @transform_2, window_bounds = array<i64: 1, 168>}, {pipeline_mode = #tpu.pipeline_mode<synchronous>, transform_indices = @transform_3, window_bounds = array<i64: 112, 252>}, {pipeline_mode = #tpu.pipeline_mode<synchronous>, transform_indices = @transform_4, window_bounds = array<i64: 168, 84>}, {pipeline_mode = #tpu.pipeline_mode<synchronous>, transform_indices = @transform_5, window_bounds = array<i64: 5, 84, 160>}, {pipeline_mode = #tpu.pipeline_mode<synchronous>, transform_indices = @transform_6, window_bounds = array<i64: 1, 160>}, {pipeline_mode = #tpu.pipeline_mode<synchronous>, transform_indices = @transform_7, window_bounds = array<i64: 40, 108>}, {pipeline_mode = #tpu.pipeline_mode<synchronous>, transform_indices = @transform_8, window_bounds = array<i64: 160, 80>}, {pipeline_mode = #tpu.pipeline_mode<synchronous>, transform_indices = @transform_9, window_bounds = array<i64: 5, 80, 120>}, {pipeline_mode = #tpu.pipeline_mode<synchronous>, transform_indices = @transform_10, window_bounds = array<i64: 1, 120>}, {pipeline_mode = #tpu.pipeline_mode<synchronous>, transform_indices = @transform_11, window_bounds = array<i64: 8, 36>}, {pipeline_mode = #tpu.pipeline_mode<synchronous>, transform_indices = @transform_12, window_bounds = array<i64: 120, 84>}, {pipeline_mode = #tpu.pipeline_mode<synchronous>, transform_indices = @transform_13, window_bounds = array<i64: 1, 84>}, {pipeline_mode = #tpu.pipeline_mode<synchronous>, transform_indices = @transform_14, window_bounds = array<i64: 84, 10>}, {pipeline_mode = #tpu.pipeline_mode<synchronous>, transform_indices = @transform_15, window_bounds = array<i64: 1, 10>}, {transform_indices = @transform_16, window_bounds = array<i64: 8, 10>}]} {
    %c0 = arith.constant 0 : index
    %c0_0 = arith.constant 0 : index
    %0 = vector.load %arg1[%c0, %c0_0] : memref<256x28xbf16, #tpu.memory_space<vmem>>, vector<256x28xbf16>
    %1 = arith.extf %0 : vector<256x28xbf16> to vector<256x28xf32>
    %2 = vector.extract_strided_slice %1 {offsets = [0, 0], sizes = [252, 28], strides = [1, 1]} : vector<256x28xf32> to vector<252x28xf32>
    %3 = arith.truncf %2 : vector<252x28xf32> to vector<252x28xbf16>
    %c0_1 = arith.constant 0 : index
    %c0_2 = arith.constant 0 : index
    %c0_3 = arith.constant 0 : index
    %4 = vector.load %arg2[%c0_1, %c0_2, %c0_3] : memref<5x28x168xbf16, #tpu.memory_space<vmem>>, vector<1x28x168xbf16>
    %5 = vector.shape_cast %4 : vector<1x28x168xbf16> to vector<28x168xbf16>
    %cst = arith.constant dense<0.000000e+00> : vector<252x168xf32>
    %6 = tpu.matmul %3, %5, %cst {dimension_numbers = #tpu.dot_dimension_numbers<[1], [0], [0], [1], [0, 0, 1, 1], [], []>} : vector<252x28xbf16>, vector<28x168xbf16>, vector<252x168xf32> -> vector<252x168xf32>
    %7 = vector.extract_strided_slice %1 {offsets = [1, 0], sizes = [252, 28], strides = [1, 1]} : vector<256x28xf32> to vector<252x28xf32>
    %8 = arith.truncf %7 : vector<252x28xf32> to vector<252x28xbf16>
    %c1 = arith.constant 1 : index
    %c0_4 = arith.constant 0 : index
    %c0_5 = arith.constant 0 : index
    %9 = vector.load %arg2[%c1, %c0_4, %c0_5] : memref<5x28x168xbf16, #tpu.memory_space<vmem>>, vector<1x28x168xbf16>
    %10 = vector.shape_cast %9 : vector<1x28x168xbf16> to vector<28x168xbf16>
    %cst_6 = arith.constant dense<0.000000e+00> : vector<252x168xf32>
    %11 = tpu.matmul %8, %10, %cst_6 {dimension_numbers = #tpu.dot_dimension_numbers<[1], [0], [0], [1], [0, 0, 1, 1], [], []>} : vector<252x28xbf16>, vector<28x168xbf16>, vector<252x168xf32> -> vector<252x168xf32>
    %12 = arith.addf %6, %11 : vector<252x168xf32>
    %13 = vector.extract_strided_slice %1 {offsets = [2, 0], sizes = [252, 28], strides = [1, 1]} : vector<256x28xf32> to vector<252x28xf32>
    %14 = arith.truncf %13 : vector<252x28xf32> to vector<252x28xbf16>
    %c2 = arith.constant 2 : index
    %c0_7 = arith.constant 0 : index
    %c0_8 = arith.constant 0 : index
    %15 = vector.load %arg2[%c2, %c0_7, %c0_8] : memref<5x28x168xbf16, #tpu.memory_space<vmem>>, vector<1x28x168xbf16>
    %16 = vector.shape_cast %15 : vector<1x28x168xbf16> to vector<28x168xbf16>
    %cst_9 = arith.constant dense<0.000000e+00> : vector<252x168xf32>
    %17 = tpu.matmul %14, %16, %cst_9 {dimension_numbers = #tpu.dot_dimension_numbers<[1], [0], [0], [1], [0, 0, 1, 1], [], []>} : vector<252x28xbf16>, vector<28x168xbf16>, vector<252x168xf32> -> vector<252x168xf32>
    %18 = arith.addf %12, %17 : vector<252x168xf32>
    %19 = vector.extract_strided_slice %1 {offsets = [3, 0], sizes = [252, 28], strides = [1, 1]} : vector<256x28xf32> to vector<252x28xf32>
    %20 = arith.truncf %19 : vector<252x28xf32> to vector<252x28xbf16>
    %c3 = arith.constant 3 : index
    %c0_10 = arith.constant 0 : index
    %c0_11 = arith.constant 0 : index
    %21 = vector.load %arg2[%c3, %c0_10, %c0_11] : memref<5x28x168xbf16, #tpu.memory_space<vmem>>, vector<1x28x168xbf16>
    %22 = vector.shape_cast %21 : vector<1x28x168xbf16> to vector<28x168xbf16>
    %cst_12 = arith.constant dense<0.000000e+00> : vector<252x168xf32>
    %23 = tpu.matmul %20, %22, %cst_12 {dimension_numbers = #tpu.dot_dimension_numbers<[1], [0], [0], [1], [0, 0, 1, 1], [], []>} : vector<252x28xbf16>, vector<28x168xbf16>, vector<252x168xf32> -> vector<252x168xf32>
    %24 = arith.addf %18, %23 : vector<252x168xf32>
    %25 = vector.extract_strided_slice %1 {offsets = [4, 0], sizes = [252, 28], strides = [1, 1]} : vector<256x28xf32> to vector<252x28xf32>
    %26 = arith.truncf %25 : vector<252x28xf32> to vector<252x28xbf16>
    %c4 = arith.constant 4 : index
    %c0_13 = arith.constant 0 : index
    %c0_14 = arith.constant 0 : index
    %27 = vector.load %arg2[%c4, %c0_13, %c0_14] : memref<5x28x168xbf16, #tpu.memory_space<vmem>>, vector<1x28x168xbf16>
    %28 = vector.shape_cast %27 : vector<1x28x168xbf16> to vector<28x168xbf16>
    %cst_15 = arith.constant dense<0.000000e+00> : vector<252x168xf32>
    %29 = tpu.matmul %26, %28, %cst_15 {dimension_numbers = #tpu.dot_dimension_numbers<[1], [0], [0], [1], [0, 0, 1, 1], [], []>} : vector<252x28xbf16>, vector<28x168xbf16>, vector<252x168xf32> -> vector<252x168xf32>
    %30 = arith.addf %24, %29 : vector<252x168xf32>
    %c0_16 = arith.constant 0 : index
    %c0_17 = arith.constant 0 : index
    %31 = vector.load %arg3[%c0_16, %c0_17] : memref<1x168xf32, #tpu.memory_space<vmem>>, vector<1x168xf32>
    %32 = vector.broadcast %31 : vector<1x168xf32> to vector<252x168xf32>
    %33 = arith.addf %30, %32 : vector<252x168xf32>
    %cst_18 = arith.constant 0.000000e+00 : f32
    %34 = vector.broadcast %cst_18 : f32 to vector<252x168xf32>
    %35 = arith.cmpf oge, %33, %34 : vector<252x168xf32>
    %cst_19 = arith.constant 0.00999999977 : f32
    %36 = vector.broadcast %cst_19 : f32 to vector<252x168xf32>
    %37 = arith.mulf %36, %33 : vector<252x168xf32>
    %38 = arith.select %35, %33, %37 : vector<252x168xi1>, vector<252x168xf32>
    %39 = arith.truncf %38 : vector<252x168xf32> to vector<252x168xbf16>
    %c0_20 = arith.constant 0 : index
    %c0_21 = arith.constant 0 : index
    %40 = vector.load %arg5[%c0_20, %c0_21] : memref<168x84xbf16, #tpu.memory_space<vmem>>, vector<168x84xbf16>
    %cst_22 = arith.constant dense<0.000000e+00> : vector<252x84xf32>
    %41 = tpu.matmul %39, %40, %cst_22 {dimension_numbers = #tpu.dot_dimension_numbers<[1], [0], [0], [1], [0, 0, 1, 1], [], []>} : vector<252x168xbf16>, vector<168x84xbf16>, vector<252x84xf32> -> vector<252x84xf32>
    %42 = arith.truncf %41 : vector<252x84xf32> to vector<252x84xbf16>
    %c0_23 = arith.constant 0 : index
    %c0_24 = arith.constant 0 : index
    %43 = vector.load %arg4[%c0_23, %c0_24] : memref<112x252xbf16, #tpu.memory_space<vmem>>, vector<112x252xbf16>
    %cst_25 = arith.constant dense<0.000000e+00> : vector<112x84xf32>
    %44 = tpu.matmul %43, %42, %cst_25 {dimension_numbers = #tpu.dot_dimension_numbers<[1], [0], [0], [1], [0, 0, 1, 1], [], []>} : vector<112x252xbf16>, vector<252x84xbf16>, vector<112x84xf32> -> vector<112x84xf32>
    %cst_26 = arith.constant 0.000000e+00 : f32
    %45 = vector.broadcast %cst_26 : f32 to vector<112x84xf32>
    %46 = arith.cmpf oge, %44, %45 : vector<112x84xf32>
    %cst_27 = arith.constant 0.00999999977 : f32
    %47 = vector.broadcast %cst_27 : f32 to vector<112x84xf32>
    %48 = arith.mulf %47, %44 : vector<112x84xf32>
    %49 = arith.select %46, %44, %48 : vector<112x84xi1>, vector<112x84xf32>
    %50 = vector.extract_strided_slice %49 {offsets = [0, 0], sizes = [108, 84], strides = [1, 1]} : vector<112x84xf32> to vector<108x84xf32>
    %51 = arith.truncf %50 : vector<108x84xf32> to vector<108x84xbf16>
    %c0_28 = arith.constant 0 : index
    %c0_29 = arith.constant 0 : index
    %c0_30 = arith.constant 0 : index
    %52 = vector.load %arg6[%c0_28, %c0_29, %c0_30] : memref<5x84x160xbf16, #tpu.memory_space<vmem>>, vector<1x84x160xbf16>
    %53 = vector.shape_cast %52 : vector<1x84x160xbf16> to vector<84x160xbf16>
    %cst_31 = arith.constant dense<0.000000e+00> : vector<108x160xf32>
    %54 = tpu.matmul %51, %53, %cst_31 {dimension_numbers = #tpu.dot_dimension_numbers<[1], [0], [0], [1], [0, 0, 1, 1], [], []>} : vector<108x84xbf16>, vector<84x160xbf16>, vector<108x160xf32> -> vector<108x160xf32>
    %55 = vector.extract_strided_slice %49 {offsets = [1, 0], sizes = [108, 84], strides = [1, 1]} : vector<112x84xf32> to vector<108x84xf32>
    %56 = arith.truncf %55 : vector<108x84xf32> to vector<108x84xbf16>
    %c1_32 = arith.constant 1 : index
    %c0_33 = arith.constant 0 : index
    %c0_34 = arith.constant 0 : index
    %57 = vector.load %arg6[%c1_32, %c0_33, %c0_34] : memref<5x84x160xbf16, #tpu.memory_space<vmem>>, vector<1x84x160xbf16>
    %58 = vector.shape_cast %57 : vector<1x84x160xbf16> to vector<84x160xbf16>
    %cst_35 = arith.constant dense<0.000000e+00> : vector<108x160xf32>
    %59 = tpu.matmul %56, %58, %cst_35 {dimension_numbers = #tpu.dot_dimension_numbers<[1], [0], [0], [1], [0, 0, 1, 1], [], []>} : vector<108x84xbf16>, vector<84x160xbf16>, vector<108x160xf32> -> vector<108x160xf32>
    %60 = arith.addf %54, %59 : vector<108x160xf32>
    %61 = vector.extract_strided_slice %49 {offsets = [2, 0], sizes = [108, 84], strides = [1, 1]} : vector<112x84xf32> to vector<108x84xf32>
    %62 = arith.truncf %61 : vector<108x84xf32> to vector<108x84xbf16>
    %c2_36 = arith.constant 2 : index
    %c0_37 = arith.constant 0 : index
    %c0_38 = arith.constant 0 : index
    %63 = vector.load %arg6[%c2_36, %c0_37, %c0_38] : memref<5x84x160xbf16, #tpu.memory_space<vmem>>, vector<1x84x160xbf16>
    %64 = vector.shape_cast %63 : vector<1x84x160xbf16> to vector<84x160xbf16>
    %cst_39 = arith.constant dense<0.000000e+00> : vector<108x160xf32>
    %65 = tpu.matmul %62, %64, %cst_39 {dimension_numbers = #tpu.dot_dimension_numbers<[1], [0], [0], [1], [0, 0, 1, 1], [], []>} : vector<108x84xbf16>, vector<84x160xbf16>, vector<108x160xf32> -> vector<108x160xf32>
    %66 = arith.addf %60, %65 : vector<108x160xf32>
    %67 = vector.extract_strided_slice %49 {offsets = [3, 0], sizes = [108, 84], strides = [1, 1]} : vector<112x84xf32> to vector<108x84xf32>
    %68 = arith.truncf %67 : vector<108x84xf32> to vector<108x84xbf16>
    %c3_40 = arith.constant 3 : index
    %c0_41 = arith.constant 0 : index
    %c0_42 = arith.constant 0 : index
    %69 = vector.load %arg6[%c3_40, %c0_41, %c0_42] : memref<5x84x160xbf16, #tpu.memory_space<vmem>>, vector<1x84x160xbf16>
    %70 = vector.shape_cast %69 : vector<1x84x160xbf16> to vector<84x160xbf16>
    %cst_43 = arith.constant dense<0.000000e+00> : vector<108x160xf32>
    %71 = tpu.matmul %68, %70, %cst_43 {dimension_numbers = #tpu.dot_dimension_numbers<[1], [0], [0], [1], [0, 0, 1, 1], [], []>} : vector<108x84xbf16>, vector<84x160xbf16>, vector<108x160xf32> -> vector<108x160xf32>
    %72 = arith.addf %66, %71 : vector<108x160xf32>
    %73 = vector.extract_strided_slice %49 {offsets = [4, 0], sizes = [108, 84], strides = [1, 1]} : vector<112x84xf32> to vector<108x84xf32>
    %74 = arith.truncf %73 : vector<108x84xf32> to vector<108x84xbf16>
    %c4_44 = arith.constant 4 : index
    %c0_45 = arith.constant 0 : index
    %c0_46 = arith.constant 0 : index
    %75 = vector.load %arg6[%c4_44, %c0_45, %c0_46] : memref<5x84x160xbf16, #tpu.memory_space<vmem>>, vector<1x84x160xbf16>
    %76 = vector.shape_cast %75 : vector<1x84x160xbf16> to vector<84x160xbf16>
    %cst_47 = arith.constant dense<0.000000e+00> : vector<108x160xf32>
    %77 = tpu.matmul %74, %76, %cst_47 {dimension_numbers = #tpu.dot_dimension_numbers<[1], [0], [0], [1], [0, 0, 1, 1], [], []>} : vector<108x84xbf16>, vector<84x160xbf16>, vector<108x160xf32> -> vector<108x160xf32>
    %78 = arith.addf %72, %77 : vector<108x160xf32>
    %c0_48 = arith.constant 0 : index
    %c0_49 = arith.constant 0 : index
    %79 = vector.load %arg7[%c0_48, %c0_49] : memref<1x160xf32, #tpu.memory_space<vmem>>, vector<1x160xf32>
    %80 = vector.broadcast %79 : vector<1x160xf32> to vector<108x160xf32>
    %81 = arith.addf %78, %80 : vector<108x160xf32>
    %cst_50 = arith.constant 0.000000e+00 : f32
    %82 = vector.broadcast %cst_50 : f32 to vector<108x160xf32>
    %83 = arith.cmpf oge, %81, %82 : vector<108x160xf32>
    %cst_51 = arith.constant 0.00999999977 : f32
    %84 = vector.broadcast %cst_51 : f32 to vector<108x160xf32>
    %85 = arith.mulf %84, %81 : vector<108x160xf32>
    %86 = arith.select %83, %81, %85 : vector<108x160xi1>, vector<108x160xf32>
    %87 = arith.truncf %86 : vector<108x160xf32> to vector<108x160xbf16>
    %c0_52 = arith.constant 0 : index
    %c0_53 = arith.constant 0 : index
    %88 = vector.load %arg9[%c0_52, %c0_53] : memref<160x80xbf16, #tpu.memory_space<vmem>>, vector<160x80xbf16>
    %cst_54 = arith.constant dense<0.000000e+00> : vector<108x80xf32>
    %89 = tpu.matmul %87, %88, %cst_54 {dimension_numbers = #tpu.dot_dimension_numbers<[1], [0], [0], [1], [0, 0, 1, 1], [], []>} : vector<108x160xbf16>, vector<160x80xbf16>, vector<108x80xf32> -> vector<108x80xf32>
    %90 = arith.truncf %89 : vector<108x80xf32> to vector<108x80xbf16>
    %c0_55 = arith.constant 0 : index
    %c0_56 = arith.constant 0 : index
    %91 = vector.load %arg8[%c0_55, %c0_56] : memref<40x108xbf16, #tpu.memory_space<vmem>>, vector<40x108xbf16>
    %cst_57 = arith.constant dense<0.000000e+00> : vector<40x80xf32>
    %92 = tpu.matmul %91, %90, %cst_57 {dimension_numbers = #tpu.dot_dimension_numbers<[1], [0], [0], [1], [0, 0, 1, 1], [], []>} : vector<40x108xbf16>, vector<108x80xbf16>, vector<40x80xf32> -> vector<40x80xf32>
    %cst_58 = arith.constant 0.000000e+00 : f32
    %93 = vector.broadcast %cst_58 : f32 to vector<40x80xf32>
    %94 = arith.cmpf oge, %92, %93 : vector<40x80xf32>
    %cst_59 = arith.constant 0.00999999977 : f32
    %95 = vector.broadcast %cst_59 : f32 to vector<40x80xf32>
    %96 = arith.mulf %95, %92 : vector<40x80xf32>
    %97 = arith.select %94, %92, %96 : vector<40x80xi1>, vector<40x80xf32>
    %98 = vector.extract_strided_slice %97 {offsets = [0, 0], sizes = [36, 80], strides = [1, 1]} : vector<40x80xf32> to vector<36x80xf32>
    %99 = arith.truncf %98 : vector<36x80xf32> to vector<36x80xbf16>
    %c0_60 = arith.constant 0 : index
    %c0_61 = arith.constant 0 : index
    %c0_62 = arith.constant 0 : index
    %100 = vector.load %arg10[%c0_60, %c0_61, %c0_62] : memref<5x80x120xbf16, #tpu.memory_space<vmem>>, vector<1x80x120xbf16>
    %101 = vector.shape_cast %100 : vector<1x80x120xbf16> to vector<80x120xbf16>
    %cst_63 = arith.constant dense<0.000000e+00> : vector<36x120xf32>
    %102 = tpu.matmul %99, %101, %cst_63 {dimension_numbers = #tpu.dot_dimension_numbers<[1], [0], [0], [1], [0, 0, 1, 1], [], []>} : vector<36x80xbf16>, vector<80x120xbf16>, vector<36x120xf32> -> vector<36x120xf32>
    %103 = vector.extract_strided_slice %97 {offsets = [1, 0], sizes = [36, 80], strides = [1, 1]} : vector<40x80xf32> to vector<36x80xf32>
    %104 = arith.truncf %103 : vector<36x80xf32> to vector<36x80xbf16>
    %c1_64 = arith.constant 1 : index
    %c0_65 = arith.constant 0 : index
    %c0_66 = arith.constant 0 : index
    %105 = vector.load %arg10[%c1_64, %c0_65, %c0_66] : memref<5x80x120xbf16, #tpu.memory_space<vmem>>, vector<1x80x120xbf16>
    %106 = vector.shape_cast %105 : vector<1x80x120xbf16> to vector<80x120xbf16>
    %cst_67 = arith.constant dense<0.000000e+00> : vector<36x120xf32>
    %107 = tpu.matmul %104, %106, %cst_67 {dimension_numbers = #tpu.dot_dimension_numbers<[1], [0], [0], [1], [0, 0, 1, 1], [], []>} : vector<36x80xbf16>, vector<80x120xbf16>, vector<36x120xf32> -> vector<36x120xf32>
    %108 = arith.addf %102, %107 : vector<36x120xf32>
    %109 = vector.extract_strided_slice %97 {offsets = [2, 0], sizes = [36, 80], strides = [1, 1]} : vector<40x80xf32> to vector<36x80xf32>
    %110 = arith.truncf %109 : vector<36x80xf32> to vector<36x80xbf16>
    %c2_68 = arith.constant 2 : index
    %c0_69 = arith.constant 0 : index
    %c0_70 = arith.constant 0 : index
    %111 = vector.load %arg10[%c2_68, %c0_69, %c0_70] : memref<5x80x120xbf16, #tpu.memory_space<vmem>>, vector<1x80x120xbf16>
    %112 = vector.shape_cast %111 : vector<1x80x120xbf16> to vector<80x120xbf16>
    %cst_71 = arith.constant dense<0.000000e+00> : vector<36x120xf32>
    %113 = tpu.matmul %110, %112, %cst_71 {dimension_numbers = #tpu.dot_dimension_numbers<[1], [0], [0], [1], [0, 0, 1, 1], [], []>} : vector<36x80xbf16>, vector<80x120xbf16>, vector<36x120xf32> -> vector<36x120xf32>
    %114 = arith.addf %108, %113 : vector<36x120xf32>
    %115 = vector.extract_strided_slice %97 {offsets = [3, 0], sizes = [36, 80], strides = [1, 1]} : vector<40x80xf32> to vector<36x80xf32>
    %116 = arith.truncf %115 : vector<36x80xf32> to vector<36x80xbf16>
    %c3_72 = arith.constant 3 : index
    %c0_73 = arith.constant 0 : index
    %c0_74 = arith.constant 0 : index
    %117 = vector.load %arg10[%c3_72, %c0_73, %c0_74] : memref<5x80x120xbf16, #tpu.memory_space<vmem>>, vector<1x80x120xbf16>
    %118 = vector.shape_cast %117 : vector<1x80x120xbf16> to vector<80x120xbf16>
    %cst_75 = arith.constant dense<0.000000e+00> : vector<36x120xf32>
    %119 = tpu.matmul %116, %118, %cst_75 {dimension_numbers = #tpu.dot_dimension_numbers<[1], [0], [0], [1], [0, 0, 1, 1], [], []>} : vector<36x80xbf16>, vector<80x120xbf16>, vector<36x120xf32> -> vector<36x120xf32>
    %120 = arith.addf %114, %119 : vector<36x120xf32>
    %121 = vector.extract_strided_slice %97 {offsets = [4, 0], sizes = [36, 80], strides = [1, 1]} : vector<40x80xf32> to vector<36x80xf32>
    %122 = arith.truncf %121 : vector<36x80xf32> to vector<36x80xbf16>
    %c4_76 = arith.constant 4 : index
    %c0_77 = arith.constant 0 : index
    %c0_78 = arith.constant 0 : index
    %123 = vector.load %arg10[%c4_76, %c0_77, %c0_78] : memref<5x80x120xbf16, #tpu.memory_space<vmem>>, vector<1x80x120xbf16>
    %124 = vector.shape_cast %123 : vector<1x80x120xbf16> to vector<80x120xbf16>
    %cst_79 = arith.constant dense<0.000000e+00> : vector<36x120xf32>
    %125 = tpu.matmul %122, %124, %cst_79 {dimension_numbers = #tpu.dot_dimension_numbers<[1], [0], [0], [1], [0, 0, 1, 1], [], []>} : vector<36x80xbf16>, vector<80x120xbf16>, vector<36x120xf32> -> vector<36x120xf32>
    %126 = arith.addf %120, %125 : vector<36x120xf32>
    %c0_80 = arith.constant 0 : index
    %c0_81 = arith.constant 0 : index
    %127 = vector.load %arg12[%c0_80, %c0_81] : memref<8x36xbf16, #tpu.memory_space<vmem>>, vector<8x36xbf16>
    %128 = arith.truncf %126 : vector<36x120xf32> to vector<36x120xbf16>
    %cst_82 = arith.constant dense<0.000000e+00> : vector<8x120xf32>
    %129 = tpu.matmul %127, %128, %cst_82 {dimension_numbers = #tpu.dot_dimension_numbers<[1], [0], [0], [1], [0, 0, 1, 1], [], []>} : vector<8x36xbf16>, vector<36x120xbf16>, vector<8x120xf32> -> vector<8x120xf32>
    %c0_83 = arith.constant 0 : index
    %c0_84 = arith.constant 0 : index
    %130 = vector.load %arg11[%c0_83, %c0_84] : memref<1x120xf32, #tpu.memory_space<vmem>>, vector<1x120xf32>
    %131 = vector.broadcast %130 : vector<1x120xf32> to vector<8x120xf32>
    %132 = arith.addf %129, %131 : vector<8x120xf32>
    %cst_85 = arith.constant 0.000000e+00 : f32
    %133 = vector.broadcast %cst_85 : f32 to vector<8x120xf32>
    %134 = arith.cmpf oge, %132, %133 : vector<8x120xf32>
    %cst_86 = arith.constant 0.00999999977 : f32
    %135 = vector.broadcast %cst_86 : f32 to vector<8x120xf32>
    %136 = arith.mulf %135, %132 : vector<8x120xf32>
    %137 = arith.select %134, %132, %136 : vector<8x120xi1>, vector<8x120xf32>
    %138 = arith.truncf %137 : vector<8x120xf32> to vector<8x120xbf16>
    %c0_87 = arith.constant 0 : index
    %c0_88 = arith.constant 0 : index
    %139 = vector.load %arg13[%c0_87, %c0_88] : memref<120x84xbf16, #tpu.memory_space<vmem>>, vector<120x84xbf16>
    %cst_89 = arith.constant dense<0.000000e+00> : vector<8x84xf32>
    %140 = tpu.matmul %138, %139, %cst_89 {dimension_numbers = #tpu.dot_dimension_numbers<[1], [0], [0], [1], [0, 0, 1, 1], [], []>} : vector<8x120xbf16>, vector<120x84xbf16>, vector<8x84xf32> -> vector<8x84xf32>
    %c0_90 = arith.constant 0 : index
    %c0_91 = arith.constant 0 : index
    %141 = vector.load %arg14[%c0_90, %c0_91] : memref<1x84xf32, #tpu.memory_space<vmem>>, vector<1x84xf32>
    %142 = vector.broadcast %141 : vector<1x84xf32> to vector<8x84xf32>
    %143 = arith.addf %140, %142 : vector<8x84xf32>
    %cst_92 = arith.constant 0.000000e+00 : f32
    %144 = vector.broadcast %cst_92 : f32 to vector<8x84xf32>
    %145 = arith.cmpf oge, %143, %144 : vector<8x84xf32>
    %cst_93 = arith.constant 0.00999999977 : f32
    %146 = vector.broadcast %cst_93 : f32 to vector<8x84xf32>
    %147 = arith.mulf %146, %143 : vector<8x84xf32>
    %148 = arith.select %145, %143, %147 : vector<8x84xi1>, vector<8x84xf32>
    %149 = arith.truncf %148 : vector<8x84xf32> to vector<8x84xbf16>
    %c0_94 = arith.constant 0 : index
    %c0_95 = arith.constant 0 : index
    %150 = vector.load %arg15[%c0_94, %c0_95] : memref<84x10xbf16, #tpu.memory_space<vmem>>, vector<84x10xbf16>
    %cst_96 = arith.constant dense<0.000000e+00> : vector<8x10xf32>
    %151 = tpu.matmul %149, %150, %cst_96 {dimension_numbers = #tpu.dot_dimension_numbers<[1], [0], [0], [1], [0, 0, 1, 1], [], []>} : vector<8x84xbf16>, vector<84x10xbf16>, vector<8x10xf32> -> vector<8x10xf32>
    %c0_97 = arith.constant 0 : index
    %c0_98 = arith.constant 0 : index
    %152 = vector.load %arg16[%c0_97, %c0_98] : memref<1x10xf32, #tpu.memory_space<vmem>>, vector<1x10xf32>
    %153 = vector.broadcast %152 : vector<1x10xf32> to vector<8x10xf32>
    %154 = arith.addf %151, %153 : vector<8x10xf32>
    %c0_99 = arith.constant 0 : index
    %c0_100 = arith.constant 0 : index
    %155 = vector.load %arg17[%c0_99, %c0_100] : memref<8x10xf32, #tpu.memory_space<vmem>>, vector<8x10xf32>
    tpu.vector_store %arg17[%c0_99, %c0_100], %154 {strides = array<i32>} : memref<8x10xf32, #tpu.memory_space<vmem>>, vector<8x10xf32>,
    return
  }
  func.func @transform_0(%arg0: i32) -> (i32, i32) {
    %c0_i32 = arith.constant 0 : i32
    %c0_i32_0 = arith.constant 0 : i32
    return %arg0, %c0_i32 : i32, i32
  }
  func.func @transform_1(%arg0: i32) -> (i32, i32, i32) {
    %c0_i32 = arith.constant 0 : i32
    %c0_i32_0 = arith.constant 0 : i32
    %c0_i32_1 = arith.constant 0 : i32
    %c0_i32_2 = arith.constant 0 : i32
    return %c0_i32, %c0_i32_0, %c0_i32_1 : i32, i32, i32
  }
  func.func @transform_2(%arg0: i32) -> (i32, i32) {
    %c0_i32 = arith.constant 0 : i32
    %c0_i32_0 = arith.constant 0 : i32
    %c0_i32_1 = arith.constant 0 : i32
    return %c0_i32, %c0_i32_0 : i32, i32
  }
  func.func @transform_3(%arg0: i32) -> (i32, i32) {
    %c0_i32 = arith.constant 0 : i32
    %c0_i32_0 = arith.constant 0 : i32
    %c0_i32_1 = arith.constant 0 : i32
    return %c0_i32, %c0_i32_0 : i32, i32
  }
  func.func @transform_4(%arg0: i32) -> (i32, i32) {
    %c0_i32 = arith.constant 0 : i32
    %c0_i32_0 = arith.constant 0 : i32
    %c0_i32_1 = arith.constant 0 : i32
    return %c0_i32, %c0_i32_0 : i32, i32
  }
  func.func @transform_5(%arg0: i32) -> (i32, i32, i32) {
    %c0_i32 = arith.constant 0 : i32
    %c0_i32_0 = arith.constant 0 : i32
    %c0_i32_1 = arith.constant 0 : i32
    %c0_i32_2 = arith.constant 0 : i32
    return %c0_i32, %c0_i32_0, %c0_i32_1 : i32, i32, i32
  }
  func.func @transform_6(%arg0: i32) -> (i32, i32) {
    %c0_i32 = arith.constant 0 : i32
    %c0_i32_0 = arith.constant 0 : i32
    %c0_i32_1 = arith.constant 0 : i32
    return %c0_i32, %c0_i32_0 : i32, i32
  }
  func.func @transform_7(%arg0: i32) -> (i32, i32) {
    %c0_i32 = arith.constant 0 : i32
    %c0_i32_0 = arith.constant 0 : i32
    %c0_i32_1 = arith.constant 0 : i32
    return %c0_i32, %c0_i32_0 : i32, i32
  }
  func.func @transform_8(%arg0: i32) -> (i32, i32) {
    %c0_i32 = arith.constant 0 : i32
    %c0_i32_0 = arith.constant 0 : i32
    %c0_i32_1 = arith.constant 0 : i32
    return %c0_i32, %c0_i32_0 : i32, i32
  }
  func.func @transform_9(%arg0: i32) -> (i32, i32, i32) {
    %c0_i32 = arith.constant 0 : i32
    %c0_i32_0 = arith.constant 0 : i32
    %c0_i32_1 = arith.constant 0 : i32
    %c0_i32_2 = arith.constant 0 : i32
    return %c0_i32, %c0_i32_0, %c0_i32_1 : i32, i32, i32
  }
  func.func @transform_10(%arg0: i32) -> (i32, i32) {
    %c0_i32 = arith.constant 0 : i32
    %c0_i32_0 = arith.constant 0 : i32
    %c0_i32_1 = arith.constant 0 : i32
    return %c0_i32, %c0_i32_0 : i32, i32
  }
  func.func @transform_11(%arg0: i32) -> (i32, i32) {
    %c0_i32 = arith.constant 0 : i32
    %c0_i32_0 = arith.constant 0 : i32
    %c0_i32_1 = arith.constant 0 : i32
    return %c0_i32, %c0_i32_0 : i32, i32
  }
  func.func @transform_12(%arg0: i32) -> (i32, i32) {
    %c0_i32 = arith.constant 0 : i32
    %c0_i32_0 = arith.constant 0 : i32
    %c0_i32_1 = arith.constant 0 : i32
    return %c0_i32, %c0_i32_0 : i32, i32
  }
  func.func @transform_13(%arg0: i32) -> (i32, i32) {
    %c0_i32 = arith.constant 0 : i32
    %c0_i32_0 = arith.constant 0 : i32
    %c0_i32_1 = arith.constant 0 : i32
    return %c0_i32, %c0_i32_0 : i32, i32
  }
  func.func @transform_14(%arg0: i32) -> (i32, i32) {
    %c0_i32 = arith.constant 0 : i32
    %c0_i32_0 = arith.constant 0 : i32
    %c0_i32_1 = arith.constant 0 : i32
    return %c0_i32, %c0_i32_0 : i32, i32
  }
  func.func @transform_15(%arg0: i32) -> (i32, i32) {
    %c0_i32 = arith.constant 0 : i32
    %c0_i32_0 = arith.constant 0 : i32
    %c0_i32_1 = arith.constant 0 : i32
    return %c0_i32, %c0_i32_0 : i32, i32
  }
  func.func @transform_16(%arg0: i32) -> (i32, i32) {
    %c0_i32 = arith.constant 0 : i32
    %c0_i32_0 = arith.constant 0 : i32
    return %arg0, %c0_i32 : i32, i32
  }
}

</mosaic_0001>

<bundles_post_ra>
// kernel: lenet5_forward.1
= control target key start
LH: loop header
LB: loop body
LE: loop exit
PB: predicated region body
PF: predicated region fallthrough
CT: control target
= control target key end

     0   :  { %s9244_s0 = inlined_call_operand.vmem [shape: bf16[512,28], index: 0, kind: input, shape index: {}]   ;;  %s9245_s1 = inlined_call_operand.vmem [shape: bf16[5,28,168], index: 1, kind: input, shape index: {}]   ;;  %s9246_s2 = inlined_call_operand.vmem [shape: f32[1,168], index: 2, kind: input, shape index: {}]   ;;  %s9247_s3 = inlined_call_operand.vmem [shape: bf16[112,252], index: 3, kind: input, shape index: {}]   ;;  %s9248_s4 = inlined_call_operand.vmem [shape: bf16[168,84], index: 4, kind: input, shape index: {}]   ;;  %s9249_s5 = inlined_call_operand.vmem [shape: bf16[5,84,160], index: 5, kind: input, shape index: {}]   ;;  %s9250_s6 = inlined_call_operand.vmem [shape: f32[1,160], index: 6, kind: input, shape index: {}]   ;;  %s9251_s7 = inlined_call_operand.vmem [shape: bf16[40,108], index: 7, kind: input, shape index: {}]   ;;  %s9252_s8 = inlined_call_operand.vmem [shape: bf16[160,80], index: 8, kind: input, shape index: {}]   ;;  %s9253_s9 = inlined_call_operand.vmem [shape: bf16[5,80,120], index: 9, kind: input, shape index: {}]   ;;  %s9254_s10 = inlined_call_operand.vmem [shape: f32[1,120], index: 10, kind: input, shape index: {}]   ;;  %s9255_s11 = inlined_call_operand.vmem [shape: bf16[8,36], index: 11, kind: input, shape index: {}]   ;;  %s9256_s12 = inlined_call_operand.vmem [shape: bf16[120,84], index: 12, kind: input, shape index: {}]   ;;  %s9257_s13 = inlined_call_operand.vmem [shape: f32[1,84], index: 13, kind: input, shape index: {}]   ;;  %s9258_s14 = inlined_call_operand.vmem [shape: bf16[84,10], index: 14, kind: input, shape index: {}]   ;;  %s9259_s15 = inlined_call_operand.vmem [shape: f32[1,10], index: 15, kind: input, shape index: {}]   ;;  %s9260_s16 = inlined_call_operand.hbm [shape: f32[16,10], index: 16, kind: output, shape index: {}]  }
   0x1   :  { %9293 = sst [smem:[#allocation52_spill]] %s9244_s0 }
   0x2   :  { %9294 = sst [smem:[#allocation53_spill]] %s9245_s1 }
   0x3   :  { %21 = vsyncpa [#allocation3], 0 }
   0x4   :  { %23 = vsyncpa [#allocation3 + $0x1], 0  ;;  %s6777_s21 = smov 0   ;;  %s6779_s22 = smov 0  }
   0x5   :  { %s6781_s23 = smov 0   ;;  %s6783_s24 = smov 0  }
   0x6 LB: > { %9295 = sst [smem:[#allocation5_spill]] %s6678_s21  ;;  %s6798_s25 = sadd.s32 4294967295, %s6690_s24   ;;  %s6690_s24 = sphi %s6783_s24, %s9484_s24   ;;  %s6686_s23 = sphi %s6781_s23, %s9486_s23   ;;  %s6682_s22 = sphi %s6779_s22, %s9488_s22   ;;  %s6678_s21 = sphi %s6777_s21, %s9487_s21  }
   0x7   : > { %9296 = sst [smem:[#allocation6_spill]] %s6686_s23  ;;  %s5383_s26 = sadd.s32 4294967294, %s6690_s24  }
   0x8   : > { %9297 = sst [smem:[#allocation7_spill]] %s6690_s24  ;;  %s6802_s27 = sadd.s32 1, %s6690_s24  }
   0x9   : > { %9298 = sst [smem:[#allocation8_spill]] %s6802_s27  ;;  %s377_s28 = sadd.s32 1, %s6686_s23 }
   0xa   : > { %s374_s29 = ssub.s32 %s6690_s24, %s6802_s27  ;;  %p387_p0 = scmp.ne.s32.totalorder %s6686_s23, %s6682_s22 }
   0xb   : > { %p375_p1 = scmp.eq.s32.totalorder %s374_s29, 0  ;;  %p388_p2 = scmp.eq.s32.totalorder %s6798_s25, 1 }
   0xc   : > { %p393_p3 = scmp.ne.s32.totalorder %s6682_s22, %s6678_s21  ;;  %p394_p4 = scmp.eq.s32.totalorder %s5383_s26, 1 }
   0xd   : > { %s6813_s30 = scalar_select %p375_p1, %s6686_s23, %s377_s28  }
   0xe   : > { %p6815_p5 = por %p388_p2, %p387_p0  ;;  %p6819_p6 = por %p394_p4, %p393_p3 }
   0xf   : > { %9299 = sst [smem:[#allocation9_spill]] %s6813_s30  ;;  %p5386_p7 = scmp.ge.s32.totalorder %s6690_s24, 1 }
  0x10   : > { %s9301_s17 = scalar_select %p6819_p6, 1, 0 }
  0x11   : > { %p466_p8 = scmp.lt.s32.totalorder %s6690_s24, 3 }
  0x12   : > { %9302 = sst [smem:[#allocation10_spill]] %s9301_s17 }
  0x13   : > { %p467_p9 = pnand %p5386_p7, %p466_p8 }
  0x15   : > { %470 = sbr.rel (%p467_p9) target bundleno = 2757 (0xac5), region = 84 }
  0x1a   : > { %s9303_s1 = sld [smem:[#allocation53_spill]]  ;;  %vm807_vm0 = vcmask 1045504   ;;  %s5388_s28 = sshll.u32 %s6798_s25, 5  ;;  %vm758_vm1 = vcmask 228352   ;;  %vm612_vm2 = vsmask.f32 7424 }
  0x1b   : > { %p517_p10 = scmp.lt.s32.totalorder %s5388_s28, 63  ;;  %s9304_s20 = sld [smem:[#allocation52_spill]]  ;;  %vm1598_vm3 = vsmask.f32 6400  ;;  %vm1247_vm4 = vcmask 1046528   ;;  %vm2754_vm5 = vcmask 1043456  }
  0x1c   : > { %vm2705_vm10 = vcmask 326656   ;;  %s6408_s30 = sshll.u32 %s6798_s25, 3 }
  0x1d   : > { %s9490_s28 = smov (!%p517_p10, %s5388_s28), 63  ;;  %s5319_s17 = scalar_lea.hbm %s9260_s16, %s6408_s30 }
  0x1e   : > { %s5389_s18 = sshll.u32 %s9490_s28, 2  ;;  %s513_s28 = sand.u32 1, %s6682_s22  }
  0x1f   : > { %s5387_s23 = sshll.u32 %s513_s28, 3  ;;  %s5323_s19 = sshll.u32 %s5319_s17, 4  ;;  %s5324_s19 = int_to_ptr.hbm [resolvable:$true] %s5323_s19 }
  0x20   : > { %v5516_v0 = vld [vmem:[%s9303_s1 + $0x10] sm:$0xf]  ;;  %v6430_v1 = vld [vmem:[%s9303_s1 + $0x14] sm:$0x30]  ;;  %v6429_v3 = vld [vmem:[%s9303_s1 + $0x14] sm:$0xf] }
  0x21   : > { %v5517_v2 = vor.u32 %v6430_v1, %v5516_v0  ;;  %v5518_v4 = vld [vmem:[%s9303_s1 + $0x18] sm:$0x30]  ;;  %v5508_v5 = vld [vmem:[%s9303_s1] sm:$0xf]  ;;  %v6428_v7 = vld [vmem:[%s9303_s1 + $0x4] sm:$0xf0]  ;;  %s6881_s26 = scalar_lea.vmem %s9304_s20, %s5389_s18 }
  0x22   : > { %v5521_v6 = vor.u32 %v6429_v3, %v5518_v4  ;;  %v6427_v8 = vld [vmem:[%s9303_s1 + $0x4] sm:$0xf]  ;;  %v5510_v9 = vld [vmem:[%s9303_s1 + $0x8] sm:$0xf0]  ;;  %v5468_v11 = vld [vmem:[%s9303_s1 + $0x30] sm:$0xf]  ;;  %v5509_v14 = vor.u32 %v6428_v7, %v5508_v5 }
  0x23   : > { %v1043_v10 = vsel %vm807_vm0, %v5517_v2, 0  ;;  %v6434_v12 = vld [vmem:[%s9303_s1 + $0x34] sm:$0x30]  ;;  %v6433_v16 = vld [vmem:[%s9303_s1 + $0x34] sm:$0xf]  ;;  %v5513_v18 = vor.u32 %v6427_v8, %v5510_v9  ;;  %v6884_v28 = vld [vmem:[%s6881_s26] sm:$0xff] }
  0x24   : > { %1054 = vmatpush.bf16.msra.mxu2 %v1043_v10  ;;  %v1046_v13 = vsel %vm807_vm0, %v5521_v6, 0  ;;  %v5469_v15 = vor.u32 %v6434_v12, %v5468_v11  ;;  %v5470_v17 = vld [vmem:[%s9303_s1 + $0x38] sm:$0x30]  ;;  %v5460_v20 = vld [vmem:[%s9303_s1 + $0x20] sm:$0xf]  ;;  %v6887_v29 = vld [vmem:[%s6881_s26 + $0x8] sm:$0xff] }
  0x25   : > { %1143 = vmatpush.bf16.msra.mxu3 %v1046_v13  ;;  %v5473_v19 = vor.u32 %v6433_v16, %v5470_v17  ;;  %v6432_v21 = vld [vmem:[%s9303_s1 + $0x24] sm:$0xf0]  ;;  %v6431_v23 = vld [vmem:[%s9303_s1 + $0x24] sm:$0xf]  ;;  %v5462_v24 = vld [vmem:[%s9303_s1 + $0x28] sm:$0xf0] }
  0x26   : > { %v809_v22 = vsel %vm807_vm0, %v5469_v15, 0  ;;  %v5461_v26 = vor.u32 %v6432_v21, %v5460_v20  ;;  %v5465_v27 = vor.u32 %v6431_v23, %v5462_v24  ;;  %v614_v30 = vshrl.u32 %v6884_v28, 16  ;;  %v6906_v37 = vld [vmem:[%s6881_s26 + $0x10] sm:$0xff]  ;;  %v6922_v43 = vld [vmem:[%s6881_s26 + $0x18] sm:$0xff]  ;;  %v6938_v49 = vld [vmem:[%s6881_s26 + $0x20] sm:$0xff]  ;;  %s515_s18 = scalar_lea.vmem [#allocation2], %s5387_s23 }
  0x27   : > { %820 = vmatpush.bf16.msra.mxu0 %v809_v22  ;;  %v812_v25 = vsel %vm807_vm0, %v5473_v19, 0  ;;  %v616_v31 = vshll.u32 %v6884_v28, 16  ;;  %v621_v32 = vshll.u32 %v6887_v29, 16  ;;  %v625_v38 = vshrl.u32 %v6887_v29, 16  ;;  %v6954_v55 = vld [vmem:[%s6881_s26 + $0x28] sm:$0xff]  ;;  %v6970_v61 = vld [vmem:[%s6881_s26 + $0x30] sm:$0xff] }
  0x28   : > { %1055 = vmatpush.bf16.msra.mxu2 %v5509_v14  ;;  %909 = vmatpush.bf16.msra.mxu1 %v812_v25  ;;  %v629_v39 = vshll.u32 %v6906_v37, 16  ;;  %v633_v44 = vshrl.u32 %v6906_v37, 16  ;;  %v9290_v45 = vshll.u32 %v6922_v43, 16  ;;  %v9292_v50 = vshrl.u32 %v6922_v43, 16  ;;  %v6986_v3 = vld [vmem:[%s6881_s26 + $0x38] sm:$0xff]  ;;  %v7002_v9 = vld [vmem:[%s6881_s26 + $0x40] sm:$0xff] }
  0x29   : > { %1144 = vmatpush.bf16.msra.mxu3 %v5513_v18  ;;  %v618_v33 = vrot.slane %v616_v31, 1  ;;  %v623_v34 = vrot.slane %v621_v32, 1  ;;  %v9288_v51 = vshll.u32 %v6938_v49, 16  ;;  %v9289_v56 = vshrl.u32 %v6938_v49, 16  ;;  %v7018_v15 = vld [vmem:[%s6881_s26 + $0x48] sm:$0xff]  ;;  %s5321_s24 = sshll.u32 %s515_s18, 4  ;;  %s5322_s24 = int_to_ptr.vmem [resolvable:$true] %s5321_s24 }
  0x2a   : > { %v631_v41 = vrot.slane %v629_v39, 1  ;;  %v639_v47 = vrot.slane %v9290_v45, 1  ;;  %v9284_v57 = vshll.u32 %v6954_v55, 16  ;;  %v9285_v62 = vshrl.u32 %v6954_v55, 16  ;;  %s5309_s25 = scalar_lea.sflag [#allocation3], %s513_s28  ;;  %s6642_s20 = sshra.s32 %s5324_s19, 4  ;;  %s6643_s20 = int_to_ptr.hbm [resolvable:$true] %s6642_s20 }
  0x2b   : > { %5522 = vmatmul.msk.bf16.vlgmr.msra.gmra.mxu2 %vm758_vm1, %v6884_v28  ;;  %821 = vmatpush.bf16.msra.mxu0 %v5461_v26  ;;  %v619_v35 = vor.u32 %v618_v33, %v614_v30  ;;  %v627_v40 = vor.u32 %v625_v38, %v623_v34  ;;  %v647_v53 = vrot.slane %v9288_v51, 1  ;;  %v9282_v63 = vshll.u32 %v6970_v61, 16  ;;  %s6648_s23 = scalar_lea.hbm %s9260_s16, 16  ;;  %p6649_p0 = scmp.lt.s32.totalorder %s6643_s20, %s9260_s16 }
  0x2c   : > { %5538 = vmatmul.msk.bf16.vlgmr.msra.gmra.mxu3 %vm758_vm1, %v6884_v28  ;;  %910 = vmatpush.bf16.msra.mxu1 %v5465_v27  ;;  %v635_v46 = vor.u32 %v633_v44, %v631_v41  ;;  %v643_v52 = vor.u32 %v9292_v50, %v639_v47  ;;  %v655_v59 = vrot.slane %v9284_v57, 1  ;;  %v9283_v4 = vshrl.u32 %v6970_v61, 16  ;;  %v7038_v27 = vld [vmem:[%s6881_s26 + $0x50] sm:$0xff] }
  0x2d   : > { %v624_v36 = vsel %vm612_vm2, %v619_v35, %v623_v34  ;;  %v632_v42 = vsel %vm612_vm2, %v627_v40, %v631_v41  ;;  %v651_v58 = vor.u32 %v9289_v56, %v647_v53  ;;  %v663_v1 = vrot.slane %v9282_v63, 1 }
  0x2e   : > { %5474 = vmatmul.msk.bf16.vlgmr.msra.gmra.mxu0 %vm758_vm1, %v624_v36  ;;  %v640_v48 = vsel %vm612_vm2, %v635_v46, %v639_v47  ;;  %v648_v54 = vsel %vm612_vm2, %v643_v52, %v647_v53  ;;  %v659_v0 = vor.u32 %v9285_v62, %v655_v59  ;;  %v9280_v5 = vshll.u32 %v6986_v3, 16 }
  0x2f   : > { %5490 = vmatmul.msk.bf16.vlgmr.msra.gmra.mxu1 %vm758_vm1, %v624_v36  ;;  %v656_v60 = vsel %vm612_vm2, %v651_v58, %v655_v59  ;;  %v667_v6 = vor.u32 %v9283_v4, %v663_v1  ;;  %v9281_v10 = vshrl.u32 %v6986_v3, 16  ;;  %v9276_v11 = vshll.u32 %v7002_v9, 16 }
  0x30   : > { %v664_v2 = vsel %vm612_vm2, %v659_v0, %v663_v1  ;;  %v671_v7 = vrot.slane %v9280_v5, 1  ;;  %v9277_v16 = vshrl.u32 %v7002_v9, 16  ;;  %v9274_v17 = vshll.u32 %v7018_v15, 16  ;;  %v7062_v1 = vld [vmem:[%s6881_s26 + $0x58] sm:$0xff] }
  0x31   : > { %v679_v13 = vrot.slane %v9276_v11, 1  ;;  %v9275_v36 = vshrl.u32 %v7018_v15, 16  ;;  %v9272_v40 = vshll.u32 %v7038_v27, 16 }
  0x32   : > { %v672_v8 = vsel %vm612_vm2, %v667_v6, %v671_v7  ;;  %v675_v12 = vor.u32 %v9281_v10, %v671_v7  ;;  %v687_v19 = vrot.slane %v9274_v17, 1  ;;  %v1599_v10 = vrot.slane %v614_v30, 1  ;;  %v6440_v30 = vld [vmem:[%s9303_s1 + $0x64] sm:$0xf0] }
  0x33   : > { %v683_v18 = vor.u32 %v9277_v16, %v679_v13 }
  0x34   : > { %v680_v14 = vsel %vm612_vm2, %v675_v12, %v679_v13  ;;  %v691_v47 = vor.u32 %v9275_v36, %v687_v19  ;;  %v9268_v12 = vshll.u32 %v7062_v1, 16 }
  0x35   : > { %v688_v23 = vsel %vm612_vm2, %v683_v18, %v687_v19 }
  0x3b   : > { %5523 = vmatmul.msk.bf16.gmra.mxu2 %vm758_vm1, %v6887_v29 }
  0x3c   : > { %5539 = vmatmul.msk.bf16.gmra.mxu3 %vm758_vm1, %v6887_v29 }
  0x3e   : > { %5475 = vmatmul.msk.bf16.gmra.mxu0 %vm758_vm1, %v632_v42 }
  0x3f   : > { %5491 = vmatmul.msk.bf16.gmra.mxu1 %vm758_vm1, %v632_v42 }
  0x4b   : > { %5524 = vmatmul.msk.bf16.gmra.mxu2 %vm758_vm1, %v6906_v37 }
  0x4c   : > { %5540 = vmatmul.msk.bf16.gmra.mxu3 %vm758_vm1, %v6906_v37 }
  0x4e   : > { %5476 = vmatmul.msk.bf16.gmra.mxu0 %vm758_vm1, %v640_v48 }
  0x4f   : > { %5492 = vmatmul.msk.bf16.gmra.mxu1 %vm758_vm1, %v640_v48  ;;  %v695_v48 = vrot.slane %v9272_v40, 1 }
  0x51   : > { %v696_v58 = vsel %vm612_vm2, %v691_v47, %v695_v48 }
  0x5b   : > { %5525 = vmatmul.msk.bf16.gmra.mxu2 %vm758_vm1, %v6922_v43 }
  0x5c   : > { %5541 = vmatmul.msk.bf16.gmra.mxu3 %vm758_vm1, %v6922_v43 }
  0x5e   : > { %5477 = vmatmul.msk.bf16.gmra.mxu0 %vm758_vm1, %v648_v54 }
  0x5f   : > { %5493 = vmatmul.msk.bf16.gmra.mxu1 %vm758_vm1, %v648_v54 }
  0x6b   : > { %5526 = vmatmul.msk.bf16.gmra.mxu2 %vm758_vm1, %v6938_v49 }
  0x6c   : > { %5542 = vmatmul.msk.bf16.gmra.mxu3 %vm758_vm1, %v6938_v49 }
  0x6e   : > { %5478 = vmatmul.msk.bf16.gmra.mxu0 %vm758_vm1, %v656_v60 }
  0x6f   : > { %5494 = vmatmul.msk.bf16.gmra.mxu1 %vm758_vm1, %v656_v60 }
  0x7b   : > { %5527 = vmatmul.msk.bf16.gmra.mxu2 %vm758_vm1, %v6954_v55 }
  0x7c   : > { %5543 = vmatmul.msk.bf16.gmra.mxu3 %vm758_vm1, %v6954_v55 }
  0x7e   : > { %5479 = vmatmul.msk.bf16.gmra.mxu0 %vm758_vm1, %v664_v2 }
  0x7f   : > { %5495 = vmatmul.msk.bf16.gmra.mxu1 %vm758_vm1, %v664_v2 }
  0x8b   : > { %5528 = vmatmul.msk.bf16.gmra.mxu2 %vm758_vm1, %v6970_v61 }
  0x8c   : > { %5544 = vmatmul.msk.bf16.gmra.mxu3 %vm758_vm1, %v6970_v61 }
  0x8e   : > { %5480 = vmatmul.msk.bf16.gmra.mxu0 %vm758_vm1, %v672_v8 }
  0x8f   : > { %5496 = vmatmul.msk.bf16.gmra.mxu1 %vm758_vm1, %v672_v8  ;;  %v9273_v8 = vshrl.u32 %v7038_v27, 16 }
  0x91   : > { %v699_v19 = vor.u32 %v9273_v8, %v695_v48 }
  0x9b   : > { %5529 = vmatmul.msk.bf16.gmra.mxu2 %vm758_vm1, %v6986_v3 }
  0x9c   : > { %5545 = vmatmul.msk.bf16.gmra.mxu3 %vm758_vm1, %v6986_v3 }
  0x9e   : > { %5481 = vmatmul.msk.bf16.gmra.mxu0 %vm758_vm1, %v680_v14 }
  0x9f   : > { %5497 = vmatmul.msk.bf16.gmra.mxu1 %vm758_vm1, %v680_v14 }
  0xab   : > { %5530 = vmatmul.msk.bf16.gmra.mxu2 %vm758_vm1, %v7002_v9  ;;  %v823_v21 = vpop.f32.mrf.mxu0 }
  0xac   : > { %5546 = vmatmul.msk.bf16.gmra.mxu3 %vm758_vm1, %v7002_v9  ;;  %v912_v22 = vpop.f32.mrf.mxu1 }
  0xae   : > { %v1057_v20 = vpop.f32.mrf.mxu2  ;;  %5482 = vmatmul.msk.bf16.gmra.mxu0 %vm758_vm1, %v688_v23 }
  0xaf   : > { %v7031_v24 = vadd.f32 %v1057_v20, %v823_v21  ;;  %v1146_v25 = vpop.f32.mrf.mxu3  ;;  %5498 = vmatmul.msk.bf16.gmra.mxu1 %vm758_vm1, %v688_v23  ;;  %v703_v20 = vrot.slane %v9268_v12, 1 }
  0xb0   : > { %v7033_v26 = vadd.f32 %v1146_v25, %v912_v22 }
  0xb1   : > { %v704_v25 = vsel %vm612_vm2, %v699_v19, %v703_v20 }
  0xb3   : > { %v825_v34 = vpop.f32.mrf.mxu0 }
  0xb4   : > { %v914_v35 = vpop.f32.mrf.mxu1 }
  0xb6   : > { %v1059_v33 = vpop.f32.mrf.mxu2 }
  0xb7   : > { %v7042_v41 = vadd.f32 %v1059_v33, %v825_v34  ;;  %v1148_v42 = vpop.f32.mrf.mxu3 }
  0xb8   : > { %v7044_v46 = vadd.f32 %v1148_v42, %v914_v35  ;;  %v7086_v42 = vld [vmem:[%s6881_s26 + $0x60] sm:$0xff] }
  0xbb   : > { %5531 = vmatmul.msk.bf16.gmra.mxu2 %vm758_vm1, %v7018_v15  ;;  %v828_v53 = vpop.f32.mrf.mxu0 }
  0xbc   : > { %5547 = vmatmul.msk.bf16.gmra.mxu3 %vm758_vm1, %v7018_v15  ;;  %v917_v54 = vpop.f32.mrf.mxu1 }
  0xbe   : > { %v1062_v52 = vpop.f32.mrf.mxu2  ;;  %5483 = vmatmul.msk.bf16.gmra.mxu0 %vm758_vm1, %v696_v58 }
  0xbf   : > { %v7055_v59 = vadd.f32 %v1062_v52, %v828_v53  ;;  %v1151_v60 = vpop.f32.mrf.mxu3  ;;  %5499 = vmatmul.msk.bf16.gmra.mxu1 %vm758_vm1, %v696_v58  ;;  %v9269_v53 = vshrl.u32 %v7062_v1, 16 }
  0xc0   : > { %v7057_v0 = vadd.f32 %v1151_v60, %v917_v54  ;;  %v9267_v54 = vshll.u32 %v7086_v42, 16 }
  0xc3   : > { %v830_v6 = vpop.f32.mrf.mxu0 }
  0xc4   : > { %v919_v7 = vpop.f32.mrf.mxu1 }
  0xc6   : > { %v1064_v2 = vpop.f32.mrf.mxu2 }
  0xc7   : > { %v7066_v13 = vadd.f32 %v1064_v2, %v830_v6  ;;  %v1153_v14 = vpop.f32.mrf.mxu3  ;;  %v707_v6 = vor.u32 %v9269_v53, %v703_v20  ;;  %v7110_v20 = vld [vmem:[%s6881_s26 + $0x68] sm:$0xff] }
  0xc8   : > { %v7068_v18 = vadd.f32 %v1153_v14, %v919_v7  ;;  %v711_v7 = vrot.slane %v9267_v54, 1  ;;  %v9270_v54 = vshll.u32 %v7110_v20, 16  ;;  %v9279_v36 = vshrl.u32 %v7110_v20, 16 }
  0xcb   : > { %5532 = vmatmul.msk.bf16.gmra.mxu2 %vm758_vm1, %v7038_v27  ;;  %v833_v22 = vpop.f32.mrf.mxu0 }
  0xcc   : > { %5548 = vmatmul.msk.bf16.gmra.mxu3 %vm758_vm1, %v7038_v27  ;;  %v922_v23 = vpop.f32.mrf.mxu1 }
  0xce   : > { %v1067_v21 = vpop.f32.mrf.mxu2  ;;  %5484 = vmatmul.msk.bf16.gmra.mxu0 %vm758_vm1, %v704_v25 }
  0xcf   : > { %v7079_v33 = vadd.f32 %v1067_v21, %v833_v22  ;;  %v1156_v34 = vpop.f32.mrf.mxu3  ;;  %5500 = vmatmul.msk.bf16.gmra.mxu1 %vm758_vm1, %v704_v25  ;;  %v712_v22 = vsel %vm612_vm2, %v707_v6, %v711_v7 }
  0xd0   : > { %v7081_v35 = vadd.f32 %v1156_v34, %v922_v23 }
  0xd3   : > { %v835_v48 = vpop.f32.mrf.mxu0 }
  0xd4   : > { %v924_v52 = vpop.f32.mrf.mxu1 }
  0xd6   : > { %v1069_v47 = vpop.f32.mrf.mxu2 }
  0xd7   : > { %v7090_v58 = vadd.f32 %v1069_v47, %v835_v48  ;;  %v1158_v60 = vpop.f32.mrf.mxu3 }
  0xd8   : > { %v7092_v2 = vadd.f32 %v1158_v60, %v924_v52  ;;  %v9271_v60 = vshrl.u32 %v7086_v42, 16 }
  0xdb   : > { %5533 = vmatmul.msk.bf16.gmra.mxu2 %vm758_vm1, %v7062_v1  ;;  %v838_v19 = vpop.f32.mrf.mxu0 }
  0xdc   : > { %5549 = vmatmul.msk.bf16.gmra.mxu3 %vm758_vm1, %v7062_v1  ;;  %v927_v21 = vpop.f32.mrf.mxu1 }
  0xde   : > { %v1072_v14 = vpop.f32.mrf.mxu2  ;;  %5485 = vmatmul.msk.bf16.gmra.mxu0 %vm758_vm1, %v712_v22 }
  0xdf   : > { %v7103_v23 = vadd.f32 %v1072_v14, %v838_v19  ;;  %v1161_v25 = vpop.f32.mrf.mxu3  ;;  %5501 = vmatmul.msk.bf16.gmra.mxu1 %vm758_vm1, %v712_v22  ;;  %v715_v19 = vor.u32 %v9271_v60, %v711_v7  ;;  %v5568_v7 = vld [vmem:[%s9303_s1 + $0x50] sm:$0xf] }
  0xe0   : > { %v7105_v34 = vadd.f32 %v1161_v25, %v927_v21  ;;  %v719_v21 = vrot.slane %v9270_v54, 1  ;;  %v6438_v54 = vld [vmem:[%s9303_s1 + $0x54] sm:$0x30] }
  0xe3   : > { %v840_v48 = vpop.f32.mrf.mxu0 }
  0xe4   : > { %v929_v52 = vpop.f32.mrf.mxu1 }
  0xe6   : > { %v1074_v47 = vpop.f32.mrf.mxu2 }
  0xe7   : > { %v7114_v12 = vadd.f32 %v1074_v47, %v840_v48  ;;  %v1163_v6 = vpop.f32.mrf.mxu3  ;;  %v720_v48 = vsel %vm612_vm2, %v715_v19, %v719_v21  ;;  %v6437_v19 = vld [vmem:[%s9303_s1 + $0x54] sm:$0xf] }
  0xe8   : > { %v7116_v14 = vadd.f32 %v1163_v6, %v929_v52 }
  0xeb   : > { %5534 = vmatmul.msk.bf16.gmra.mxu2 %vm758_vm1, %v7086_v42  ;;  %v843_v25 = vpop.f32.mrf.mxu0 }
  0xec   : > { %5550 = vmatmul.msk.bf16.gmra.mxu3 %vm758_vm1, %v7086_v42  ;;  %v932_v47 = vpop.f32.mrf.mxu1 }
  0xee   : > { %v1077_v22 = vpop.f32.mrf.mxu2  ;;  %5486 = vmatmul.msk.bf16.gmra.mxu0 %vm758_vm1, %v720_v48 }
  0xef   : > { %v7127_v52 = vadd.f32 %v1077_v22, %v843_v25  ;;  %v1166_v6 = vpop.f32.mrf.mxu3  ;;  %5502 = vmatmul.msk.bf16.gmra.mxu1 %vm758_vm1, %v720_v48  ;;  %v7143_v22 = vld [vmem:[%s6881_s26 + $0x70] sm:$0xff]  ;;  %v5569_v25 = vor.u32 %v6438_v54, %v5568_v7 }
  0xf0   : > { %v7129_v53 = vadd.f32 %v1166_v6, %v932_v47  ;;  %v5570_v47 = vld [vmem:[%s9303_s1 + $0x58] sm:$0x30]  ;;  %v9278_v11 = vshll.u32 %v7143_v22, 16 }
  0xf1   : > { %v5573_v48 = vor.u32 %v6437_v19, %v5570_v47  ;;  %v1346_v6 = vsel %vm807_vm0, %v5569_v25, 0  ;;  %v723_v19 = vor.u32 %v9279_v36, %v719_v21  ;;  %v7172_v21 = vld [vmem:[%s6881_s26 + $0x78] sm:$0xff] }
  0xf2   : > { %1357 = vmatpush.bf16.msrb.mxu0 %v1346_v6  ;;  %v727_v25 = vrot.slane %v9278_v11, 1  ;;  %v6442_v11 = vld [vmem:[%s9303_s1 + $0x74] sm:$0x30] }
  0xf3   : > { %v1349_v40 = vsel %vm807_vm0, %v5573_v48, 0  ;;  %v845_v8 = vpop.f32.mrf.mxu0 }
  0xf4   : > { %v934_v17 = vpop.f32.mrf.mxu1  ;;  %1446 = vmatpush.bf16.msrb.mxu1 %v1349_v40 }
  0xf6   : > { %v1079_v60 = vpop.f32.mrf.mxu2 }
  0xf7   : > { %v7152_v16 = vadd.f32 %v1079_v60, %v845_v8  ;;  %v1168_v54 = vpop.f32.mrf.mxu3  ;;  %v728_v60 = vsel %vm612_vm2, %v723_v19, %v727_v25  ;;  %v6441_v19 = vld [vmem:[%s9303_s1 + $0x74] sm:$0xf] }
  0xf8   : > { %v7154_v7 = vadd.f32 %v1168_v54, %v934_v17  ;;  %v5620_v54 = vld [vmem:[%s9303_s1 + $0x70] sm:$0xf] }
  0xfb   : > { %5535 = vmatmul.msk.bf16.gmra.mxu2 %vm758_vm1, %v7110_v20  ;;  %v848_v40 = vpop.f32.mrf.mxu0 }
  0xfc   : > { %5551 = vmatmul.msk.bf16.gmra.mxu3 %vm758_vm1, %v7110_v20  ;;  %v937_v8 = vpop.f32.mrf.mxu1 }
  0xfe   : > { %v1082_v47 = vpop.f32.mrf.mxu2  ;;  %5487 = vmatmul.msk.bf16.gmra.mxu0 %vm758_vm1, %v728_v60 }
  0xff   : > { %v7165_v48 = vadd.f32 %v1082_v47, %v848_v40  ;;  %v1171_v17 = vpop.f32.mrf.mxu3  ;;  %5503 = vmatmul.msk.bf16.gmra.mxu1 %vm758_vm1, %v728_v60  ;;  %v5621_v47 = vor.u32 %v6442_v11, %v5620_v54  ;;  %v5622_v40 = vld [vmem:[%s9303_s1 + $0x78] sm:$0x30]  ;;  %v1603_v60 = vrot.slane %v621_v32, 2  ;;  %v9287_v11 = vshrl.u32 %v7143_v22, 16 }
 0x100   : > { %v7167_v6 = vadd.f32 %v1171_v17, %v937_v8  ;;  %v5625_v8 = vor.u32 %v6441_v19, %v5622_v40  ;;  %v1602_v17 = vrot.slane %v625_v38, 1  ;;  %v9286_v54 = vshll.u32 %v7172_v21, 16  ;;  %v5612_v38 = vld [vmem:[%s9303_s1 + $0x60] sm:$0xf] }
 0x101   : > { %v1729_v5 = vsel %vm807_vm0, %v5621_v47, 0  ;;  %v6439_v47 = vld [vmem:[%s9303_s1 + $0x64] sm:$0xf]  ;;  %v731_v62 = vor.u32 %v9287_v11, %v727_v25 }
 0x102   : > { %1740 = vmatpush.bf16.msrb.mxu2 %v1729_v5  ;;  %v1732_v19 = vsel %vm807_vm0, %v5625_v8, 0  ;;  %v5613_v5 = vor.u32 %v6440_v30, %v5612_v38  ;;  %v6435_v25 = vld [vmem:[%s9303_s1 + $0x44] sm:$0xf]  ;;  %v5562_v38 = vld [vmem:[%s9303_s1 + $0x48] sm:$0xf0] }
 0x103   : > { %v850_v63 = vpop.f32.mrf.mxu0  ;;  %1829 = vmatpush.bf16.msrb.mxu3 %v1732_v19  ;;  %v7214_v19 = vor.u32 %v1603_v60, %v1602_v17  ;;  %v6436_v60 = vld [vmem:[%s9303_s1 + $0x44] sm:$0xf0] }
 0x104   : > { %v939_v4 = vpop.f32.mrf.mxu1 }
 0x106   : > { %v1084_v36 = vpop.f32.mrf.mxu2  ;;  %1741 = vmatpush.bf16.msrb.mxu2 %v5613_v5 }
 0x107   : > { %v7196_v40 = vadd.f32 %v1084_v36, %v850_v63  ;;  %v1173_v32 = vpop.f32.mrf.mxu3  ;;  %v5614_v63 = vld [vmem:[%s9303_s1 + $0x68] sm:$0xf0]  ;;  %v1600_v36 = vrot.slane %v616_v31, 2  ;;  %v5560_v31 = vld [vmem:[%s9303_s1 + $0x40] sm:$0xf] }
 0x108   : > { %v7207_v57 = vadd.f32 %v1173_v32, %v939_v4  ;;  %v5617_v8 = vor.u32 %v6439_v47, %v5614_v63  ;;  %v735_v4 = vrot.slane %v9286_v54, 1  ;;  %v5561_v17 = vor.u32 %v6436_v60, %v5560_v31 }
 0x109   : > { %v1601_v32 = vor.u32 %v1600_v36, %v1599_v10  ;;  %v5565_v47 = vor.u32 %v6435_v25, %v5562_v38 }
 0x10a   : > { %1830 = vmatpush.bf16.msrb.mxu3 %v5617_v8  ;;  %v736_v36 = vsel %vm612_vm2, %v731_v62, %v735_v4  ;;  %1358 = vmatpush.bf16.msrb.mxu0 %v5561_v17  ;;  %v9291_v62 = vshrl.u32 %v7172_v21, 16 }
 0x10b   : > { %5536 = vmatmul.msk.bf16.gmra.mxu2 %vm758_vm1, %v7143_v22  ;;  %v1605_v10 = vsel %vm1598_vm3, %v1601_v32, %v7214_v19  ;;  %v853_v5 = vpop.f32.mrf.mxu0  ;;  %1447 = vmatpush.bf16.msrb.mxu1 %v5565_v47 }
 0x10c   : > { %5552 = vmatmul.msk.bf16.gmra.mxu3 %vm758_vm1, %v7143_v22  ;;  %v942_v63 = vpop.f32.mrf.mxu1  ;;  %v739_v17 = vor.u32 %v9291_v62, %v735_v4  ;;  %v1248_v4 = vrot.slane %v6884_v28, 1 }
 0x10e   : > { %v1087_v30 = vpop.f32.mrf.mxu2  ;;  %5488 = vmatmul.msk.bf16.gmra.mxu0 %vm758_vm1, %v736_v36 }
 0x10f   : > { %v7239_v54 = vadd.f32 %v1087_v30, %v853_v5  ;;  %v1176_v11 = vpop.f32.mrf.mxu3  ;;  %5504 = vmatmul.msk.bf16.gmra.mxu1 %vm758_vm1, %v736_v36 }
 0x110   : > { %v7241_v8 = vadd.f32 %v1176_v11, %v942_v63 }
 0x113   : > { %v855_v31 = vpop.f32.mrf.mxu0 }
 0x114   : > { %v944_v60 = vpop.f32.mrf.mxu1 }
 0x116   : > { %v1089_v32 = vpop.f32.mrf.mxu2 }
 0x117   : > { %v7245_v51 = vadd.f32 %v1089_v32, %v855_v31  ;;  %v1178_v25 = vpop.f32.mrf.mxu3 }
 0x118   : > { %v7247_v38 = vadd.f32 %v1178_v25, %v944_v60 }
 0x11b   : > { %5537 = vmatmul.msk.bf16.gmra.mxu2 %vm758_vm1, %v7172_v21  ;;  %v858_v30 = vpop.f32.mrf.mxu0 }
 0x11c   : > { %5553 = vmatmul.msk.bf16.gmra.mxu3 %vm758_vm1, %v7172_v21  ;;  %v947_v47 = vpop.f32.mrf.mxu1 }
 0x11e   : > { %v1092_v11 = vpop.f32.mrf.mxu2  ;;  %5489 = vmatmul.msk.bf16.gmra.mxu0 %vm758_vm1, %v739_v17 }
 0x11f   : > { %v7256_v5 = vadd.f32 %v1092_v11, %v858_v30  ;;  %v1181_v63 = vpop.f32.mrf.mxu3  ;;  %5505 = vmatmul.msk.bf16.gmra.mxu1 %vm758_vm1, %v739_v17  ;;  %v1249_v11 = vrot.slane %v6887_v29, 1 }
 0x120   : > { %v7258_v36 = vadd.f32 %v1181_v63, %v947_v47 }
 0x121   : > { %v1250_v63 = vsel %vm1247_vm4, %v1248_v4, %v1249_v11 }
 0x123   : > { %v860_v31 = vpop.f32.mrf.mxu0 }
 0x124   : > { %v949_v60 = vpop.f32.mrf.mxu1 }
 0x126   : > { %v1094_v32 = vpop.f32.mrf.mxu2 }
 0x127   : > { %v7262_v25 = vadd.f32 %v1094_v32, %v860_v31  ;;  %v1183_v56 = vpop.f32.mrf.mxu3  ;;  %v1607_v31 = vrot.slane %v629_v39, 2  ;;  %v1251_v39 = vrot.slane %v6906_v37, 1 }
 0x128   : > { %v7264_v45 = vadd.f32 %v1183_v56, %v949_v60  ;;  %v1606_v56 = vrot.slane %v633_v44, 1 }
 0x12a   : > { %v1608_v29 = vor.u32 %v1607_v31, %v1606_v56  ;;  %v1252_v56 = vsel %vm1247_vm4, %v1249_v11, %v1251_v39 }
 0x12b   : > { %5626 = vmatmul.msk.bf16.vlgmr.msrb.gmra.mxu2 %vm758_vm1, %v1605_v10  ;;  %v863_v47 = vpop.f32.mrf.mxu0 }
 0x12c   : > { %5642 = vmatmul.msk.bf16.vlgmr.msrb.gmra.mxu3 %vm758_vm1, %v1605_v10  ;;  %v952_v17 = vpop.f32.mrf.mxu1 }
 0x12e   : > { %v1097_v30 = vpop.f32.mrf.mxu2  ;;  %5574 = vmatmul.msk.bf16.vlgmr.msrb.gmra.mxu0 %vm758_vm1, %v1250_v63 }
 0x12f   : > { %v7271_v62 = vadd.f32 %v1097_v30, %v863_v47  ;;  %v1186_v32 = vpop.f32.mrf.mxu3  ;;  %5590 = vmatmul.msk.bf16.vlgmr.msrb.gmra.mxu1 %vm758_vm1, %v1250_v63  ;;  %v1609_v47 = vsel %vm1598_vm3, %v7214_v19, %v1608_v29 }
 0x130   : > { %v7277_v28 = vadd.f32 %v1186_v32, %v952_v17 }
 0x132   : > { %9305 = vst [vmem:[#allocation11_spill] sm:$0xff] %v7277_v28 }
 0x133   : > { %v865_v60 = vpop.f32.mrf.mxu0 }
 0x134   : > { %v954_v50 = vpop.f32.mrf.mxu1 }
 0x136   : > { %v1099_v10 = vpop.f32.mrf.mxu2 }
 0x137   : > { %v7281_v4 = vadd.f32 %v1099_v10, %v865_v60  ;;  %v1188_v30 = vpop.f32.mrf.mxu3  ;;  %v9309_v60 = vshrl.u32 %v6922_v43, 16 }
 0x138   : > { %v7285_v44 = vadd.f32 %v1188_v30, %v954_v50  ;;  %v9310_v50 = vshll.u32 %v6922_v43, 16 }
 0x139   : > { %9306 = vst [vmem:[#allocation12_spill] sm:$0xff] %v7281_v4  ;;  %v1610_v4 = vrot.slane %v9309_v60, 1 }
 0x13a   : > { %9307 = vst [vmem:[#allocation13_spill] sm:$0xff] %v7285_v44  ;;  %v1611_v19 = vrot.slane %v9310_v50, 2 }
 0x13b   : > { %5627 = vmatmul.msk.bf16.gmra.mxu2 %vm758_vm1, %v1609_v47  ;;  %v868_v63 = vpop.f32.mrf.mxu0 }
 0x13c   : > { %5643 = vmatmul.msk.bf16.gmra.mxu3 %vm758_vm1, %v1609_v47  ;;  %v957_v32 = vpop.f32.mrf.mxu1  ;;  %v1612_v37 = vor.u32 %v1611_v19, %v1610_v4  ;;  %v9314_v19 = vshrl.u32 %v6938_v49, 16 }
 0x13e   : > { %v1102_v17 = vpop.f32.mrf.mxu2  ;;  %5575 = vmatmul.msk.bf16.gmra.mxu0 %vm758_vm1, %v1252_v56 }
 0x13f   : > { %v7291_v31 = vadd.f32 %v1102_v17, %v868_v63  ;;  %v1191_v10 = vpop.f32.mrf.mxu3  ;;  %5591 = vmatmul.msk.bf16.gmra.mxu1 %vm758_vm1, %v1252_v56  ;;  %v1613_v63 = vsel %vm1598_vm3, %v1608_v29, %v1612_v37 }
 0x140   : > { %v7297_v30 = vadd.f32 %v1191_v10, %v957_v32  ;;  %v1253_v32 = vrot.slane %v6922_v43, 1 }
 0x141   : > { %9308 = vst [vmem:[#allocation14_spill] sm:$0xff] %v7291_v31 }
 0x142   : > { %v1254_v4 = vsel %vm1247_vm4, %v1251_v39, %v1253_v32 }
 0x143   : > { %v870_v44 = vpop.f32.mrf.mxu0 }
 0x144   : > { %v959_v28 = vpop.f32.mrf.mxu1 }
 0x146   : > { %v1104_v47 = vpop.f32.mrf.mxu2 }
 0x147   : > { %v7301_v11 = vadd.f32 %v1104_v47, %v870_v44  ;;  %v1193_v17 = vpop.f32.mrf.mxu3  ;;  %v1614_v47 = vrot.slane %v9314_v19, 1 }
 0x148   : > { %v7304_v31 = vadd.f32 %v1193_v17, %v959_v28  ;;  %v9315_v28 = vshll.u32 %v6938_v49, 16 }
 0x149   : > { %9311 = vst [vmem:[#allocation15_spill] sm:$0xff] %v7301_v11 }
 0x14a   : > { %9312 = vst [vmem:[#allocation16_spill] sm:$0xff] %v7304_v31  ;;  %v1615_v29 = vrot.slane %v9315_v28, 2 }
 0x14b   : > { %5628 = vmatmul.msk.bf16.gmra.mxu2 %vm758_vm1, %v1613_v63  ;;  %v873_v60 = vpop.f32.mrf.mxu0 }
 0x14c   : > { %5644 = vmatmul.msk.bf16.gmra.mxu3 %vm758_vm1, %v1613_v63  ;;  %v962_v56 = vpop.f32.mrf.mxu1  ;;  %v1616_v43 = vor.u32 %v1615_v29, %v1614_v47  ;;  %v9319_v29 = vshrl.u32 %v6954_v55, 16 }
 0x14e   : > { %v1107_v10 = vpop.f32.mrf.mxu2  ;;  %5576 = vmatmul.msk.bf16.gmra.mxu0 %vm758_vm1, %v1254_v4 }
 0x14f   : > { %v7310_v50 = vadd.f32 %v1107_v10, %v873_v60  ;;  %v1196_v44 = vpop.f32.mrf.mxu3  ;;  %5592 = vmatmul.msk.bf16.gmra.mxu1 %vm758_vm1, %v1254_v4  ;;  %v1617_v60 = vsel %vm1598_vm3, %v1612_v37, %v1616_v43  ;;  %v9320_v37 = vshll.u32 %v6954_v55, 16 }
 0x150   : > { %v7316_v17 = vadd.f32 %v1196_v44, %v962_v56  ;;  %v1255_v56 = vrot.slane %v6938_v49, 1 }
 0x151   : > { %9313 = vst [vmem:[#allocation17_spill] sm:$0xff] %v7310_v50 }
 0x152   : > { %v1256_v47 = vsel %vm1247_vm4, %v1253_v32, %v1255_v56 }
 0x153   : > { %v875_v31 = vpop.f32.mrf.mxu0 }
 0x154   : > { %v964_v11 = vpop.f32.mrf.mxu1 }
 0x156   : > { %v1109_v63 = vpop.f32.mrf.mxu2 }
 0x157   : > { %v7320_v39 = vadd.f32 %v1109_v63, %v875_v31  ;;  %v1198_v10 = vpop.f32.mrf.mxu3  ;;  %v1618_v63 = vrot.slane %v9319_v29, 1 }
 0x158   : > { %v7323_v50 = vadd.f32 %v1198_v10, %v964_v11  ;;  %v1619_v11 = vrot.slane %v9320_v37, 2 }
 0x159   : > { %9316 = vst [vmem:[#allocation18_spill] sm:$0xff] %v7320_v39 }
 0x15a   : > { %9317 = vst [vmem:[#allocation19_spill] sm:$0xff] %v7323_v50  ;;  %v1620_v49 = vor.u32 %v1619_v11, %v1618_v63  ;;  %v9324_v11 = vshrl.u32 %v6970_v61, 16 }
 0x15b   : > { %5629 = vmatmul.msk.bf16.gmra.mxu2 %vm758_vm1, %v1617_v60  ;;  %v878_v19 = vpop.f32.mrf.mxu0 }
 0x15c   : > { %5645 = vmatmul.msk.bf16.gmra.mxu3 %vm758_vm1, %v1617_v60  ;;  %v967_v4 = vpop.f32.mrf.mxu1 }
 0x15e   : > { %v1112_v44 = vpop.f32.mrf.mxu2  ;;  %5577 = vmatmul.msk.bf16.gmra.mxu0 %vm758_vm1, %v1256_v47 }
 0x15f   : > { %v7329_v28 = vadd.f32 %v1112_v44, %v878_v19  ;;  %v1201_v31 = vpop.f32.mrf.mxu3  ;;  %5593 = vmatmul.msk.bf16.gmra.mxu1 %vm758_vm1, %v1256_v47  ;;  %v1621_v19 = vsel %vm1598_vm3, %v1616_v43, %v1620_v49  ;;  %v9325_v43 = vshll.u32 %v6970_v61, 16 }
 0x160   : > { %v7335_v10 = vadd.f32 %v1201_v31, %v967_v4  ;;  %v1257_v4 = vrot.slane %v6954_v55, 1 }
 0x161   : > { %9318 = vst [vmem:[#allocation20_spill] sm:$0xff] %v7329_v28 }
 0x162   : > { %v1258_v63 = vsel %vm1247_vm4, %v1255_v56, %v1257_v4 }
 0x163   : > { %v880_v50 = vpop.f32.mrf.mxu0 }
 0x164   : > { %v969_v39 = vpop.f32.mrf.mxu1 }
 0x166   : > { %v1114_v60 = vpop.f32.mrf.mxu2 }
 0x167   : > { %v7339_v32 = vadd.f32 %v1114_v60, %v880_v50  ;;  %v1203_v44 = vpop.f32.mrf.mxu3  ;;  %v1622_v60 = vrot.slane %v9324_v11, 1 }
 0x168   : > { %v7342_v28 = vadd.f32 %v1203_v44, %v969_v39  ;;  %v1623_v39 = vrot.slane %v9325_v43, 2 }
 0x169   : > { %9321 = vst [vmem:[#allocation21_spill] sm:$0xff] %v7339_v32 }
 0x16a   : > { %9322 = vst [vmem:[#allocation22_spill] sm:$0xff] %v7342_v28  ;;  %v1624_v55 = vor.u32 %v1623_v39, %v1622_v60  ;;  %v9329_v39 = vshrl.u32 %v6986_v3, 16 }
 0x16b   : > { %5630 = vmatmul.msk.bf16.gmra.mxu2 %vm758_vm1, %v1621_v19  ;;  %v883_v29 = vpop.f32.mrf.mxu0 }
 0x16c   : > { %5646 = vmatmul.msk.bf16.gmra.mxu3 %vm758_vm1, %v1621_v19  ;;  %v972_v47 = vpop.f32.mrf.mxu1 }
 0x16e   : > { %v1117_v31 = vpop.f32.mrf.mxu2  ;;  %5578 = vmatmul.msk.bf16.gmra.mxu0 %vm758_vm1, %v1258_v63 }
 0x16f   : > { %v7348_v37 = vadd.f32 %v1117_v31, %v883_v29  ;;  %v1206_v50 = vpop.f32.mrf.mxu3  ;;  %5594 = vmatmul.msk.bf16.gmra.mxu1 %vm758_vm1, %v1258_v63  ;;  %v1625_v29 = vsel %vm1598_vm3, %v1620_v49, %v1624_v55  ;;  %v9330_v49 = vshll.u32 %v6986_v3, 16 }
 0x170   : > { %v7354_v44 = vadd.f32 %v1206_v50, %v972_v47  ;;  %v1259_v47 = vrot.slane %v6970_v61, 1 }
 0x171   : > { %9323 = vst [vmem:[#allocation23_spill] sm:$0xff] %v7348_v37 }
 0x172   : > { %v1260_v60 = vsel %vm1247_vm4, %v1257_v4, %v1259_v47 }
 0x173   : > { %v885_v28 = vpop.f32.mrf.mxu0 }
 0x174   : > { %v974_v32 = vpop.f32.mrf.mxu1 }
 0x176   : > { %v1119_v19 = vpop.f32.mrf.mxu2 }
 0x177   : > { %v7358_v56 = vadd.f32 %v1119_v19, %v885_v28  ;;  %v1208_v31 = vpop.f32.mrf.mxu3  ;;  %v1626_v19 = vrot.slane %v9329_v39, 1 }
 0x178   : > { %v7361_v37 = vadd.f32 %v1208_v31, %v974_v32  ;;  %v1627_v32 = vrot.slane %v9330_v49, 2 }
 0x179   : > { %9326 = vst [vmem:[#allocation24_spill] sm:$0xff] %v7358_v56 }
 0x17a   : > { %9327 = vst [vmem:[#allocation25_spill] sm:$0xff] %v7361_v37  ;;  %v1628_v61 = vor.u32 %v1627_v32, %v1626_v19  ;;  %v9334_v32 = vshrl.u32 %v7002_v9, 16 }
 0x17b   : > { %5631 = vmatmul.msk.bf16.gmra.mxu2 %vm758_vm1, %v1625_v29  ;;  %v888_v11 = vpop.f32.mrf.mxu0 }
 0x17c   : > { %5647 = vmatmul.msk.bf16.gmra.mxu3 %vm758_vm1, %v1625_v29  ;;  %v977_v63 = vpop.f32.mrf.mxu1 }
 0x17e   : > { %v1122_v50 = vpop.f32.mrf.mxu2  ;;  %5579 = vmatmul.msk.bf16.gmra.mxu0 %vm758_vm1, %v1260_v60 }
 0x17f   : > { %v7367_v43 = vadd.f32 %v1122_v50, %v888_v11  ;;  %v1211_v28 = vpop.f32.mrf.mxu3  ;;  %5595 = vmatmul.msk.bf16.gmra.mxu1 %vm758_vm1, %v1260_v60  ;;  %v1629_v11 = vsel %vm1598_vm3, %v1624_v55, %v1628_v61  ;;  %v9335_v55 = vshll.u32 %v7002_v9, 16 }
 0x180   : > { %v7373_v31 = vadd.f32 %v1211_v28, %v977_v63  ;;  %v1261_v63 = vrot.slane %v6986_v3, 1 }
 0x181   : > { %9328 = vst [vmem:[#allocation26_spill] sm:$0xff] %v7367_v43 }
 0x182   : > { %v1262_v19 = vsel %vm1247_vm4, %v1259_v47, %v1261_v63 }
 0x183   : > { %v890_v37 = vpop.f32.mrf.mxu0 }
 0x184   : > { %v979_v56 = vpop.f32.mrf.mxu1 }
 0x186   : > { %v1124_v29 = vpop.f32.mrf.mxu2 }
 0x187   : > { %v7377_v4 = vadd.f32 %v1124_v29, %v890_v37  ;;  %v1213_v50 = vpop.f32.mrf.mxu3  ;;  %v1630_v29 = vrot.slane %v9334_v32, 1 }
 0x188   : > { %v7380_v43 = vadd.f32 %v1213_v50, %v979_v56  ;;  %v1631_v56 = vrot.slane %v9335_v55, 2 }
 0x189   : > { %9331 = vst [vmem:[#allocation27_spill] sm:$0xff] %v7377_v4 }
 0x18a   : > { %9332 = vst [vmem:[#allocation28_spill] sm:$0xff] %v7380_v43  ;;  %v1632_v3 = vor.u32 %v1631_v56, %v1630_v29  ;;  %v9339_v56 = vshrl.u32 %v7018_v15, 16 }
 0x18b   : > { %5632 = vmatmul.msk.bf16.gmra.mxu2 %vm758_vm1, %v1629_v11  ;;  %v893_v39 = vpop.f32.mrf.mxu0 }
 0x18c   : > { %5648 = vmatmul.msk.bf16.gmra.mxu3 %vm758_vm1, %v1629_v11  ;;  %v982_v60 = vpop.f32.mrf.mxu1 }
 0x18e   : > { %v1127_v28 = vpop.f32.mrf.mxu2  ;;  %5580 = vmatmul.msk.bf16.gmra.mxu0 %vm758_vm1, %v1262_v19 }
 0x18f   : > { %v7386_v49 = vadd.f32 %v1127_v28, %v893_v39  ;;  %v1216_v37 = vpop.f32.mrf.mxu3  ;;  %5596 = vmatmul.msk.bf16.gmra.mxu1 %vm758_vm1, %v1262_v19  ;;  %v1633_v39 = vsel %vm1598_vm3, %v1628_v61, %v1632_v3  ;;  %v9340_v61 = vshll.u32 %v7018_v15, 16 }
 0x190   : > { %v7392_v50 = vadd.f32 %v1216_v37, %v982_v60  ;;  %v1263_v60 = vrot.slane %v7002_v9, 1 }
 0x191   : > { %9333 = vst [vmem:[#allocation29_spill] sm:$0xff] %v7386_v49 }
 0x192   : > { %v1264_v29 = vsel %vm1247_vm4, %v1261_v63, %v1263_v60 }
 0x193   : > { %v895_v43 = vpop.f32.mrf.mxu0 }
 0x194   : > { %v984_v4 = vpop.f32.mrf.mxu1 }
 0x196   : > { %v1129_v11 = vpop.f32.mrf.mxu2 }
 0x197   : > { %v7396_v47 = vadd.f32 %v1129_v11, %v895_v43  ;;  %v1218_v28 = vpop.f32.mrf.mxu3  ;;  %v1634_v11 = vrot.slane %v9339_v56, 1 }
 0x198   : > { %v7399_v49 = vadd.f32 %v1218_v28, %v984_v4  ;;  %v1635_v4 = vrot.slane %v9340_v61, 2 }
 0x199   : > { %9336 = vst [vmem:[#allocation30_spill] sm:$0xff] %v7396_v47 }
 0x19a   : > { %9337 = vst [vmem:[#allocation31_spill] sm:$0xff] %v7399_v49  ;;  %v1636_v9 = vor.u32 %v1635_v4, %v1634_v11 }
 0x19b   : > { %5633 = vmatmul.msk.bf16.gmra.mxu2 %vm758_vm1, %v1633_v39  ;;  %v898_v32 = vpop.f32.mrf.mxu0 }
 0x19c   : > { %5649 = vmatmul.msk.bf16.gmra.mxu3 %vm758_vm1, %v1633_v39  ;;  %v987_v19 = vpop.f32.mrf.mxu1 }
 0x19e   : > { %v1132_v37 = vpop.f32.mrf.mxu2  ;;  %5581 = vmatmul.msk.bf16.gmra.mxu0 %vm758_vm1, %v1264_v29 }
 0x19f   : > { %v7405_v55 = vadd.f32 %v1132_v37, %v898_v32  ;;  %v1221_v43 = vpop.f32.mrf.mxu3  ;;  %5597 = vmatmul.msk.bf16.gmra.mxu1 %vm758_vm1, %v1264_v29  ;;  %v1637_v32 = vsel %vm1598_vm3, %v1632_v3, %v1636_v9  ;;  %v9343_v3 = vshrl.u32 %v7038_v27, 16 }
 0x1a0   : > { %v7411_v28 = vadd.f32 %v1221_v43, %v987_v19  ;;  %v1265_v19 = vrot.slane %v7018_v15, 1 }
 0x1a1   : > { %9338 = vst [vmem:[#allocation32_spill] sm:$0xff] %v7405_v55 }
 0x1a2   : > { %v1266_v11 = vsel %vm1247_vm4, %v1263_v60, %v1265_v19 }
 0x1a3   : > { %v900_v49 = vpop.f32.mrf.mxu0 }
 0x1a4   : > { %v989_v47 = vpop.f32.mrf.mxu1 }
 0x1a6   : > { %v1134_v39 = vpop.f32.mrf.mxu2 }
 0x1a7   : > { %v7415_v63 = vadd.f32 %v1134_v39, %v900_v49  ;;  %v1223_v37 = vpop.f32.mrf.mxu3  ;;  %v9344_v39 = vshll.u32 %v7038_v27, 16 }
 0x1a8   : > { %v7418_v55 = vadd.f32 %v1223_v37, %v989_v47  ;;  %v1638_v47 = vrot.slane %v9343_v3, 1 }
 0x1a9   : > { %9341 = vst [vmem:[#allocation33_spill] sm:$0xff] %v7415_v63  ;;  %v1639_v37 = vrot.slane %v9344_v39, 2 }
 0x1aa   : > { %9342 = vst [vmem:[#allocation34_spill] sm:$0xff] %v7418_v55 }
 0x1ab   : > { %5634 = vmatmul.msk.bf16.gmra.mxu2 %vm758_vm1, %v1637_v32  ;;  %v1360_v56 = vpop.f32.mrf.mxu0  ;;  %v1640_v60 = vor.u32 %v1639_v37, %v1638_v47  ;;  %v9345_v37 = vshrl.u32 %v7062_v1, 16 }
 0x1ac   : > { %5650 = vmatmul.msk.bf16.gmra.mxu3 %vm758_vm1, %v1637_v32  ;;  %v1449_v29 = vpop.f32.mrf.mxu1  ;;  %v1529_v61 = vadd.f32 %v1360_v56, %v7031_v24 }
 0x1ad   : > { %v1530_v49 = vadd.f32 %v1449_v29, %v7033_v26  ;;  %v1641_v63 = vsel %vm1598_vm3, %v1636_v9, %v1640_v60 }
 0x1ae   : > { %v1743_v43 = vpop.f32.mrf.mxu2  ;;  %5582 = vmatmul.msk.bf16.gmra.mxu0 %vm758_vm1, %v1266_v11 }
 0x1af   : > { %v1832_v4 = vpop.f32.mrf.mxu3  ;;  %v7430_v55 = vadd.f32 %v1743_v43, %v1529_v61  ;;  %5598 = vmatmul.msk.bf16.gmra.mxu1 %vm758_vm1, %v1266_v11  ;;  %v1267_v61 = vrot.slane %v7038_v27, 1 }
 0x1b0   : > { %v7432_v15 = vadd.f32 %v1832_v4, %v1530_v49 }
 0x1b3   : > { %v1362_v24 = vpop.f32.mrf.mxu0 }
 0x1b4   : > { %v1451_v56 = vpop.f32.mrf.mxu1  ;;  %v1531_v26 = vadd.f32 %v1362_v24, %v7042_v41  ;;  %v1268_v41 = vsel %vm1247_vm4, %v1265_v19, %v1267_v61  ;;  %v9346_v24 = vshll.u32 %v7062_v1, 16 }
 0x1b5   : > { %v1532_v29 = vadd.f32 %v1451_v56, %v7044_v46 }
 0x1b6   : > { %v1745_v32 = vpop.f32.mrf.mxu2  ;;  %v1643_v56 = vrot.slane %v9346_v24, 2  ;;  %v9347_v24 = vshrl.u32 %v7086_v42, 16 }
 0x1b7   : > { %v1834_v3 = vpop.f32.mrf.mxu3  ;;  %v7439_v39 = vadd.f32 %v1745_v32, %v1531_v26  ;;  %v1642_v32 = vrot.slane %v9345_v37, 1 }
 0x1b8   : > { %v7441_v43 = vadd.f32 %v1834_v3, %v1532_v29 }
 0x1bb   : > { %5635 = vmatmul.msk.bf16.gmra.mxu2 %vm758_vm1, %v1641_v63  ;;  %v1365_v49 = vpop.f32.mrf.mxu0 }
 0x1bc   : > { %5651 = vmatmul.msk.bf16.gmra.mxu3 %vm758_vm1, %v1641_v63  ;;  %v1454_v4 = vpop.f32.mrf.mxu1  ;;  %v1533_v46 = vadd.f32 %v1365_v49, %v7055_v59  ;;  %v1644_v63 = vor.u32 %v1643_v56, %v1642_v32  ;;  %v1646_v56 = vrot.slane %v9347_v24, 1 }
 0x1bd   : > { %v1534_v47 = vadd.f32 %v1454_v4, %v7057_v0 }
 0x1be   : > { %v1748_v11 = vpop.f32.mrf.mxu2  ;;  %5583 = vmatmul.msk.bf16.gmra.mxu0 %vm758_vm1, %v1268_v41  ;;  %v1645_v4 = vsel %vm1598_vm3, %v1640_v60, %v1644_v63 }
 0x1bf   : > { %v1837_v9 = vpop.f32.mrf.mxu3  ;;  %v7453_v26 = vadd.f32 %v1748_v11, %v1533_v46  ;;  %5599 = vmatmul.msk.bf16.gmra.mxu1 %vm758_vm1, %v1268_v41  ;;  %v1269_v46 = vrot.slane %v7062_v1, 1 }
 0x1c0   : > { %v7455_v27 = vadd.f32 %v1837_v9, %v1534_v47 }
 0x1c3   : > { %v1367_v59 = vpop.f32.mrf.mxu0 }
 0x1c4   : > { %v1456_v29 = vpop.f32.mrf.mxu1  ;;  %v1535_v0 = vadd.f32 %v1367_v59, %v7066_v13  ;;  %v1270_v13 = vsel %vm1247_vm4, %v1267_v61, %v1269_v46 }
 0x1c5   : > { %v1536_v3 = vadd.f32 %v1456_v29, %v7068_v18 }
 0x1c6   : > { %v1750_v19 = vpop.f32.mrf.mxu2 }
 0x1c7   : > { %v1839_v49 = vpop.f32.mrf.mxu3  ;;  %v7462_v37 = vadd.f32 %v1750_v19, %v1535_v0  ;;  %v9348_v19 = vshll.u32 %v7086_v42, 16 }
 0x1c8   : > { %v7464_v11 = vadd.f32 %v1839_v49, %v1536_v3 }
 0x1c9   : > { %v1647_v59 = vrot.slane %v9348_v19, 2 }
 0x1cb   : > { %5636 = vmatmul.msk.bf16.gmra.mxu2 %vm758_vm1, %v1645_v4  ;;  %v1370_v47 = vpop.f32.mrf.mxu0  ;;  %v1648_v61 = vor.u32 %v1647_v59, %v1646_v56  ;;  %v9349_v56 = vshrl.u32 %v7110_v20, 16  ;;  %v9350_v59 = vshll.u32 %v7110_v20, 16 }
 0x1cc   : > { %5652 = vmatmul.msk.bf16.gmra.mxu3 %vm758_vm1, %v1645_v4  ;;  %v1459_v9 = vpop.f32.mrf.mxu1  ;;  %v1537_v18 = vadd.f32 %v1370_v47, %v7079_v33 }
 0x1cd   : > { %v1538_v32 = vadd.f32 %v1459_v9, %v7081_v35  ;;  %v1649_v47 = vsel %vm1598_vm3, %v1644_v63, %v1648_v61  ;;  %v1650_v19 = vrot.slane %v9349_v56, 1  ;;  %v9351_v56 = vshrl.u32 %v7143_v22, 16 }
 0x1ce   : > { %v1753_v41 = vpop.f32.mrf.mxu2  ;;  %5584 = vmatmul.msk.bf16.gmra.mxu0 %vm758_vm1, %v1270_v13 }
 0x1cf   : > { %v1842_v60 = vpop.f32.mrf.mxu3  ;;  %v7476_v29 = vadd.f32 %v1753_v41, %v1537_v18  ;;  %5600 = vmatmul.msk.bf16.gmra.mxu1 %vm758_vm1, %v1270_v13  ;;  %v1271_v18 = vrot.slane %v7086_v42, 1 }
 0x1d0   : > { %v7478_v1 = vadd.f32 %v1842_v60, %v1538_v32 }
 0x1d3   : > { %v1372_v33 = vpop.f32.mrf.mxu0 }
 0x1d4   : > { %v1461_v3 = vpop.f32.mrf.mxu1  ;;  %v1539_v35 = vadd.f32 %v1372_v33, %v7090_v58  ;;  %v1272_v58 = vsel %vm1247_vm4, %v1269_v46, %v1271_v18 }
 0x1d5   : > { %v1540_v49 = vadd.f32 %v1461_v3, %v7092_v2 }
 0x1d6   : > { %v1755_v0 = vpop.f32.mrf.mxu2 }
 0x1d7   : > { %v1844_v4 = vpop.f32.mrf.mxu3  ;;  %v7485_v9 = vadd.f32 %v1755_v0, %v1539_v35  ;;  %v1651_v0 = vrot.slane %v9350_v59, 2  ;;  %v9352_v59 = vshll.u32 %v7143_v22, 16 }
 0x1d8   : > { %v7487_v41 = vadd.f32 %v1844_v4, %v1540_v49 }
 0x1d9   : > { %v1652_v46 = vor.u32 %v1651_v0, %v1650_v19  ;;  %v1654_v19 = vrot.slane %v9351_v56, 1  ;;  %v1655_v0 = vrot.slane %v9352_v59, 2  ;;  %v1275_v56 = vrot.slane %v7143_v22, 1 }
 0x1db   : > { %5637 = vmatmul.msk.bf16.gmra.mxu2 %vm758_vm1, %v1649_v47  ;;  %v1375_v32 = vpop.f32.mrf.mxu0 }
 0x1dc   : > { %5653 = vmatmul.msk.bf16.gmra.mxu3 %vm758_vm1, %v1649_v47  ;;  %v1464_v60 = vpop.f32.mrf.mxu1  ;;  %v1541_v2 = vadd.f32 %v1375_v32, %v7103_v23  ;;  %v1653_v47 = vsel %vm1598_vm3, %v1648_v61, %v1652_v46 }
 0x1dd   : > { %v1542_v24 = vadd.f32 %v1464_v60, %v7105_v34  ;;  %v1273_v60 = vrot.slane %v7110_v20, 1 }
 0x1de   : > { %v1758_v13 = vpop.f32.mrf.mxu2  ;;  %5585 = vmatmul.msk.bf16.gmra.mxu0 %vm758_vm1, %v1272_v58 }
 0x1df   : > { %v1847_v63 = vpop.f32.mrf.mxu3  ;;  %v7499_v33 = vadd.f32 %v1758_v13, %v1541_v2  ;;  %5601 = vmatmul.msk.bf16.gmra.mxu1 %vm758_vm1, %v1272_v58 }
 0x1e0   : > { %v7501_v42 = vadd.f32 %v1847_v63, %v1542_v24 }
 0x1e3   : > { %v1377_v23 = vpop.f32.mrf.mxu0 }
 0x1e4   : > { %v1466_v35 = vpop.f32.mrf.mxu1  ;;  %v1543_v34 = vadd.f32 %v1377_v23, %v7114_v12  ;;  %v1274_v12 = vsel %vm1247_vm4, %v1271_v18, %v1273_v60  ;;  %v6445_v18 = vld [vmem:[%s9303_s1 + $0x94] sm:$0xf] }
 0x1e5   : > { %v1544_v49 = vadd.f32 %v1466_v35, %v7116_v14  ;;  %v5674_v35 = vld [vmem:[%s9303_s1 + $0x98] sm:$0x30] }
 0x1e6   : > { %v1760_v3 = vpop.f32.mrf.mxu2 }
 0x1e7   : > { %v1849_v4 = vpop.f32.mrf.mxu3  ;;  %v7508_v32 = vadd.f32 %v1760_v3, %v1543_v34  ;;  %v1656_v34 = vor.u32 %v1655_v0, %v1654_v19 }
 0x1e8   : > { %v7510_v13 = vadd.f32 %v1849_v4, %v1544_v49  ;;  %v5677_v49 = vor.u32 %v6445_v18, %v5674_v35  ;;  %v9353_v18 = vshrl.u32 %v7172_v21, 16 }
 0x1eb   : > { %5638 = vmatmul.msk.bf16.gmra.mxu2 %vm758_vm1, %v1653_v47  ;;  %v1380_v2 = vpop.f32.mrf.mxu0 }
 0x1ec   : > { %5654 = vmatmul.msk.bf16.gmra.mxu3 %vm758_vm1, %v1653_v47  ;;  %v1469_v24 = vpop.f32.mrf.mxu1  ;;  %v1545_v14 = vadd.f32 %v1380_v2, %v7127_v52  ;;  %v5672_v52 = vld [vmem:[%s9303_s1 + $0x90] sm:$0xf] }
 0x1ed   : > { %v1546_v63 = vadd.f32 %v1469_v24, %v7129_v53  ;;  %v6446_v53 = vld [vmem:[%s9303_s1 + $0x94] sm:$0x30] }
 0x1ee   : > { %v1763_v58 = vpop.f32.mrf.mxu2  ;;  %5586 = vmatmul.msk.bf16.gmra.mxu0 %vm758_vm1, %v1274_v12  ;;  %v5673_v23 = vor.u32 %v6446_v53, %v5672_v52  ;;  %v1276_v52 = vsel %vm1247_vm4, %v1273_v60, %v1275_v56 }
 0x1ef   : > { %v1852_v61 = vpop.f32.mrf.mxu3  ;;  %v7522_v3 = vadd.f32 %v1763_v58, %v1545_v14  ;;  %5602 = vmatmul.msk.bf16.gmra.mxu1 %vm758_vm1, %v1274_v12  ;;  %v2083_v58 = vsel %vm807_vm0, %v5677_v49, 0 }
 0x1f0   : > { %v7524_v20 = vadd.f32 %v1852_v61, %v1546_v63  ;;  %v2080_v4 = vsel %vm807_vm0, %v5673_v23, 0  ;;  %2180 = vmatpush.bf16.msra.mxu1 %v2083_v58  ;;  %v1657_v61 = vsel %vm1598_vm3, %v1652_v46, %v1656_v34  ;;  %v1658_v23 = vrot.slane %v9353_v18, 1 }
 0x1f1   : > { %2091 = vmatpush.bf16.msra.mxu0 %v2080_v4  ;;  %v9354_v46 = vshll.u32 %v7172_v21, 16 }
 0x1f3   : > { %v1382_v2 = vpop.f32.mrf.mxu0  ;;  %v1659_v35 = vrot.slane %v9354_v46, 2 }
 0x1f4   : > { %v1471_v24 = vpop.f32.mrf.mxu1  ;;  %v7545_v12 = vadd.f32 %v1382_v2, %v7152_v16 }
 0x1f5   : > { %v7548_v14 = vadd.f32 %v1471_v24, %v7154_v7  ;;  %v1660_v60 = vor.u32 %v1659_v35, %v1658_v23 }
 0x1f6   : > { %v7541_v47 = vpop.f32.mrf.mxu2 }
 0x1f7   : > { %v7550_v63 = vpop.f32.mrf.mxu3 }
 0x1fb   : > { %5639 = vmatmul.msk.bf16.gmra.mxu2 %vm758_vm1, %v1657_v61  ;;  %v1385_v59 = vpop.f32.mrf.mxu0 }
 0x1fc   : > { %5655 = vmatmul.msk.bf16.gmra.mxu3 %vm758_vm1, %v1657_v61  ;;  %v1474_v0 = vpop.f32.mrf.mxu1  ;;  %v1549_v16 = vadd.f32 %v1385_v59, %v7165_v48  ;;  %v1661_v61 = vsel %vm1598_vm3, %v1656_v34, %v1660_v60  ;;  %v5664_v59 = vld [vmem:[%s9303_s1 + $0x80] sm:$0xf]  ;;  %v5666_v34 = vld [vmem:[%s9303_s1 + $0x88] sm:$0xf0] }
 0x1fd   : > { %v1550_v7 = vadd.f32 %v1474_v0, %v7167_v6 }
 0x1fe   : > { %v1768_v19 = vpop.f32.mrf.mxu2  ;;  %5587 = vmatmul.msk.bf16.gmra.mxu0 %vm758_vm1, %v1276_v52 }
 0x1ff   : > { %v1857_v53 = vpop.f32.mrf.mxu3  ;;  %v7563_v49 = vadd.f32 %v1768_v19, %v1549_v16  ;;  %5603 = vmatmul.msk.bf16.gmra.mxu1 %vm758_vm1, %v1276_v52  ;;  %v1277_v19 = vrot.slane %v7172_v21, 1 }
 0x200   : > { %v7565_v22 = vadd.f32 %v1857_v53, %v1550_v7 }
 0x201   : > { %v1278_v53 = vsel %vm1247_vm4, %v1275_v56, %v1277_v19 }
 0x203   : > { %v1387_v48 = vpop.f32.mrf.mxu0 }
 0x204   : > { %v1476_v6 = vpop.f32.mrf.mxu1  ;;  %v7572_v58 = vadd.f32 %v1387_v48, %v7196_v40  ;;  %v6444_v40 = vld [vmem:[%s9303_s1 + $0x84] sm:$0xf0] }
 0x205   : > { %v7575_v2 = vadd.f32 %v1476_v6, %v7207_v57  ;;  %v6443_v57 = vld [vmem:[%s9303_s1 + $0x84] sm:$0xf]  ;;  %v5665_v0 = vor.u32 %v6444_v40, %v5664_v59  ;;  %s6644_s1 = scalar_lea.hbm %s6643_s20, 8 }
 0x206   : > { %v7569_v4 = vpop.f32.mrf.mxu2  ;;  %v5669_v52 = vor.u32 %v6443_v57, %v5666_v34  ;;  %p6645_p11 = scmp.ne.s32.totalorder %s6643_s20, %s6644_s1  ;;  %p6650_p1 = scmp.lt.s32.totalorder %s6648_s23, %s6644_s1 }
 0x207   : > { %v7577_v24 = vpop.f32.mrf.mxu3  ;;  %2092 = vmatpush.bf16.msra.mxu0 %v5665_v0 }
 0x208   : > { %2181 = vmatpush.bf16.msra.mxu1 %v5669_v52  ;;  %p6646_p12 = pnand %p6645_p11, %p6815_p5  ;;  %p6651_p2 = por %p6650_p1, %p6649_p0 }
 0x20a   : > { %p6647_p13 = pneg %p6646_p12 }
 0x20b   : > { %5640 = vmatmul.msk.bf16.gmra.mxu2 %vm758_vm1, %v1661_v61  ;;  %v1390_v16 = vpop.f32.mrf.mxu0 }
 0x20c   : > { %5656 = vmatmul.msk.bf16.gmra.mxu3 %vm758_vm1, %v1661_v61  ;;  %v1479_v7 = vpop.f32.mrf.mxu1  ;;  %v1553_v18 = vadd.f32 %v1390_v16, %v7239_v54  ;;  %p6652_p3 = pnand %p6651_p2, %p6647_p13 }
 0x20d   : > { %v1554_v23 = vadd.f32 %v1479_v7, %v7241_v8 }
 0x20e   : > { %v1773_v21 = vpop.f32.mrf.mxu2  ;;  %5588 = vmatmul.msk.bf16.gmra.mxu0 %vm758_vm1, %v1278_v53 }
 0x20f   : > { %v1862_v46 = vpop.f32.mrf.mxu3  ;;  %v7598_v35 = vadd.f32 %v1773_v21, %v1553_v18  ;;  %5604 = vmatmul.msk.bf16.gmra.mxu1 %vm758_vm1, %v1278_v53  ;;  %v6612_v18 = vld [vmem:[%s6881_s26] sm:$0xff] }
 0x210   : > { %v7600_v48 = vadd.f32 %v1862_v46, %v1554_v23  ;;  %v1982_v23 = vrot.slane %v6612_v18, 2  ;;  %v6613_v46 = vld [vmem:[%s6881_s26 + $0x8] sm:$0xff] }
 0x213   : > { %v1392_v61 = vpop.f32.mrf.mxu0 }
 0x214   : > { %v1481_v59 = vpop.f32.mrf.mxu1  ;;  %v7607_v56 = vadd.f32 %v1392_v61, %v7245_v51  ;;  %v1983_v61 = vrot.slane %v6613_v46, 2  ;;  %v9360_v46 = vld [vmem:[#allocation12_spill] sm:$0xff] }
 0x215   : > { %v7610_v54 = vadd.f32 %v1481_v59, %v7247_v38 }
 0x216   : > { %v7604_v6 = vpop.f32.mrf.mxu2 }
 0x217   : > { %v7612_v8 = vpop.f32.mrf.mxu3 }
 0x21b   : > { %5641 = vmatmul.msk.bf16.gmra.mxu2 %vm758_vm1, %v1660_v60  ;;  %v1395_v57 = vpop.f32.mrf.mxu0 }
 0x21c   : > { %5657 = vmatmul.msk.bf16.gmra.mxu3 %vm758_vm1, %v1660_v60  ;;  %v1484_v0 = vpop.f32.mrf.mxu1  ;;  %v1557_v34 = vadd.f32 %v1395_v57, %v7256_v5  ;;  %v1984_v57 = vsel %vm807_vm0, %v1982_v23, %v1983_v61  ;;  %v9361_v23 = vld [vmem:[#allocation13_spill] sm:$0xff] }
 0x21d   : > { %v1558_v21 = vadd.f32 %v1484_v0, %v7258_v36 }
 0x21e   : > { %v1778_v40 = vpop.f32.mrf.mxu2  ;;  %5589 = vmatmul.msk.bf16.gmra.mxu0 %vm758_vm1, %v1277_v19 }
 0x21f   : > { %v1867_v51 = vpop.f32.mrf.mxu3  ;;  %v7618_v52 = vadd.f32 %v1778_v40, %v1557_v34  ;;  %5605 = vmatmul.msk.bf16.gmra.mxu1 %vm758_vm1, %v1277_v19  ;;  %v9356_v34 = vld [vmem:[#allocation11_spill] sm:$0xff] }
 0x220   : > { %v7620_v38 = vadd.f32 %v1867_v51, %v1558_v21 }
 0x223   : > { %v1397_v60 = vpop.f32.mrf.mxu0 }
 0x224   : > { %v1486_v7 = vpop.f32.mrf.mxu1  ;;  %v7627_v53 = vadd.f32 %v1397_v60, %v7262_v25 }
 0x225   : > { %v7630_v5 = vadd.f32 %v1486_v7, %v7264_v45 }
 0x226   : > { %v7624_v16 = vpop.f32.mrf.mxu2 }
 0x227   : > { %v7632_v36 = vpop.f32.mrf.mxu3 }
 0x228   : > { %9355 = vst [vmem:[#allocation35_spill] sm:$0xff] %v7632_v36 }
 0x22b   : > { %v1400_v40 = vpop.f32.mrf.mxu0 }
 0x22c   : > { %v1489_v19 = vpop.f32.mrf.mxu1  ;;  %v1561_v0 = vadd.f32 %v1400_v40, %v7271_v62 }
 0x22d   : > { %v1562_v25 = vadd.f32 %v1489_v19, %v9356_v34 }
 0x22e   : > { %v1783_v59 = vpop.f32.mrf.mxu2  ;;  %5678 = vmatmul.msk.bf16.vlgmr.msra.gmra.mxu0 %vm758_vm1, %v1984_v57 }
 0x22f   : > { %v1872_v21 = vpop.f32.mrf.mxu3  ;;  %v7639_v51 = vadd.f32 %v1783_v59, %v1561_v0  ;;  %5694 = vmatmul.msk.bf16.vlgmr.msra.gmra.mxu1 %vm758_vm1, %v1984_v57  ;;  %v6614_v59 = vld [vmem:[%s6881_s26 + $0x10] sm:$0xff] }
 0x230   : > { %v7641_v45 = vadd.f32 %v1872_v21, %v1562_v25  ;;  %v1985_v19 = vrot.slane %v6614_v59, 2  ;;  %v9364_v21 = vld [vmem:[#allocation14_spill] sm:$0xff] }
 0x231   : > { %9357 = vst [vmem:[#allocation11_spill] sm:$0xff] %v7639_v51 }
 0x232   : > { %9358 = vst [vmem:[#allocation36_spill] sm:$0xff] %v7641_v45  ;;  %v1986_v57 = vsel %vm807_vm0, %v1983_v61, %v1985_v19  ;;  %v9369_v61 = vld [vmem:[#allocation16_spill] sm:$0xff] }
 0x233   : > { %v1402_v7 = vpop.f32.mrf.mxu0 }
 0x234   : > { %v1491_v18 = vpop.f32.mrf.mxu1  ;;  %v7648_v36 = vadd.f32 %v1402_v7, %v9360_v46 }
 0x235   : > { %v7651_v62 = vadd.f32 %v1491_v18, %v9361_v23 }
 0x236   : > { %v7645_v60 = vpop.f32.mrf.mxu2 }
 0x237   : > { %9359 = vst [vmem:[#allocation37_spill] sm:$0xff] %v7645_v60  ;;  %v7653_v40 = vpop.f32.mrf.mxu3 }
 0x238   : > { %9362 = vst [vmem:[#allocation12_spill] sm:$0xff] %v7651_v62 }
 0x239   : > { %9363 = vst [vmem:[#allocation13_spill] sm:$0xff] %v7653_v40  ;;  %v9368_v40 = vld [vmem:[#allocation15_spill] sm:$0xff] }
 0x23b   : > { %v1405_v34 = vpop.f32.mrf.mxu0 }
 0x23c   : > { %v1494_v25 = vpop.f32.mrf.mxu1  ;;  %v1565_v60 = vadd.f32 %v1405_v34, %v9364_v21  ;;  %v9372_v21 = vld [vmem:[#allocation17_spill] sm:$0xff] }
 0x23d   : > { %v1566_v45 = vadd.f32 %v1494_v25, %v7297_v30 }
 0x23e   : > { %v1788_v0 = vpop.f32.mrf.mxu2  ;;  %5679 = vmatmul.msk.bf16.gmra.mxu0 %vm758_vm1, %v1986_v57 }
 0x23f   : > { %v1877_v51 = vpop.f32.mrf.mxu3  ;;  %v7659_v7 = vadd.f32 %v1788_v0, %v1565_v60  ;;  %5695 = vmatmul.msk.bf16.gmra.mxu1 %vm758_vm1, %v1986_v57  ;;  %v6615_v60 = vld [vmem:[%s6881_s26 + $0x18] sm:$0xff] }
 0x240   : > { %v7661_v46 = vadd.f32 %v1877_v51, %v1566_v45  ;;  %v1987_v0 = vrot.slane %v6615_v60, 2 }
 0x241   : > { %9365 = vst [vmem:[#allocation14_spill] sm:$0xff] %v7659_v7 }
 0x242   : > { %9366 = vst [vmem:[#allocation38_spill] sm:$0xff] %v7661_v46  ;;  %v1988_v57 = vsel %vm807_vm0, %v1985_v19, %v1987_v0  ;;  %v9377_v19 = vld [vmem:[#allocation19_spill] sm:$0xff] }
 0x243   : > { %v1407_v23 = vpop.f32.mrf.mxu0 }
 0x244   : > { %v1496_v59 = vpop.f32.mrf.mxu1  ;;  %v7668_v62 = vadd.f32 %v1407_v23, %v9368_v40 }
 0x245   : > { %v7671_v34 = vadd.f32 %v1496_v59, %v9369_v61 }
 0x246   : > { %v7665_v18 = vpop.f32.mrf.mxu2 }
 0x247   : > { %9367 = vst [vmem:[#allocation39_spill] sm:$0xff] %v7665_v18  ;;  %v7673_v30 = vpop.f32.mrf.mxu3 }
 0x248   : > { %9370 = vst [vmem:[#allocation15_spill] sm:$0xff] %v7671_v34 }
 0x249   : > { %9371 = vst [vmem:[#allocation16_spill] sm:$0xff] %v7673_v30  ;;  %v9376_v30 = vld [vmem:[#allocation18_spill] sm:$0xff] }
 0x24b   : > { %v1410_v45 = vpop.f32.mrf.mxu0 }
 0x24c   : > { %v1499_v25 = vpop.f32.mrf.mxu1  ;;  %v1569_v18 = vadd.f32 %v1410_v45, %v9372_v21  ;;  %v9380_v21 = vld [vmem:[#allocation20_spill] sm:$0xff] }
 0x24d   : > { %v1570_v46 = vadd.f32 %v1499_v25, %v7316_v17 }
 0x24e   : > { %v1793_v51 = vpop.f32.mrf.mxu2  ;;  %5680 = vmatmul.msk.bf16.gmra.mxu0 %vm758_vm1, %v1988_v57 }
 0x24f   : > { %v1882_v7 = vpop.f32.mrf.mxu3  ;;  %v7679_v40 = vadd.f32 %v1793_v51, %v1569_v18  ;;  %5696 = vmatmul.msk.bf16.gmra.mxu1 %vm758_vm1, %v1988_v57  ;;  %v6616_v18 = vld [vmem:[%s6881_s26 + $0x20] sm:$0xff] }
 0x250   : > { %v7681_v23 = vadd.f32 %v1882_v7, %v1570_v46  ;;  %v1989_v51 = vrot.slane %v6616_v18, 2 }
 0x251   : > { %9373 = vst [vmem:[#allocation17_spill] sm:$0xff] %v7679_v40 }
 0x252   : > { %9374 = vst [vmem:[#allocation40_spill] sm:$0xff] %v7681_v23  ;;  %v1990_v57 = vsel %vm807_vm0, %v1987_v0, %v1989_v51  ;;  %v9385_v0 = vld [vmem:[#allocation22_spill] sm:$0xff] }
 0x253   : > { %v1412_v61 = vpop.f32.mrf.mxu0 }
 0x254   : > { %v1501_v60 = vpop.f32.mrf.mxu1  ;;  %v7688_v34 = vadd.f32 %v1412_v61, %v9376_v30 }
 0x255   : > { %v7691_v45 = vadd.f32 %v1501_v60, %v9377_v19 }
 0x256   : > { %v7685_v59 = vpop.f32.mrf.mxu2 }
 0x257   : > { %9375 = vst [vmem:[#allocation41_spill] sm:$0xff] %v7685_v59  ;;  %v7693_v17 = vpop.f32.mrf.mxu3 }
 0x258   : > { %9378 = vst [vmem:[#allocation18_spill] sm:$0xff] %v7691_v45 }
 0x259   : > { %9379 = vst [vmem:[#allocation19_spill] sm:$0xff] %v7693_v17  ;;  %v9384_v17 = vld [vmem:[#allocation21_spill] sm:$0xff] }
 0x25b   : > { %v1415_v46 = vpop.f32.mrf.mxu0 }
 0x25c   : > { %v1504_v25 = vpop.f32.mrf.mxu1  ;;  %v1573_v59 = vadd.f32 %v1415_v46, %v9380_v21  ;;  %v9388_v21 = vld [vmem:[#allocation23_spill] sm:$0xff] }
 0x25d   : > { %v1574_v23 = vadd.f32 %v1504_v25, %v7335_v10 }
 0x25e   : > { %v1798_v7 = vpop.f32.mrf.mxu2  ;;  %5681 = vmatmul.msk.bf16.gmra.mxu0 %vm758_vm1, %v1990_v57 }
 0x25f   : > { %v1887_v40 = vpop.f32.mrf.mxu3  ;;  %v7699_v30 = vadd.f32 %v1798_v7, %v1573_v59  ;;  %5697 = vmatmul.msk.bf16.gmra.mxu1 %vm758_vm1, %v1990_v57  ;;  %v6617_v59 = vld [vmem:[%s6881_s26 + $0x28] sm:$0xff] }
 0x260   : > { %v7701_v61 = vadd.f32 %v1887_v40, %v1574_v23  ;;  %v1991_v7 = vrot.slane %v6617_v59, 2 }
 0x261   : > { %9381 = vst [vmem:[#allocation20_spill] sm:$0xff] %v7699_v30 }
 0x262   : > { %9382 = vst [vmem:[#allocation42_spill] sm:$0xff] %v7701_v61  ;;  %v1992_v57 = vsel %vm807_vm0, %v1989_v51, %v1991_v7  ;;  %v9393_v51 = vld [vmem:[#allocation25_spill] sm:$0xff] }
 0x263   : > { %v1417_v19 = vpop.f32.mrf.mxu0 }
 0x264   : > { %v1506_v18 = vpop.f32.mrf.mxu1  ;;  %v7708_v45 = vadd.f32 %v1417_v19, %v9384_v17 }
 0x265   : > { %v7711_v46 = vadd.f32 %v1506_v18, %v9385_v0 }
 0x266   : > { %v7705_v60 = vpop.f32.mrf.mxu2 }
 0x267   : > { %9383 = vst [vmem:[#allocation43_spill] sm:$0xff] %v7705_v60  ;;  %v7713_v10 = vpop.f32.mrf.mxu3 }
 0x268   : > { %9386 = vst [vmem:[#allocation21_spill] sm:$0xff] %v7711_v46 }
 0x269   : > { %9387 = vst [vmem:[#allocation22_spill] sm:$0xff] %v7713_v10  ;;  %v9392_v10 = vld [vmem:[#allocation24_spill] sm:$0xff] }
 0x26b   : > { %v1420_v23 = vpop.f32.mrf.mxu0 }
 0x26c   : > { %v1509_v25 = vpop.f32.mrf.mxu1  ;;  %v1577_v60 = vadd.f32 %v1420_v23, %v9388_v21 }
 0x26d   : > { %v1578_v61 = vadd.f32 %v1509_v25, %v7354_v44 }
 0x26e   : > { %v1803_v40 = vpop.f32.mrf.mxu2  ;;  %5682 = vmatmul.msk.bf16.gmra.mxu0 %vm758_vm1, %v1992_v57 }
 0x26f   : > { %v1892_v30 = vpop.f32.mrf.mxu3  ;;  %v7719_v17 = vadd.f32 %v1803_v40, %v1577_v60  ;;  %5698 = vmatmul.msk.bf16.gmra.mxu1 %vm758_vm1, %v1992_v57  ;;  %v6618_v60 = vld [vmem:[%s6881_s26 + $0x30] sm:$0xff]  ;;  %v9395_v57 = vld [vmem:[#allocation26_spill] sm:$0xff] }
 0x270   : > { %v7721_v19 = vadd.f32 %v1892_v30, %v1578_v61  ;;  %v1993_v40 = vrot.slane %v6618_v60, 2 }
 0x271   : > { %9389 = vst [vmem:[#allocation23_spill] sm:$0xff] %v7719_v17 }
 0x272   : > { %9390 = vst [vmem:[#allocation44_spill] sm:$0xff] %v7721_v19  ;;  %v1994_v21 = vsel %vm807_vm0, %v1991_v7, %v1993_v40  ;;  %v2641_v7 = vld [vmem:[%s9248_s4 + $0x50] sm:$0xf] }
 0x273   : > { %v1422_v0 = vpop.f32.mrf.mxu0 }
 0x274   : > { %v1511_v59 = vpop.f32.mrf.mxu1  ;;  %v7728_v46 = vadd.f32 %v1422_v0, %v9392_v10  ;;  %v6454_v10 = vld [vmem:[%s9248_s4 + $0x38] sm:$0xff] }
 0x275   : > { %v7731_v23 = vadd.f32 %v1511_v59, %v9393_v51  ;;  %2758 = vmatpush.bf16.msra.mxu2 %v6454_v10  ;;  %v6453_v51 = vld [vmem:[%s9248_s4 + $0x30] sm:$0xff] }
 0x276   : > { %v7725_v18 = vpop.f32.mrf.mxu2 }
 0x277   : > { %9391 = vst [vmem:[#allocation45_spill] sm:$0xff] %v7725_v18  ;;  %v7733_v44 = vpop.f32.mrf.mxu3 }
 0x278   : > { %9394 = vst [vmem:[#allocation24_spill] sm:$0xff] %v7733_v44 }
 0x279   : > { %2759 = vmatpush.bf16.msra.mxu2 %v6453_v51  ;;  %v6451_v51 = vld [vmem:[%s9248_s4 + $0x20] sm:$0xff] }
 0x27b   : > { %v1425_v61 = vpop.f32.mrf.mxu0 }
 0x27c   : > { %v1514_v25 = vpop.f32.mrf.mxu1  ;;  %v1581_v19 = vadd.f32 %v1425_v61, %v9395_v57  ;;  %v9399_v61 = vld [vmem:[#allocation27_spill] sm:$0xff] }
 0x27d   : > { %v1582_v18 = vadd.f32 %v1514_v25, %v7373_v31  ;;  %v2683_v31 = vunpack.c.l.b16 %v2641_v7  ;;  %v6452_v7 = vld [vmem:[%s9248_s4 + $0x28] sm:$0xff] }
 0x27e   : > { %v1808_v30 = vpop.f32.mrf.mxu2  ;;  %5683 = vmatmul.msk.bf16.gmra.mxu0 %vm758_vm1, %v1994_v21  ;;  %2760 = vmatpush.bf16.msra.mxu2 %v6452_v7 }
 0x27f   : > { %v1897_v17 = vpop.f32.mrf.mxu3  ;;  %v7742_v0 = vadd.f32 %v1808_v30, %v1581_v19  ;;  %5699 = vmatmul.msk.bf16.gmra.mxu1 %vm758_vm1, %v1994_v21  ;;  %v2694_v19 = vpack.c.b16 %v2683_v31, %v2683_v31  ;;  %v9401_v21 = vld [vmem:[#allocation28_spill] sm:$0xff] }
 0x280   : > { %v7744_v59 = vadd.f32 %v1897_v17, %v1582_v18  ;;  %v6619_v31 = vld [vmem:[%s6881_s26 + $0x38] sm:$0xff] }
 0x281   : > { %9396 = vst [vmem:[#allocation25_spill] sm:$0xff] %v7742_v0  ;;  %v2756_v30 = vsel %vm2754_vm5, %v2694_v19, 0 }
 0x282   : > { %9397 = vst [vmem:[#allocation26_spill] sm:$0xff] %v7744_v59  ;;  %2852 = vmatpush.bf16.msra.mxu3 %v2756_v30  ;;  %2761 = vmatpush.bf16.msra.mxu2 %v6451_v51  ;;  %v9416_v59 = vld [vmem:[#allocation33_spill] sm:$0xff] }
 0x283   : > { %v1427_v17 = vpop.f32.mrf.mxu0 }
 0x284   : > { %v1516_v18 = vpop.f32.mrf.mxu1  ;;  %v7758_v25 = vadd.f32 %v1427_v17, %v9399_v61 }
 0x285   : > { %v7761_v57 = vadd.f32 %v1516_v18, %v9401_v21  ;;  %v9404_v21 = vld [vmem:[#allocation29_spill] sm:$0xff] }
 0x286   : > { %v7754_v60 = vpop.f32.mrf.mxu2  ;;  %9400 = vst [vmem:[#allocation27_spill] sm:$0xff] %v7758_v25 }
 0x287   : > { %9398 = vst [vmem:[#allocation46_spill] sm:$0xff] %v7754_v60  ;;  %v7763_v10 = vpop.f32.mrf.mxu3  ;;  %v1995_v60 = vrot.slane %v6619_v31, 2  ;;  %v6450_v31 = vld [vmem:[%s9248_s4 + $0x18] sm:$0xff] }
 0x288   : > { %9402 = vst [vmem:[#allocation28_spill] sm:$0xff] %v7761_v57  ;;  %2762 = vmatpush.bf16.msra.mxu2 %v6450_v31  ;;  %v6620_v31 = vld [vmem:[%s6881_s26 + $0x40] sm:$0xff] }
 0x289   : > { %9403 = vst [vmem:[#allocation47_spill] sm:$0xff] %v7763_v10  ;;  %v1996_v18 = vsel %vm807_vm0, %v1993_v40, %v1995_v60  ;;  %v6449_v40 = vld [vmem:[%s9248_s4 + $0x10] sm:$0xff] }
 0x28b   : > { %v1430_v17 = vpop.f32.mrf.mxu0 }
 0x28c   : > { %v1519_v61 = vpop.f32.mrf.mxu1  ;;  %v1585_v10 = vadd.f32 %v1430_v17, %v9404_v21  ;;  %2763 = vmatpush.bf16.msra.mxu2 %v6449_v40  ;;  %v6447_v40 = vld [vmem:[%s9248_s4] sm:$0xff] }
 0x28d   : > { %v1586_v30 = vadd.f32 %v1519_v61, %v7392_v50  ;;  %v9408_v61 = vld [vmem:[#allocation30_spill] sm:$0xff] }
 0x28e   : > { %v1813_v19 = vpop.f32.mrf.mxu2  ;;  %5684 = vmatmul.msk.bf16.gmra.mxu0 %vm758_vm1, %v1996_v18 }
 0x28f   : > { %v1902_v57 = vpop.f32.mrf.mxu3  ;;  %v7778_v7 = vadd.f32 %v1813_v19, %v1585_v10  ;;  %5700 = vmatmul.msk.bf16.gmra.mxu1 %vm758_vm1, %v1996_v18  ;;  %v9410_v19 = vld [vmem:[#allocation31_spill] sm:$0xff]  ;;  %v6448_v18 = vld [vmem:[%s9248_s4 + $0x8] sm:$0xff] }
 0x290   : > { %v7780_v25 = vadd.f32 %v1902_v57, %v1586_v30  ;;  %v6456_v30 = vld [vmem:[%s9248_s4 + $0x48] sm:$0xff]  ;;  %2764 = vmatpush.bf16.msra.mxu2 %v6448_v18 }
 0x291   : > { %9405 = vst [vmem:[#allocation29_spill] sm:$0xff] %v7778_v7  ;;  %2853 = vmatpush.bf16.msra.mxu3 %v6456_v30  ;;  %v9413_v30 = vld [vmem:[#allocation32_spill] sm:$0xff] }
 0x292   : > { %9406 = vst [vmem:[#allocation48_spill] sm:$0xff] %v7780_v25 }
 0x293   : > { %v1432_v51 = vpop.f32.mrf.mxu0 }
 0x294   : > { %v1521_v17 = vpop.f32.mrf.mxu1  ;;  %v7790_v10 = vadd.f32 %v1432_v51, %v9408_v61  ;;  %v6455_v51 = vld [vmem:[%s9248_s4 + $0x40] sm:$0xff]  ;;  %2765 = vmatpush.bf16.msra.mxu2 %v6447_v40 }
 0x295   : > { %v7793_v57 = vadd.f32 %v1521_v17, %v9410_v19  ;;  %2854 = vmatpush.bf16.msra.mxu3 %v6455_v51 }
 0x296   : > { %v7787_v50 = vpop.f32.mrf.mxu2  ;;  %9409 = vst [vmem:[#allocation30_spill] sm:$0xff] %v7790_v10 }
 0x297   : > { %9407 = vst [vmem:[#allocation49_spill] sm:$0xff] %v7787_v50  ;;  %v7795_v21 = vpop.f32.mrf.mxu3  ;;  %v1997_v50 = vrot.slane %v6620_v31, 2 }
 0x298   : > { %9411 = vst [vmem:[#allocation31_spill] sm:$0xff] %v7793_v57 }
 0x299   : > { %9412 = vst [vmem:[#allocation50_spill] sm:$0xff] %v7795_v21  ;;  %v1998_v21 = vsel %vm807_vm0, %v1995_v60, %v1997_v50  ;;  %v9418_v60 = vld [vmem:[#allocation34_spill] sm:$0xff] }
 0x29b   : > { %v1435_v61 = vpop.f32.mrf.mxu0 }
 0x29c   : > { %v1524_v19 = vpop.f32.mrf.mxu1  ;;  %v1589_v57 = vadd.f32 %v1435_v61, %v9413_v30  ;;  %v6621_v61 = vld [vmem:[%s6881_s26 + $0x48] sm:$0xff] }
 0x29d   : > { %v1590_v18 = vadd.f32 %v1524_v19, %v7411_v28  ;;  %v1999_v30 = vrot.slane %v6621_v61, 2 }
 0x29e   : > { %v1818_v17 = vpop.f32.mrf.mxu2  ;;  %5685 = vmatmul.msk.bf16.gmra.mxu0 %vm758_vm1, %v1998_v21 }
 0x29f   : > { %v1907_v31 = vpop.f32.mrf.mxu3  ;;  %v7813_v10 = vadd.f32 %v1818_v17, %v1589_v57  ;;  %5701 = vmatmul.msk.bf16.gmra.mxu1 %vm758_vm1, %v1998_v21  ;;  %v2327_v57 = vld [vmem:[%s9246_s2] sm:$0x3]  ;;  %v2000_v19 = vsel %vm807_vm0, %v1997_v50, %v1999_v30 }
 0x2a0   : > { %v7815_v25 = vadd.f32 %v1907_v31, %v1590_v18  ;;  %v7831_v18 = vperm.slane %v2327_v57, 0  ;;  %v7834_v31 = vperm.slane %v2327_v57, 1 }
 0x2a1   : > { %9414 = vst [vmem:[#allocation32_spill] sm:$0xff] %v7813_v10 }
 0x2a2   : > { %9415 = vst [vmem:[#allocation51_spill] sm:$0xff] %v7815_v25 }
 0x2a3   : > { %v1437_v51 = vpop.f32.mrf.mxu0 }
 0x2a4   : > { %v1526_v7 = vpop.f32.mrf.mxu1  ;;  %v7820_v0 = vadd.f32 %v1437_v51, %v9416_v59 }
 0x2a5   : > { %v7823_v40 = vadd.f32 %v1526_v7, %v9418_v60 }
 0x2a6   : > { %9417 = vst [vmem:[#allocation33_spill] sm:$0xff] %v7820_v0 }
 0x2a7   : > { %9419 = vst [vmem:[#allocation34_spill] sm:$0xff] %v7823_v40 }
 0x2ab   : > { %v2094_v28 = vpop.f32.mrf.mxu0 }
 0x2ac   : > { %v2183_v17 = vpop.f32.mrf.mxu1  ;;  %v2263_v21 = vadd.f32 %v2094_v28, %v7430_v55 }
 0x2ad   : > { %v2264_v59 = vadd.f32 %v2183_v17, %v7432_v15  ;;  %v6622_v17 = vld [vmem:[%s6881_s26 + $0x50] sm:$0xff] }
 0x2ae   : > { %5686 = vmatmul.msk.bf16.gmra.mxu0 %vm758_vm1, %v2000_v19  ;;  %v2333_v7 = vadd.f32 %v7831_v18, %v2263_v21 }
 0x2af   : > { %5702 = vmatmul.msk.bf16.gmra.mxu1 %vm758_vm1, %v2000_v19  ;;  %v2334_v51 = vadd.f32 %v7834_v31, %v2264_v59  ;;  %v2001_v19 = vrot.slane %v6622_v17, 2 }
 0x2b0   : > { %v2461_v28 = vmul.f32 0.01, %v2333_v7  ;;  %vm2397_vm6 = vcmp.ge.f32.partialorder %v2333_v7, 0.0 }
 0x2b1   : > { %v2462_v40 = vmul.f32 0.01, %v2334_v51  ;;  %vm2398_vm7 = vcmp.ge.f32.partialorder %v2334_v51, 0.0 }
 0x2b2   : > { %v2525_v0 = vsel %vm2397_vm6, %v2333_v7, %v2461_v28 }
 0x2b3   : > { %v2096_v60 = vpop.f32.mrf.mxu0  ;;  %v2526_v25 = vsel %vm2398_vm7, %v2334_v51, %v2462_v40 }
 0x2b4   : > { %v2185_v61 = vpop.f32.mrf.mxu1  ;;  %v2265_v50 = vadd.f32 %v2096_v60, %v7439_v39 }
 0x2b5   : > { %v2266_v55 = vadd.f32 %v2185_v61, %v7441_v43 }
 0x2b6   : > { %v2335_v15 = vadd.f32 %v7831_v18, %v2265_v50  ;;  %v2002_v50 = vsel %vm807_vm0, %v1999_v30, %v2001_v19 }
 0x2b7   : > { %v2336_v57 = vadd.f32 %v7834_v31, %v2266_v55 }
 0x2b8   : > { %vm2399_vm8 = vcmp.ge.f32.partialorder %v2335_v15, 0.0  ;;  %v2463_v21 = vmul.f32 0.01, %v2335_v15 }
 0x2b9   : > { %vm2400_vm9 = vcmp.ge.f32.partialorder %v2336_v57, 0.0  ;;  %v2464_v59 = vmul.f32 0.01, %v2336_v57 }
 0x2ba   : > { %v2527_v39 = vsel %vm2399_vm8, %v2335_v15, %v2463_v21 }
 0x2bb   : > { %v2528_v60 = vsel %vm2400_vm9, %v2336_v57, %v2464_v59  ;;  %v2589_v43 = vpack.c.bf16 %v2527_v39, %v2525_v0  ;;  %v2099_v10 = vpop.f32.mrf.mxu0 }
 0x2bc   : > { %v2590_v61 = vpack.c.bf16 %v2528_v60, %v2526_v25  ;;  %v2188_v44 = vpop.f32.mrf.mxu1  ;;  %v2267_v55 = vadd.f32 %v2099_v10, %v7453_v26 }
 0x2bd   : > { %2766 = vmatmul.bf16.vlgmr.msra.gmra.mxu2 %v2589_v43  ;;  %v2268_v17 = vadd.f32 %v2188_v44, %v7455_v27  ;;  %v6623_v44 = vld [vmem:[%s6881_s26 + $0x58] sm:$0xff] }
 0x2be   : > { %5750 = vmatmul.msk.bf16.vlgmr.msra.gmra.mxu3 %vm2705_vm10, %v2590_v61  ;;  %5687 = vmatmul.msk.bf16.gmra.mxu0 %vm758_vm1, %v2002_v50  ;;  %v2337_v40 = vadd.f32 %v7831_v18, %v2267_v55  ;;  %v2003_v10 = vrot.slane %v6623_v44, 2 }
 0x2bf   : > { %5703 = vmatmul.msk.bf16.gmra.mxu1 %vm758_vm1, %v2002_v50  ;;  %v2338_v0 = vadd.f32 %v7834_v31, %v2268_v17 }
 0x2c0   : > { %v2465_v28 = vmul.f32 0.01, %v2337_v40  ;;  %vm2401_vm11 = vcmp.ge.f32.partialorder %v2337_v40, 0.0  ;;  %v2004_v55 = vsel %vm807_vm0, %v2001_v19, %v2003_v10 }
 0x2c1   : > { %v2466_v15 = vmul.f32 0.01, %v2338_v0  ;;  %vm2402_vm12 = vcmp.ge.f32.partialorder %v2338_v0, 0.0 }
 0x2c2   : > { %v2529_v60 = vsel %vm2401_vm11, %v2337_v40, %v2465_v28 }
 0x2c3   : > { %v2101_v25 = vpop.f32.mrf.mxu0  ;;  %v2530_v59 = vsel %vm2402_vm12, %v2338_v0, %v2466_v15 }
 0x2c4   : > { %v2190_v7 = vpop.f32.mrf.mxu1  ;;  %v2269_v30 = vadd.f32 %v2101_v25, %v7462_v37 }
 0x2c5   : > { %v2270_v51 = vadd.f32 %v2190_v7, %v7464_v11 }
 0x2c6   : > { %v2339_v26 = vadd.f32 %v7831_v18, %v2269_v30 }
 0x2c7   : > { %v2340_v27 = vadd.f32 %v7834_v31, %v2270_v51 }
 0x2c8   : > { %v2467_v57 = vmul.f32 0.01, %v2339_v26  ;;  %vm2403_vm14 = vcmp.ge.f32.partialorder %v2339_v26, 0.0 }
 0x2c9   : > { %vm2404_vm13 = vcmp.ge.f32.partialorder %v2340_v27, 0.0  ;;  %v2468_v21 = vmul.f32 0.01, %v2340_v27 }
 0x2ca   : > { %v2531_v37 = vsel %vm2403_vm14, %v2339_v26, %v2467_v57  ;;  %v6624_v26 = vld [vmem:[%s6881_s26 + $0x60] sm:$0xff] }
 0x2cb   : > { %v2532_v39 = vsel %vm2404_vm13, %v2340_v27, %v2468_v21  ;;  %v2104_v43 = vpop.f32.mrf.mxu0  ;;  %v2591_v61 = vpack.c.bf16 %v2531_v37, %v2529_v60  ;;  %v2005_v27 = vrot.slane %v6624_v26, 2 }
 0x2cc   : > { %v2193_v11 = vpop.f32.mrf.mxu1  ;;  %v2592_v50 = vpack.c.bf16 %v2532_v39, %v2530_v59  ;;  %v2271_v17 = vadd.f32 %v2104_v43, %v7476_v29 }
 0x2cd   : > { %2771 = vmatmul.bf16.gmra.mxu2 %v2591_v61  ;;  %v2272_v25 = vadd.f32 %v2193_v11, %v7478_v1  ;;  %v2006_v11 = vsel %vm807_vm0, %v2003_v10, %v2005_v27 }
 0x2ce   : > { %5751 = vmatmul.msk.bf16.gmra.mxu3 %vm2705_vm10, %v2592_v50  ;;  %5688 = vmatmul.msk.bf16.gmra.mxu0 %vm758_vm1, %v2004_v55  ;;  %v2341_v40 = vadd.f32 %v7831_v18, %v2271_v17 }
 0x2cf   : > { %5704 = vmatmul.msk.bf16.gmra.mxu1 %vm758_vm1, %v2004_v55  ;;  %v2342_v0 = vadd.f32 %v7834_v31, %v2272_v25 }
 0x2d0   : > { %v2469_v28 = vmul.f32 0.01, %v2341_v40  ;;  %vm2405_vm15 = vcmp.ge.f32.partialorder %v2341_v40, 0.0 }
 0x2d1   : > { %v2470_v15 = vmul.f32 0.01, %v2342_v0  ;;  %vm2406_vm6 = vcmp.ge.f32.partialorder %v2342_v0, 0.0 }
 0x2d2   : > { %v2533_v39 = vsel %vm2405_vm15, %v2341_v40, %v2469_v28 }
 0x2d3   : > { %v2106_v7 = vpop.f32.mrf.mxu0  ;;  %v2534_v21 = vsel %vm2406_vm6, %v2342_v0, %v2470_v15 }
 0x2d4   : > { %v2195_v30 = vpop.f32.mrf.mxu1  ;;  %v2273_v19 = vadd.f32 %v2106_v7, %v7485_v9 }
 0x2d5   : > { %v2274_v51 = vadd.f32 %v2195_v30, %v7487_v41 }
 0x2d6   : > { %v2343_v29 = vadd.f32 %v7831_v18, %v2273_v19  ;;  %v6625_v19 = vld [vmem:[%s6881_s26 + $0x68] sm:$0xff] }
 0x2d7   : > { %v2344_v1 = vadd.f32 %v7834_v31, %v2274_v51  ;;  %v2007_v51 = vrot.slane %v6625_v19, 2 }
 0x2d8   : > { %v2471_v44 = vmul.f32 0.01, %v2343_v29  ;;  %vm2407_vm8 = vcmp.ge.f32.partialorder %v2343_v29, 0.0 }
 0x2d9   : > { %vm2408_vm7 = vcmp.ge.f32.partialorder %v2344_v1, 0.0  ;;  %v2472_v57 = vmul.f32 0.01, %v2344_v1 }
 0x2da   : > { %v2535_v9 = vsel %vm2407_vm8, %v2343_v29, %v2471_v44 }
 0x2db   : > { %v2536_v59 = vsel %vm2408_vm7, %v2344_v1, %v2472_v57  ;;  %v2109_v60 = vpop.f32.mrf.mxu0  ;;  %v2593_v37 = vpack.c.bf16 %v2535_v9, %v2533_v39 }
 0x2dc   : > { %v2198_v41 = vpop.f32.mrf.mxu1  ;;  %v2594_v43 = vpack.c.bf16 %v2536_v59, %v2534_v21  ;;  %v2275_v61 = vadd.f32 %v2109_v60, %v7499_v33  ;;  %v2008_v59 = vsel %vm807_vm0, %v2005_v27, %v2007_v51  ;;  %v1930_v60 = vadd.f32 %v7541_v47, %v7545_v12  ;;  %v6626_v47 = vld [vmem:[%s6881_s26 + $0x70] sm:$0xff] }
 0x2dd   : > { %2776 = vmatmul.bf16.gmra.mxu2 %v2593_v37  ;;  %v2276_v50 = vadd.f32 %v2198_v41, %v7501_v42  ;;  %v1931_v41 = vadd.f32 %v7550_v63, %v7548_v14  ;;  %v2009_v12 = vrot.slane %v6626_v47, 2 }
 0x2de   : > { %5752 = vmatmul.msk.bf16.gmra.mxu3 %vm2705_vm10, %v2594_v43  ;;  %5689 = vmatmul.msk.bf16.gmra.mxu0 %vm758_vm1, %v2006_v11  ;;  %v2345_v55 = vadd.f32 %v7831_v18, %v2275_v61 }
 0x2df   : > { %5705 = vmatmul.msk.bf16.gmra.mxu1 %vm758_vm1, %v2006_v11  ;;  %v2346_v17 = vadd.f32 %v7834_v31, %v2276_v50  ;;  %v2010_v19 = vsel %vm807_vm0, %v2007_v51, %v2009_v12 }
 0x2e0   : > { %v2473_v7 = vmul.f32 0.01, %v2345_v55  ;;  %vm2409_vm9 = vcmp.ge.f32.partialorder %v2345_v55, 0.0 }
 0x2e1   : > { %v2474_v30 = vmul.f32 0.01, %v2346_v17  ;;  %vm2410_vm11 = vcmp.ge.f32.partialorder %v2346_v17, 0.0 }
 0x2e2   : > { %v2537_v26 = vsel %vm2409_vm9, %v2345_v55, %v2473_v7 }
 0x2e3   : > { %v2111_v25 = vpop.f32.mrf.mxu0  ;;  %v2538_v29 = vsel %vm2410_vm11, %v2346_v17, %v2474_v30 }
 0x2e4   : > { %v2200_v40 = vpop.f32.mrf.mxu1  ;;  %v2277_v10 = vadd.f32 %v2111_v25, %v7508_v32 }
 0x2e5   : > { %v2278_v0 = vadd.f32 %v2200_v40, %v7510_v13 }
 0x2e6   : > { %v2347_v33 = vadd.f32 %v7831_v18, %v2277_v10 }
 0x2e7   : > { %v2348_v42 = vadd.f32 %v7834_v31, %v2278_v0 }
 0x2e8   : > { %v2475_v28 = vmul.f32 0.01, %v2347_v33  ;;  %vm2411_vm13 = vcmp.ge.f32.partialorder %v2347_v33, 0.0 }
 0x2e9   : > { %vm2412_vm12 = vcmp.ge.f32.partialorder %v2348_v42, 0.0  ;;  %v2476_v15 = vmul.f32 0.01, %v2348_v42 }
 0x2ea   : > { %v2539_v32 = vsel %vm2411_vm13, %v2347_v33, %v2475_v28 }
 0x2eb   : > { %v2540_v1 = vsel %vm2412_vm12, %v2348_v42, %v2476_v15  ;;  %v2114_v44 = vpop.f32.mrf.mxu0  ;;  %v2595_v57 = vpack.c.bf16 %v2539_v32, %v2537_v26 }
 0x2ec   : > { %v2203_v13 = vpop.f32.mrf.mxu1  ;;  %v2596_v21 = vpack.c.bf16 %v2540_v1, %v2538_v29  ;;  %v2279_v39 = vadd.f32 %v2114_v44, %v7522_v3  ;;  %v1934_v29 = vadd.f32 %v7569_v4, %v7572_v58  ;;  %v1935_v1 = vadd.f32 %v7577_v24, %v7575_v2  ;;  %v6627_v4 = vld [vmem:[%s6881_s26 + $0x78] sm:$0xff] }
 0x2ed   : > { %2781 = vmatmul.bf16.gmra.mxu2 %v2595_v57  ;;  %v2280_v9 = vadd.f32 %v2203_v13, %v7524_v20  ;;  %v2011_v58 = vrot.slane %v6627_v4, 2 }
 0x2ee   : > { %5753 = vmatmul.msk.bf16.gmra.mxu3 %vm2705_vm10, %v2596_v21  ;;  %5690 = vmatmul.msk.bf16.gmra.mxu0 %vm758_vm1, %v2008_v59  ;;  %v2349_v27 = vadd.f32 %v7831_v18, %v2279_v39 }
 0x2ef   : > { %5706 = vmatmul.msk.bf16.gmra.mxu1 %vm758_vm1, %v2008_v59  ;;  %v2350_v37 = vadd.f32 %v7834_v31, %v2280_v9 }
 0x2f0   : > { %v2477_v20 = vmul.f32 0.01, %v2349_v27  ;;  %vm2413_vm14 = vcmp.ge.f32.partialorder %v2349_v27, 0.0 }
 0x2f1   : > { %v2478_v50 = vmul.f32 0.01, %v2350_v37  ;;  %vm2414_vm15 = vcmp.ge.f32.partialorder %v2350_v37, 0.0 }
 0x2f2   : > { %v2541_v10 = vsel %vm2413_vm14, %v2349_v27, %v2477_v20 }
 0x2f3   : > { %v2116_v43 = vpop.f32.mrf.mxu0  ;;  %v2542_v63 = vsel %vm2414_vm15, %v2350_v37, %v2478_v50  ;;  %v1938_v50 = vadd.f32 %v7604_v6, %v7607_v56 }
 0x2f4   : > { %v2205_v11 = vpop.f32.mrf.mxu1  ;;  %v2281_v3 = vadd.f32 %v2116_v43, %v1930_v60 }
 0x2f5   : > { %v2282_v61 = vadd.f32 %v2205_v11, %v1931_v41 }
 0x2f6   : > { %v2351_v55 = vadd.f32 %v7831_v18, %v2281_v3  ;;  %v2012_v3 = vsel %vm807_vm0, %v2009_v12, %v2011_v58 }
 0x2f7   : > { %v2352_v17 = vadd.f32 %v7834_v31, %v2282_v61 }
 0x2f8   : > { %v2479_v25 = vmul.f32 0.01, %v2351_v55  ;;  %vm2415_vm7 = vcmp.ge.f32.partialorder %v2351_v55, 0.0 }
 0x2f9   : > { %vm2416_vm6 = vcmp.ge.f32.partialorder %v2352_v17, 0.0  ;;  %v2480_v14 = vmul.f32 0.01, %v2352_v17 }
 0x2fa   : > { %v2543_v0 = vsel %vm2415_vm7, %v2351_v55, %v2479_v25  ;;  %v1939_v55 = vadd.f32 %v7612_v8, %v7610_v54 }
 0x2fb   : > { %v2544_v40 = vsel %vm2416_vm6, %v2352_v17, %v2480_v14  ;;  %v2119_v7 = vpop.f32.mrf.mxu0  ;;  %v2597_v33 = vpack.c.bf16 %v2543_v0, %v2541_v10 }
 0x2fc   : > { %v2208_v30 = vpop.f32.mrf.mxu1  ;;  %v2598_v42 = vpack.c.bf16 %v2544_v40, %v2542_v63  ;;  %v2283_v28 = vadd.f32 %v2119_v7, %v7563_v49 }
 0x2fd   : > { %2786 = vmatmul.bf16.gmra.mxu2 %v2597_v33  ;;  %v2284_v15 = vadd.f32 %v2208_v30, %v7565_v22 }
 0x2fe   : > { %5754 = vmatmul.msk.bf16.gmra.mxu3 %vm2705_vm10, %v2598_v42  ;;  %5691 = vmatmul.msk.bf16.gmra.mxu0 %vm758_vm1, %v2010_v19  ;;  %v2353_v51 = vadd.f32 %v7831_v18, %v2283_v28 }
 0x2ff   : > { %5707 = vmatmul.msk.bf16.gmra.mxu1 %vm758_vm1, %v2010_v19  ;;  %v2354_v26 = vadd.f32 %v7834_v31, %v2284_v15 }
 0x300   : > { %v2481_v22 = vmul.f32 0.01, %v2353_v51  ;;  %vm2417_vm8 = vcmp.ge.f32.partialorder %v2353_v51, 0.0 }
 0x301   : > { %v2482_v57 = vmul.f32 0.01, %v2354_v26  ;;  %vm2418_vm9 = vcmp.ge.f32.partialorder %v2354_v26, 0.0 }
 0x302   : > { %v2545_v60 = vsel %vm2417_vm8, %v2353_v51, %v2481_v22 }
 0x303   : > { %v2121_v32 = vpop.f32.mrf.mxu0  ;;  %v2546_v24 = vsel %vm2418_vm9, %v2354_v26, %v2482_v57 }
 0x304   : > { %v2210_v44 = vpop.f32.mrf.mxu1  ;;  %v2285_v49 = vadd.f32 %v2121_v32, %v1934_v29  ;;  %v1942_v29 = vadd.f32 %v7624_v16, %v7627_v53 }
 0x305   : > { %v2286_v13 = vadd.f32 %v2210_v44, %v1935_v1  ;;  %v9420_v1 = vld [vmem:[#allocation35_spill] sm:$0xff] }
 0x306   : > { %v2355_v21 = vadd.f32 %v7831_v18, %v2285_v49  ;;  %v1943_v51 = vadd.f32 %v9420_v1, %v7630_v5 }
 0x307   : > { %v2356_v59 = vadd.f32 %v7834_v31, %v2286_v13 }
 0x308   : > { %v2483_v39 = vmul.f32 0.01, %v2355_v21  ;;  %vm2419_vm12 = vcmp.ge.f32.partialorder %v2355_v21, 0.0 }
 0x309   : > { %vm2420_vm11 = vcmp.ge.f32.partialorder %v2356_v59, 0.0  ;;  %v2484_v2 = vmul.f32 0.01, %v2356_v59 }
 0x30a   : > { %v2547_v41 = vsel %vm2419_vm12, %v2355_v21, %v2483_v39 }
 0x30b   : > { %v2548_v9 = vsel %vm2420_vm11, %v2356_v59, %v2484_v2  ;;  %v2124_v27 = vpop.f32.mrf.mxu0  ;;  %v2599_v43 = vpack.c.bf16 %v2547_v41, %v2545_v60  ;;  %v9421_v60 = vld [vmem:[#allocation11_spill] sm:$0xff] }
 0x30c   : > { %v2213_v37 = vpop.f32.mrf.mxu1  ;;  %v2600_v11 = vpack.c.bf16 %v2548_v9, %v2546_v24  ;;  %v2287_v61 = vadd.f32 %v2124_v27, %v7598_v35  ;;  %v9422_v27 = vld [vmem:[#allocation36_spill] sm:$0xff] }
 0x30d   : > { %2791 = vmatmul.bf16.gmra.mxu2 %v2599_v43  ;;  %v2288_v20 = vadd.f32 %v2213_v37, %v7600_v48  ;;  %v9423_v43 = vld [vmem:[#allocation37_spill] sm:$0xff] }
 0x30e   : > { %5755 = vmatmul.msk.bf16.gmra.mxu3 %vm2705_vm10, %v2600_v11  ;;  %5692 = vmatmul.msk.bf16.gmra.mxu0 %vm758_vm1, %v2012_v3  ;;  %v2357_v17 = vadd.f32 %v7831_v18, %v2287_v61  ;;  %v1946_v11 = vadd.f32 %v9423_v43, %v7648_v36  ;;  %v9425_v61 = vld [vmem:[#allocation13_spill] sm:$0xff]  ;;  %v7952_v36 = vpop.f32.mrf.mxu2 }
 0x30f   : > { %5708 = vmatmul.msk.bf16.gmra.mxu1 %vm758_vm1, %v2012_v3  ;;  %v2358_v47 = vadd.f32 %v7834_v31, %v2288_v20  ;;  %v9424_v3 = vld [vmem:[#allocation12_spill] sm:$0xff] }
 0x310   : > { %v2485_v63 = vmul.f32 0.01, %v2357_v17  ;;  %vm2421_vm13 = vcmp.ge.f32.partialorder %v2357_v17, 0.0  ;;  %v1947_v20 = vadd.f32 %v9425_v61, %v9424_v3 }
 0x311   : > { %v2486_v48 = vmul.f32 0.01, %v2358_v47  ;;  %vm2422_vm14 = vcmp.ge.f32.partialorder %v2358_v47, 0.0 }
 0x312   : > { %v2549_v0 = vsel %vm2421_vm13, %v2357_v17, %v2485_v63 }
 0x313   : > { %v2126_v12 = vpop.f32.mrf.mxu0  ;;  %v2550_v54 = vsel %vm2422_vm14, %v2358_v47, %v2486_v48 }
 0x314   : > { %v2215_v25 = vpop.f32.mrf.mxu1  ;;  %v2289_v14 = vadd.f32 %v2126_v12, %v1938_v50 }
 0x315   : > { %v2290_v35 = vadd.f32 %v2215_v25, %v1939_v55 }
 0x316   : > { %v2359_v40 = vadd.f32 %v7831_v18, %v2289_v14 }
 0x317   : > { %v2360_v10 = vadd.f32 %v7834_v31, %v2290_v35 }
 0x318   : > { %v2487_v6 = vmul.f32 0.01, %v2359_v40  ;;  %vm2423_vm6 = vcmp.ge.f32.partialorder %v2359_v40, 0.0 }
 0x319   : > { %vm2424_vm15 = vcmp.ge.f32.partialorder %v2360_v10, 0.0  ;;  %v2488_v56 = vmul.f32 0.01, %v2360_v10 }
 0x31a   : > { %v2551_v7 = vsel %vm2423_vm6, %v2359_v40, %v2487_v6  ;;  %v7954_v40 = vpop.f32.mrf.mxu3 }
 0x31b   : > { %v2552_v8 = vsel %vm2424_vm15, %v2360_v10, %v2488_v56  ;;  %v2129_v30 = vpop.f32.mrf.mxu0  ;;  %v2601_v42 = vpack.c.bf16 %v2551_v7, %v2549_v0 }
 0x31c   : > { %v2218_v33 = vpop.f32.mrf.mxu1  ;;  %v2602_v19 = vpack.c.bf16 %v2552_v8, %v2550_v54  ;;  %v2291_v28 = vadd.f32 %v2129_v30, %v7618_v52 }
 0x31d   : > { %2796 = vmatmul.bf16.gmra.mxu2 %v2601_v42  ;;  %v2292_v15 = vadd.f32 %v2218_v33, %v7620_v38 }
 0x31e   : > { %5756 = vmatmul.msk.bf16.gmra.mxu3 %vm2705_vm10, %v2602_v19  ;;  %5693 = vmatmul.msk.bf16.gmra.mxu0 %vm758_vm1, %v2011_v58  ;;  %v2361_v26 = vadd.f32 %v7831_v18, %v2291_v28  ;;  %v9426_v19 = vld [vmem:[#allocation14_spill] sm:$0xff] }
 0x31f   : > { %5709 = vmatmul.msk.bf16.gmra.mxu1 %vm758_vm1, %v2011_v58  ;;  %v2362_v32 = vadd.f32 %v7834_v31, %v2292_v15  ;;  %v9427_v15 = vld [vmem:[#allocation38_spill] sm:$0xff] }
 0x320   : > { %v2489_v22 = vmul.f32 0.01, %v2361_v26  ;;  %vm2425_vm1 = vcmp.ge.f32.partialorder %v2361_v26, 0.0 }
 0x321   : > { %v2490_v38 = vmul.f32 0.01, %v2362_v32  ;;  %vm2426_vm7 = vcmp.ge.f32.partialorder %v2362_v32, 0.0 }
 0x322   : > { %v2553_v4 = vsel %vm2425_vm1, %v2361_v26, %v2489_v22 }
 0x323   : > { %v2131_v44 = vpop.f32.mrf.mxu0  ;;  %v2554_v5 = vsel %vm2426_vm7, %v2362_v32, %v2490_v38  ;;  %v9428_v32 = vld [vmem:[#allocation39_spill] sm:$0xff] }
 0x324   : > { %v2220_v49 = vpop.f32.mrf.mxu1  ;;  %v2293_v13 = vadd.f32 %v2131_v44, %v1942_v29  ;;  %v1950_v44 = vadd.f32 %v9428_v32, %v7668_v62 }
 0x325   : > { %v2294_v52 = vadd.f32 %v2220_v49, %v1943_v51  ;;  %v9429_v49 = vld [vmem:[#allocation15_spill] sm:$0xff] }
 0x326   : > { %v2363_v57 = vadd.f32 %v7831_v18, %v2293_v13  ;;  %v9430_v13 = vld [vmem:[#allocation16_spill] sm:$0xff] }
 0x327   : > { %v2364_v21 = vadd.f32 %v7834_v31, %v2294_v52  ;;  %v1951_v52 = vadd.f32 %v9430_v13, %v9429_v49 }
 0x328   : > { %v2491_v16 = vmul.f32 0.01, %v2363_v57  ;;  %vm2427_vm9 = vcmp.ge.f32.partialorder %v2363_v57, 0.0 }
 0x329   : > { %vm2428_vm8 = vcmp.ge.f32.partialorder %v2364_v21, 0.0  ;;  %v2492_v53 = vmul.f32 0.01, %v2364_v21 }
 0x32a   : > { %v2555_v58 = vsel %vm2427_vm9, %v2363_v57, %v2491_v16 }
 0x32b   : > { %v2556_v59 = vsel %vm2428_vm8, %v2364_v21, %v2492_v53  ;;  %v2134_v39 = vpop.f32.mrf.mxu0  ;;  %v2603_v24 = vpack.c.bf16 %v2555_v58, %v2553_v4 }
 0x32c   : > { %v2223_v2 = vpop.f32.mrf.mxu1  ;;  %v2604_v9 = vpack.c.bf16 %v2556_v59, %v2554_v5  ;;  %v2295_v41 = vadd.f32 %v2134_v39, %v9421_v60 }
 0x32d   : > { %2801 = vmatmul.bf16.gmra.mxu2 %v2603_v24  ;;  %v2296_v37 = vadd.f32 %v2223_v2, %v9422_v27 }
 0x32e   : > { %5757 = vmatmul.msk.bf16.gmra.mxu3 %vm2705_vm10, %v2604_v9  ;;  %v2365_v50 = vadd.f32 %v7831_v18, %v2295_v41 }
 0x32f   : > { %v2366_v55 = vadd.f32 %v7834_v31, %v2296_v37 }
 0x330   : > { %v2493_v14 = vmul.f32 0.01, %v2365_v50  ;;  %vm2429_vm11 = vcmp.ge.f32.partialorder %v2365_v50, 0.0 }
 0x331   : > { %v2494_v35 = vmul.f32 0.01, %v2366_v55  ;;  %vm2430_vm12 = vcmp.ge.f32.partialorder %v2366_v55, 0.0 }
 0x332   : > { %v2557_v8 = vsel %vm2429_vm11, %v2365_v50, %v2493_v14  ;;  %v9431_v50 = vld [vmem:[#allocation17_spill] sm:$0xff] }
 0x333   : > { %v2136_v17 = vpop.f32.mrf.mxu0  ;;  %v2558_v56 = vsel %vm2430_vm12, %v2366_v55, %v2494_v35  ;;  %v9433_v35 = vld [vmem:[#allocation41_spill] sm:$0xff] }
 0x334   : > { %v2225_v47 = vpop.f32.mrf.mxu1  ;;  %v2297_v12 = vadd.f32 %v2136_v17, %v1946_v11  ;;  %v9432_v17 = vld [vmem:[#allocation40_spill] sm:$0xff] }
 0x335   : > { %v2298_v25 = vadd.f32 %v2225_v47, %v1947_v20 }
 0x336   : > { %v2367_v63 = vadd.f32 %v7831_v18, %v2297_v12 }
 0x337   : > { %v2368_v48 = vadd.f32 %v7834_v31, %v2298_v25 }
 0x338   : > { %v2495_v10 = vmul.f32 0.01, %v2367_v63  ;;  %vm2431_vm14 = vcmp.ge.f32.partialorder %v2367_v63, 0.0 }
 0x339   : > { %vm2432_vm13 = vcmp.ge.f32.partialorder %v2368_v48, 0.0  ;;  %v2496_v6 = vmul.f32 0.01, %v2368_v48 }
 0x33a   : > { %v2559_v0 = vsel %vm2431_vm14, %v2367_v63, %v2495_v10  ;;  %v1954_v63 = vadd.f32 %v9433_v35, %v7688_v34  ;;  %v9435_v10 = vld [vmem:[#allocation19_spill] sm:$0xff] }
 0x33b   : > { %v2560_v54 = vsel %vm2432_vm13, %v2368_v48, %v2496_v6  ;;  %v2139_v7 = vpop.f32.mrf.mxu0  ;;  %v2605_v33 = vpack.c.bf16 %v2559_v0, %v2557_v8  ;;  %v9434_v48 = vld [vmem:[#allocation18_spill] sm:$0xff] }
 0x33c   : > { %v2228_v30 = vpop.f32.mrf.mxu1  ;;  %v2606_v42 = vpack.c.bf16 %v2560_v54, %v2558_v56  ;;  %v2299_v28 = vadd.f32 %v2139_v7, %v9426_v19  ;;  %v1955_v6 = vadd.f32 %v9435_v10, %v9434_v48 }
 0x33d   : > { %2806 = vmatmul.bf16.gmra.mxu2 %v2605_v33  ;;  %v2300_v29 = vadd.f32 %v2228_v30, %v9427_v15 }
 0x33e   : > { %5758 = vmatmul.msk.bf16.gmra.mxu3 %vm2705_vm10, %v2606_v42  ;;  %v2369_v22 = vadd.f32 %v7831_v18, %v2299_v28 }
 0x33f   : > { %v2370_v38 = vadd.f32 %v7834_v31, %v2300_v29 }
 0x340   : > { %v2767_v1 = vpop.f32.mrf.mxu2  ;;  %v2497_v5 = vmul.f32 0.01, %v2369_v22  ;;  %vm2433_vm15 = vcmp.ge.f32.partialorder %v2369_v22, 0.0 }
 0x341   : > { %v2856_v51 = vpop.f32.mrf.mxu3  ;;  %v2498_v59 = vmul.f32 0.01, %v2370_v38  ;;  %vm2434_vm6 = vcmp.ge.f32.partialorder %v2370_v38, 0.0 }
 0x342   : > { %v7959_v26 = vadd.f32 %v2856_v51, %v2767_v1  ;;  %v2561_v27 = vsel %vm2433_vm15, %v2369_v22, %v2497_v5  ;;  %v9437_v5 = vld [vmem:[#allocation42_spill] sm:$0xff] }
 0x343   : > { %v2141_v57 = vpop.f32.mrf.mxu0  ;;  %v2562_v60 = vsel %vm2434_vm6, %v2370_v38, %v2498_v59 }
 0x344   : > { %v2230_v21 = vpop.f32.mrf.mxu1  ;;  %v2301_v16 = vadd.f32 %v2141_v57, %v1950_v44 }
 0x345   : > { %v2302_v53 = vadd.f32 %v2230_v21, %v1951_v52 }
 0x346   : > { %v2371_v4 = vadd.f32 %v7831_v18, %v2301_v16  ;;  %v9436_v16 = vld [vmem:[#allocation20_spill] sm:$0xff] }
 0x347   : > { %v2372_v58 = vadd.f32 %v7834_v31, %v2302_v53 }
 0x348   : > { %v2499_v62 = vmul.f32 0.01, %v2371_v4  ;;  %v2769_v2 = vpop.f32.mrf.mxu2  ;;  %vm2435_vm7 = vcmp.ge.f32.partialorder %v2371_v4, 0.0 }
 0x349   : > { %vm2436_vm1 = vcmp.ge.f32.partialorder %v2372_v58, 0.0  ;;  %v2500_v39 = vmul.f32 0.01, %v2372_v58  ;;  %v2858_v24 = vpop.f32.mrf.mxu3 }
 0x34a   : > { %v7969_v9 = vadd.f32 %v2858_v24, %v2769_v2  ;;  %v2563_v37 = vsel %vm2435_vm7, %v2371_v4, %v2499_v62  ;;  %v9439_v24 = vld [vmem:[#allocation21_spill] sm:$0xff] }
 0x34b   : > { %v2564_v41 = vsel %vm2436_vm1, %v2372_v58, %v2500_v39  ;;  %v2144_v11 = vpop.f32.mrf.mxu0  ;;  %v2607_v61 = vpack.c.bf16 %v2563_v37, %v2561_v27  ;;  %v9438_v39 = vld [vmem:[#allocation43_spill] sm:$0xff] }
 0x34c   : > { %v2936_v43 = vpack.c.bf16 %v7969_v9, %v7959_v26  ;;  %v2233_v3 = vpop.f32.mrf.mxu1  ;;  %v2608_v20 = vpack.c.bf16 %v2564_v41, %v2562_v60  ;;  %v2303_v55 = vadd.f32 %v2144_v11, %v9431_v50  ;;  %v1958_v2 = vadd.f32 %v9438_v39, %v7708_v45  ;;  %v9440_v60 = vld [vmem:[#allocation22_spill] sm:$0xff] }
 0x34d   : > { %2811 = vmatmul.bf16.gmra.mxu2 %v2607_v61  ;;  %v2304_v47 = vadd.f32 %v2233_v3, %v9432_v17  ;;  %v1959_v41 = vadd.f32 %v9440_v60, %v9439_v24 }
 0x34e   : > { %5759 = vmatmul.msk.bf16.gmra.mxu3 %vm2705_vm10, %v2608_v20  ;;  %v2373_v56 = vadd.f32 %v7831_v18, %v2303_v55 }
 0x34f   : > { %v2374_v54 = vadd.f32 %v7834_v31, %v2304_v47 }
 0x350   : > { %v2772_v12 = vpop.f32.mrf.mxu2  ;;  %v2501_v33 = vmul.f32 0.01, %v2373_v56  ;;  %vm2437_vm8 = vcmp.ge.f32.partialorder %v2373_v56, 0.0 }
 0x351   : > { %v2861_v25 = vpop.f32.mrf.mxu3  ;;  %v2502_v42 = vmul.f32 0.01, %v2374_v54  ;;  %vm2438_vm9 = vcmp.ge.f32.partialorder %v2374_v54, 0.0 }
 0x352   : > { %v7976_v14 = vadd.f32 %v2861_v25, %v2772_v12  ;;  %v2565_v49 = vsel %vm2437_vm8, %v2373_v56, %v2501_v33  ;;  %v9441_v33 = vld [vmem:[#allocation23_spill] sm:$0xff] }
 0x353   : > { %v2146_v8 = vpop.f32.mrf.mxu0  ;;  %v2566_v32 = vsel %vm2438_vm9, %v2374_v54, %v2502_v42 }
 0x354   : > { %v2235_v0 = vpop.f32.mrf.mxu1  ;;  %v2305_v7 = vadd.f32 %v2146_v8, %v1954_v63 }
 0x355   : > { %v2306_v30 = vadd.f32 %v2235_v0, %v1955_v6 }
 0x356   : > { %v2375_v19 = vadd.f32 %v7831_v18, %v2305_v7 }
 0x357   : > { %v2376_v28 = vadd.f32 %v7834_v31, %v2306_v30 }
 0x358   : > { %v2503_v34 = vmul.f32 0.01, %v2375_v19  ;;  %v2774_v29 = vpop.f32.mrf.mxu2  ;;  %vm2439_vm12 = vcmp.ge.f32.partialorder %v2375_v19, 0.0 }
 0x359   : > { %vm2440_vm11 = vcmp.ge.f32.partialorder %v2376_v28, 0.0  ;;  %v2504_v15 = vmul.f32 0.01, %v2376_v28  ;;  %v2863_v1 = vpop.f32.mrf.mxu3 }
 0x35a   : > { %v7986_v51 = vadd.f32 %v2863_v1, %v2774_v29  ;;  %v2567_v13 = vsel %vm2439_vm12, %v2375_v19, %v2503_v34  ;;  %v9442_v19 = vld [vmem:[#allocation44_spill] sm:$0xff]  ;;  %v9443_v1 = vld [vmem:[#allocation45_spill] sm:$0xff] }
 0x35b   : > { %v2568_v44 = vsel %vm2440_vm11, %v2376_v28, %v2504_v15  ;;  %v2149_v22 = vpop.f32.mrf.mxu0  ;;  %v2609_v57 = vpack.c.bf16 %v2567_v13, %v2565_v49 }
 0x35c   : > { %v2937_v52 = vpack.c.bf16 %v7986_v51, %v7976_v14  ;;  %v2238_v38 = vpop.f32.mrf.mxu1  ;;  %v2610_v21 = vpack.c.bf16 %v2568_v44, %v2566_v32  ;;  %v2307_v53 = vadd.f32 %v2149_v22, %v9436_v16  ;;  %v1962_v32 = vadd.f32 %v9443_v1, %v7728_v46  ;;  %v9444_v44 = vld [vmem:[#allocation24_spill] sm:$0xff] }
 0x35d   : > { %2816 = vmatmul.bf16.gmra.mxu2 %v2609_v57  ;;  %v2308_v59 = vadd.f32 %v2238_v38, %v9437_v5  ;;  %v1963_v49 = vadd.f32 %v9444_v44, %v7731_v23 }
 0x35e   : > { %5760 = vmatmul.msk.bf16.gmra.mxu3 %vm2705_vm10, %v2610_v21  ;;  %v2377_v27 = vadd.f32 %v7831_v18, %v2307_v53 }
 0x35f   : > { %v2378_v37 = vadd.f32 %v7834_v31, %v2308_v59 }
 0x360   : > { %v2777_v4 = vpop.f32.mrf.mxu2  ;;  %v2505_v50 = vmul.f32 0.01, %v2377_v27  ;;  %vm2441_vm13 = vcmp.ge.f32.partialorder %v2377_v27, 0.0 }
 0x361   : > { %v2866_v58 = vpop.f32.mrf.mxu3  ;;  %v2506_v55 = vmul.f32 0.01, %v2378_v37  ;;  %vm2442_vm14 = vcmp.ge.f32.partialorder %v2378_v37, 0.0 }
 0x362   : > { %v7993_v62 = vadd.f32 %v2866_v58, %v2777_v4  ;;  %v2569_v6 = vsel %vm2441_vm13, %v2377_v27, %v2505_v50  ;;  %v9445_v50 = vld [vmem:[#allocation25_spill] sm:$0xff] }
 0x363   : > { %v2151_v11 = vpop.f32.mrf.mxu0  ;;  %v2570_v48 = vsel %vm2442_vm14, %v2378_v37, %v2506_v55 }
 0x364   : > { %v2240_v3 = vpop.f32.mrf.mxu1  ;;  %v2309_v61 = vadd.f32 %v2151_v11, %v1958_v2 }
 0x365   : > { %v2310_v20 = vadd.f32 %v2240_v3, %v1959_v41 }
 0x366   : > { %v2379_v17 = vadd.f32 %v7831_v18, %v2309_v61 }
 0x367   : > { %v2380_v47 = vadd.f32 %v7834_v31, %v2310_v20 }
 0x368   : > { %v2507_v45 = vmul.f32 0.01, %v2379_v17  ;;  %v2779_v25 = vpop.f32.mrf.mxu2  ;;  %vm2443_vm6 = vcmp.ge.f32.partialorder %v2379_v17, 0.0 }
 0x369   : > { %vm2444_vm15 = vcmp.ge.f32.partialorder %v2380_v47, 0.0  ;;  %v2508_v12 = vmul.f32 0.01, %v2380_v47  ;;  %v2868_v35 = vpop.f32.mrf.mxu3 }
 0x36a   : > { %v8003_v63 = vadd.f32 %v2868_v35, %v2779_v25  ;;  %v2571_v56 = vsel %vm2443_vm6, %v2379_v17, %v2507_v45  ;;  %v9446_v17 = vld [vmem:[#allocation26_spill] sm:$0xff]  ;;  %v9447_v35 = vld [vmem:[#allocation27_spill] sm:$0xff] }
 0x36b   : > { %v2572_v10 = vsel %vm2444_vm15, %v2380_v47, %v2508_v12  ;;  %v2154_v8 = vpop.f32.mrf.mxu0  ;;  %v2611_v7 = vpack.c.bf16 %v2571_v56, %v2569_v6  ;;  %v9449_v6 = vld [vmem:[#allocation28_spill] sm:$0xff]  ;;  %v9450_v56 = vld [vmem:[#allocation47_spill] sm:$0xff] }
 0x36c   : > { %v2938_v54 = vpack.c.bf16 %v8003_v63, %v7993_v62  ;;  %v2243_v0 = vpop.f32.mrf.mxu1  ;;  %v2612_v30 = vpack.c.bf16 %v2572_v10, %v2570_v48  ;;  %v2311_v42 = vadd.f32 %v2154_v8, %v9441_v33  ;;  %v9448_v48 = vld [vmem:[#allocation46_spill] sm:$0xff]  ;;  %v1967_v8 = vadd.f32 %v9450_v56, %v9449_v6 }
 0x36d   : > { %2821 = vmatmul.bf16.gmra.mxu2 %v2611_v7  ;;  %v2312_v28 = vadd.f32 %v2243_v0, %v9442_v19  ;;  %v1966_v10 = vadd.f32 %v9448_v48, %v9447_v35 }
 0x36e   : > { %5761 = vmatmul.msk.bf16.gmra.mxu3 %vm2705_vm10, %v2612_v30  ;;  %v2381_v13 = vadd.f32 %v7831_v18, %v2311_v42 }
 0x36f   : > { %v2382_v22 = vadd.f32 %v7834_v31, %v2312_v28 }
 0x370   : > { %v2782_v34 = vpop.f32.mrf.mxu2  ;;  %v2509_v53 = vmul.f32 0.01, %v2381_v13  ;;  %vm2445_vm1 = vcmp.ge.f32.partialorder %v2381_v13, 0.0 }
 0x371   : > { %v2871_v15 = vpop.f32.mrf.mxu3  ;;  %v2510_v5 = vmul.f32 0.01, %v2382_v22  ;;  %vm2446_vm7 = vcmp.ge.f32.partialorder %v2382_v22, 0.0 }
 0x372   : > { %v8010_v29 = vadd.f32 %v2871_v15, %v2782_v34  ;;  %v2573_v41 = vsel %vm2445_vm1, %v2381_v13, %v2509_v53 }
 0x373   : > { %v2156_v38 = vpop.f32.mrf.mxu0  ;;  %v2574_v24 = vsel %vm2446_vm7, %v2382_v22, %v2510_v5 }
 0x374   : > { %v2245_v57 = vpop.f32.mrf.mxu1  ;;  %v2313_v21 = vadd.f32 %v2156_v38, %v1962_v32 }
 0x375   : > { %v2314_v16 = vadd.f32 %v2245_v57, %v1963_v49 }
 0x376   : > { %v2383_v59 = vadd.f32 %v7831_v18, %v2313_v21 }
 0x377   : > { %v2384_v4 = vadd.f32 %v7834_v31, %v2314_v16 }
 0x378   : > { %v2511_v46 = vmul.f32 0.01, %v2383_v59  ;;  %v2784_v23 = vpop.f32.mrf.mxu2  ;;  %vm2447_vm9 = vcmp.ge.f32.partialorder %v2383_v59, 0.0 }
 0x379   : > { %vm2448_vm8 = vcmp.ge.f32.partialorder %v2384_v4, 0.0  ;;  %v2512_v58 = vmul.f32 0.01, %v2384_v4  ;;  %v2873_v39 = vpop.f32.mrf.mxu3 }
 0x37a   : > { %v8020_v2 = vadd.f32 %v2873_v39, %v2784_v23  ;;  %v2575_v27 = vsel %vm2447_vm9, %v2383_v59, %v2511_v46 }
 0x37b   : > { %v2576_v60 = vsel %vm2448_vm8, %v2384_v4, %v2512_v58  ;;  %v2159_v11 = vpop.f32.mrf.mxu0  ;;  %v2613_v61 = vpack.c.bf16 %v2575_v27, %v2573_v41  ;;  %v9451_v4 = vld [vmem:[#allocation29_spill] sm:$0xff]  ;;  %v9452_v58 = vld [vmem:[#allocation48_spill] sm:$0xff] }
 0x37c   : > { %v2939_v37 = vpack.c.bf16 %v8020_v2, %v8010_v29  ;;  %v2248_v3 = vpop.f32.mrf.mxu1  ;;  %v2614_v20 = vpack.c.bf16 %v2576_v60, %v2574_v24  ;;  %v2315_v55 = vadd.f32 %v2159_v11, %v9445_v50  ;;  %v9453_v60 = vld [vmem:[#allocation30_spill] sm:$0xff]  ;;  %v9454_v41 = vld [vmem:[#allocation49_spill] sm:$0xff]  ;;  %v9455_v11 = vld [vmem:[#allocation31_spill] sm:$0xff] }
 0x37d   : > { %2826 = vmatmul.bf16.gmra.mxu2 %v2613_v61  ;;  %v2316_v47 = vadd.f32 %v2248_v3, %v9446_v17  ;;  %v1970_v27 = vadd.f32 %v9454_v41, %v9453_v60  ;;  %v9456_v3 = vld [vmem:[#allocation50_spill] sm:$0xff] }
 0x37e   : > { %5762 = vmatmul.msk.bf16.gmra.mxu3 %vm2705_vm10, %v2614_v20  ;;  %v2385_v0 = vadd.f32 %v7831_v18, %v2315_v55  ;;  %v1971_v61 = vadd.f32 %v9456_v3, %v9455_v11 }
 0x37f   : > { %v2386_v7 = vadd.f32 %v7834_v31, %v2316_v47 }
 0x380   : > { %v2787_v45 = vpop.f32.mrf.mxu2  ;;  %v2513_v28 = vmul.f32 0.01, %v2385_v0  ;;  %vm2449_vm11 = vcmp.ge.f32.partialorder %v2385_v0, 0.0 }
 0x381   : > { %v2876_v12 = vpop.f32.mrf.mxu3  ;;  %v2514_v34 = vmul.f32 0.01, %v2386_v7  ;;  %vm2450_vm12 = vcmp.ge.f32.partialorder %v2386_v7, 0.0 }
 0x382   : > { %v8027_v25 = vadd.f32 %v2876_v12, %v2787_v45  ;;  %v2577_v57 = vsel %vm2449_vm11, %v2385_v0, %v2513_v28 }
 0x383   : > { %v2161_v30 = vpop.f32.mrf.mxu0  ;;  %v2578_v22 = vsel %vm2450_vm12, %v2386_v7, %v2514_v34 }
 0x384   : > { %v2250_v33 = vpop.f32.mrf.mxu1  ;;  %v2317_v42 = vadd.f32 %v2161_v30, %v1966_v10 }
 0x385   : > { %v2318_v19 = vadd.f32 %v2250_v33, %v1967_v8 }
 0x386   : > { %v2387_v15 = vadd.f32 %v7831_v18, %v2317_v42 }
 0x387   : > { %v2388_v1 = vadd.f32 %v7834_v31, %v2318_v19 }
 0x388   : > { %v2515_v32 = vmul.f32 0.01, %v2387_v15  ;;  %v8037_v49 = vpop.f32.mrf.mxu2  ;;  %vm2451_vm14 = vcmp.ge.f32.partialorder %v2387_v15, 0.0 }
 0x389   : > { %vm2452_vm13 = vcmp.ge.f32.partialorder %v2388_v1, 0.0  ;;  %v2516_v44 = vmul.f32 0.01, %v2388_v1  ;;  %v8039_v13 = vpop.f32.mrf.mxu3 }
 0x38a   : > { %v2579_v21 = vsel %vm2451_vm14, %v2387_v15, %v2515_v32 }
 0x38b   : > { %v2580_v38 = vsel %vm2452_vm13, %v2388_v1, %v2516_v44  ;;  %v2164_v16 = vpop.f32.mrf.mxu0  ;;  %v2615_v5 = vpack.c.bf16 %v2579_v21, %v2577_v57  ;;  %v9457_v1 = vld [vmem:[#allocation32_spill] sm:$0xff]  ;;  %v9458_v44 = vld [vmem:[#allocation51_spill] sm:$0xff]  ;;  %v9459_v21 = vld [vmem:[#allocation33_spill] sm:$0xff]  ;;  %vm3346_vm13 = vcmask 1041408  }
 0x38c   : > { %v2253_v53 = vpop.f32.mrf.mxu1  ;;  %v2616_v59 = vpack.c.bf16 %v2580_v38, %v2578_v22  ;;  %v2319_v46 = vadd.f32 %v2164_v16, %v9451_v4  ;;  %v1974_v16 = vadd.f32 %v7952_v36, %v9459_v21 }
 0x38d   : > { %2831 = vmatmul.bf16.gmra.mxu2 %v2615_v5  ;;  %v2320_v23 = vadd.f32 %v2253_v53, %v9452_v58  ;;  %v9460_v53 = vld [vmem:[#allocation34_spill] sm:$0xff] }
 0x38e   : > { %5763 = vmatmul.msk.bf16.gmra.mxu3 %vm2705_vm10, %v2616_v59  ;;  %v2389_v20 = vadd.f32 %v7831_v18, %v2319_v46  ;;  %v1975_v5 = vadd.f32 %v7954_v40, %v9460_v53 }
 0x38f   : > { %v2390_v50 = vadd.f32 %v7834_v31, %v2320_v23 }
 0x390   : > { %v8044_v39 = vpop.f32.mrf.mxu2  ;;  %v2517_v12 = vmul.f32 0.01, %v2389_v20  ;;  %vm2453_vm15 = vcmp.ge.f32.partialorder %v2389_v20, 0.0 }
 0x391   : > { %v8046_v24 = vpop.f32.mrf.mxu3  ;;  %v2518_v35 = vmul.f32 0.01, %v2390_v50  ;;  %vm2454_vm6 = vcmp.ge.f32.partialorder %v2390_v50, 0.0 }
 0x392   : > { %v2581_v33 = vsel %vm2453_vm15, %v2389_v20, %v2517_v12 }
 0x393   : > { %v2166_v55 = vpop.f32.mrf.mxu0  ;;  %v2582_v7 = vsel %vm2454_vm6, %v2390_v50, %v2518_v35  ;;  %vm3324_vm6 = vcmask 687104  }
 0x394   : > { %v2255_v17 = vpop.f32.mrf.mxu1  ;;  %v2321_v47 = vadd.f32 %v2166_v55, %v1970_v27 }
 0x395   : > { %v2322_v45 = vadd.f32 %v2255_v17, %v1971_v61 }
 0x396   : > { %v2391_v48 = vadd.f32 %v7831_v18, %v2321_v47 }
 0x397   : > { %v2392_v10 = vadd.f32 %v7834_v31, %v2322_v45 }
 0x398   : > { %v2519_v6 = vmul.f32 0.01, %v2391_v48  ;;  %v2794_v8 = vpop.f32.mrf.mxu2  ;;  %vm2455_vm7 = vcmp.ge.f32.partialorder %v2391_v48, 0.0 }
 0x399   : > { %vm2456_vm1 = vcmp.ge.f32.partialorder %v2392_v10, 0.0  ;;  %v2520_v56 = vmul.f32 0.01, %v2392_v10  ;;  %v2883_v0 = vpop.f32.mrf.mxu3 }
 0x39a   : > { %v2583_v42 = vsel %vm2455_vm7, %v2391_v48, %v2519_v6 }
 0x39b   : > { %v2584_v30 = vsel %vm2456_vm1, %v2392_v10, %v2520_v56  ;;  %v2169_v19 = vpop.f32.mrf.mxu0  ;;  %v2617_v34 = vpack.c.bf16 %v2583_v42, %v2581_v33  ;;  %v2884_v33 = vadd.f32 %v2883_v0, %v2794_v8 }
 0x39c   : > { %v2258_v28 = vpop.f32.mrf.mxu1  ;;  %v2618_v15 = vpack.c.bf16 %v2584_v30, %v2582_v7  ;;  %v2323_v32 = vadd.f32 %v2169_v19, %v9457_v1  ;;  %v2879_v1 = vadd.f32 %v8039_v13, %v8037_v49 }
 0x39d   : > { %2836 = vmatmul.bf16.gmra.mxu2 %v2617_v34  ;;  %v2324_v22 = vadd.f32 %v2258_v28, %v9458_v44  ;;  %v2882_v34 = vadd.f32 %v8046_v24, %v8044_v39 }
 0x39e   : > { %5764 = vmatmul.msk.bf16.gmra.mxu3 %vm2705_vm10, %v2618_v15  ;;  %v2393_v59 = vadd.f32 %v7831_v18, %v2323_v32  ;;  %v2940_v44 = vpack.c.bf16 %v2879_v1, %v8027_v25 }
 0x39f   : > { %v2394_v4 = vadd.f32 %v7834_v31, %v2324_v22  ;;  %v2941_v32 = vpack.c.bf16 %v2884_v33, %v2882_v34  ;;  %v5784_v33 = vld [vmem:[%s9247_s3 + $0x20] sm:$0xf] }
 0x3a0   : > { %v2797_v38 = vpop.f32.mrf.mxu2  ;;  %v2521_v41 = vmul.f32 0.01, %v2393_v59  ;;  %vm2457_vm8 = vcmp.ge.f32.partialorder %v2393_v59, 0.0 }
 0x3a1   : > { %v2886_v57 = vpop.f32.mrf.mxu3  ;;  %v2522_v27 = vmul.f32 0.01, %v2394_v4  ;;  %vm2458_vm9 = vcmp.ge.f32.partialorder %v2394_v4, 0.0 }
 0x3a2   : > { %v2585_v17 = vsel %vm2457_vm8, %v2393_v59, %v2521_v41  ;;  %v2887_v30 = vadd.f32 %v2886_v57, %v2797_v38  ;;  %v5768_v41 = vld [vmem:[%s9247_s3] sm:$0xf] }
 0x3a3   : > { %v2171_v46 = vpop.f32.mrf.mxu0  ;;  %v2586_v50 = vsel %vm2458_vm9, %v2394_v4, %v2522_v27  ;;  %v6458_v27 = vld [vmem:[%s9247_s3 + $0x4] sm:$0xf0] }
 0x3a4   : > { %v2260_v58 = vpop.f32.mrf.mxu1  ;;  %v2325_v23 = vadd.f32 %v2171_v46, %v1974_v16 }
 0x3a5   : > { %v2326_v60 = vadd.f32 %v2260_v58, %v1975_v5 }
 0x3a6   : > { %v2395_v11 = vadd.f32 %v7831_v18, %v2325_v23 }
 0x3a7   : > { %v2396_v3 = vadd.f32 %v7834_v31, %v2326_v60 }
 0x3a8   : > { %v2523_v36 = vmul.f32 0.01, %v2395_v11  ;;  %v2799_v40 = vpop.f32.mrf.mxu2  ;;  %vm2459_vm12 = vcmp.ge.f32.partialorder %v2395_v11, 0.0 }
 0x3a9   : > { %vm2460_vm11 = vcmp.ge.f32.partialorder %v2396_v3, 0.0  ;;  %v2524_v61 = vmul.f32 0.01, %v2396_v3  ;;  %v2888_v20 = vpop.f32.mrf.mxu3 }
 0x3aa   : > { %v2587_v47 = vsel %vm2459_vm12, %v2395_v11, %v2523_v36  ;;  %v2889_v56 = vadd.f32 %v2888_v20, %v2799_v40  ;;  %v5769_v11 = vor.u32 %v6458_v27, %v5768_v41  ;;  %v6480_v41 = vld [vmem:[%s9249_s5 + $0x44] sm:$0xf0]  ;;  %v6479_v27 = vld [vmem:[%s9249_s5 + $0x44] sm:$0xf] }
 0x3ab   : > { %v2588_v55 = vsel %vm2460_vm11, %v2396_v3, %v2524_v61  ;;  %v2619_v45 = vpack.c.bf16 %v2587_v47, %v2585_v17  ;;  %v5776_v47 = vld [vmem:[%s9247_s3 + $0x10] sm:$0xf] }
 0x3ac   : > { %v2620_v12 = vpack.c.bf16 %v2588_v55, %v2586_v50  ;;  %v2942_v42 = vpack.c.bf16 %v2889_v56, %v2887_v30 }
 0x3ad   : > { %2841 = vmatmul.bf16.gmra.mxu2 %v2619_v45  ;;  %v6460_v45 = vld [vmem:[%s9247_s3 + $0x14] sm:$0xf0] }
 0x3ae   : > { %5765 = vmatmul.msk.bf16.gmra.mxu3 %vm2705_vm10, %v2620_v12  ;;  %vm3029_vm10 = vcmask 1014784  }
 0x3b0   : > { %v2802_v18 = vpop.f32.mrf.mxu2 }
 0x3b1   : > { %v2891_v35 = vpop.f32.mrf.mxu3 }
 0x3b2   : > { %v2892_v10 = vadd.f32 %v2891_v35, %v2802_v18  ;;  %v5777_v35 = vor.u32 %v6460_v45, %v5776_v47  ;;  %v5818_v47 = vld [vmem:[%s9247_s3 + $0x68] sm:$0xf0]  ;;  %v5920_v45 = vld [vmem:[%s9249_s5 + $0x30] sm:$0xf] }
 0x3b8   : > { %v2804_v31 = vpop.f32.mrf.mxu2 }
 0x3b9   : > { %v2893_v48 = vpop.f32.mrf.mxu3 }
 0x3ba   : > { %v2894_v6 = vadd.f32 %v2893_v48, %v2804_v31 }
 0x3bc   : > { %v2943_v7 = vpack.c.bf16 %v2894_v6, %v2892_v10 }
 0x3be   : > { %3054 = vmatpush.bf16.msrb.mxu0 %v2943_v7 }
 0x3c0   : > { %v2807_v19 = vpop.f32.mrf.mxu2 }
 0x3c1   : > { %v2896_v28 = vpop.f32.mrf.mxu3 }
 0x3c2   : > { %v8070_v15 = vadd.f32 %v2896_v28, %v2807_v19  ;;  %3055 = vmatpush.bf16.msrb.mxu0 %v2942_v42  ;;  %v6462_v42 = vld [vmem:[%s9247_s3 + $0x24] sm:$0xf0] }
 0x3c3   : > { %v5785_v34 = vor.u32 %v6462_v42, %v5784_v33  ;;  %v5914_v33 = vld [vmem:[%s9249_s5 + $0x28] sm:$0xf0] }
 0x3c6   : > { %3056 = vmatpush.bf16.msrb.mxu0 %v2941_v32 }
 0x3c8   : > { %v8075_v22 = vpop.f32.mrf.mxu2 }
 0x3c9   : > { %v8077_v38 = vpop.f32.mrf.mxu3 }
 0x3ca   : > { %3057 = vmatpush.bf16.msrb.mxu0 %v2940_v44  ;;  %v2899_v1 = vadd.f32 %v8077_v38, %v8075_v22  ;;  %v6457_v44 = vld [vmem:[%s9247_s3 + $0x4] sm:$0xf]  ;;  %v5792_v22 = vld [vmem:[%s9247_s3 + $0x30] sm:$0xf]  ;;  %v6464_v38 = vld [vmem:[%s9247_s3 + $0x34] sm:$0xf0] }
 0x3ce   : > { %3058 = vmatpush.bf16.msrb.mxu0 %v2939_v37 }
 0x3d0   : > { %v2812_v39 = vpop.f32.mrf.mxu2 }
 0x3d1   : > { %v2901_v24 = vpop.f32.mrf.mxu3 }
 0x3d2   : > { %v8082_v8 = vadd.f32 %v2901_v24, %v2812_v39  ;;  %3059 = vmatpush.bf16.msrb.mxu0 %v2938_v54  ;;  %v5770_v39 = vld [vmem:[%s9247_s3 + $0x8] sm:$0xf0]  ;;  %v2944_v24 = vpack.c.bf16 %v2899_v1, %v8070_v15  ;;  %v5778_v15 = vld [vmem:[%s9247_s3 + $0x18] sm:$0xf0] }
 0x3d6   : > { %3060 = vmatpush.bf16.msrb.mxu0 %v2937_v52 }
 0x3d8   : > { %v2814_v25 = vpop.f32.mrf.mxu2 }
 0x3d9   : > { %v2903_v49 = vpop.f32.mrf.mxu3 }
 0x3da   : > { %3061 = vmatpush.bf16.msrb.mxu0 %v2936_v43  ;;  %v2904_v19 = vadd.f32 %v2903_v49, %v2814_v25  ;;  %v5773_v25 = vor.u32 %v6457_v44, %v5770_v39  ;;  %v6459_v49 = vld [vmem:[%s9247_s3 + $0x14] sm:$0xf]  ;;  %v6474_v44 = vld [vmem:[%s9249_s5 + $0x14] sm:$0xf0] }
 0x3db   : > { %v6473_v39 = vld [vmem:[%s9249_s5 + $0x14] sm:$0xf] }
 0x3dc   : > { %v2945_v32 = vpack.c.bf16 %v2904_v19, %v8082_v8  ;;  %v5793_v8 = vor.u32 %v6464_v38, %v5792_v22  ;;  %v5839_v19 = vld [vmem:[%s9249_s5 + $0xa8] sm:$0x33] }
 0x3dd   : > { %3062 = vmatmul.bf16.vlgmr.msrb.gmra.mxu0 %v5769_v11  ;;  %v5930_v11 = vld [vmem:[%s9249_s5 + $0x48] sm:$0xf0]  ;;  %v3301_v1 = vunpack.c.h.b16 %v5839_v19 }
 0x3df   : > { %v3313_v38 = vpack.c.b16 %v3301_v1, %v3301_v1 }
 0x3e0   : > { %v2817_v29 = vpop.f32.mrf.mxu2 }
 0x3e1   : > { %v2906_v2 = vpop.f32.mrf.mxu3 }
 0x3e2   : > { %v2907_v37 = vadd.f32 %v2906_v2, %v2817_v29  ;;  %v5781_v29 = vor.u32 %v6459_v49, %v5778_v15  ;;  %v5800_v2 = vld [vmem:[%s9247_s3 + $0x40] sm:$0xf]  ;;  %v3351_v15 = vsel %vm3346_vm13, %v3313_v38, 0 }
 0x3e3   : > { %3399 = vmatpush.bf16.msrb.mxu3 %v3351_v15 }
 0x3e8   : > { %v2819_v13 = vpop.f32.mrf.mxu2 }
 0x3e9   : > { %v2908_v0 = vpop.f32.mrf.mxu3 }
 0x3ea   : > { %v2909_v7 = vadd.f32 %v2908_v0, %v2819_v13  ;;  %v6461_v0 = vld [vmem:[%s9247_s3 + $0x24] sm:$0xf] }
 0x3ec   : > { %v2946_v28 = vpack.c.bf16 %v2909_v7, %v2907_v37  ;;  %v6466_v37 = vld [vmem:[%s9247_s3 + $0x44] sm:$0xf0]  ;;  %v6475_v7 = vld [vmem:[%s9249_s5 + $0x24] sm:$0xf] }
 0x3ed   : > { %3067 = vmatmul.bf16.gmra.mxu0 %v5777_v35  ;;  %v5801_v13 = vor.u32 %v6466_v37, %v5800_v2  ;;  %v5917_v42 = vor.u32 %v6475_v7, %v5914_v33  ;;  %v6472_v2 = vld [vmem:[%s9249_s5 + $0x4] sm:$0xf0] }
 0x3f0   : > { %v2822_v57 = vpop.f32.mrf.mxu2 }
 0x3f1   : > { %v2911_v21 = vpop.f32.mrf.mxu3 }
 0x3f2   : > { %v2912_v16 = vadd.f32 %v2911_v21, %v2822_v57  ;;  %v5786_v57 = vld [vmem:[%s9247_s3 + $0x28] sm:$0xf0] }
 0x3f3   : > { %v5789_v21 = vor.u32 %v6461_v0, %v5786_v57  ;;  %v5898_v0 = vld [vmem:[%s9249_s5 + $0x8] sm:$0xf0] }
 0x3f8   : > { %v2824_v62 = vpop.f32.mrf.mxu2 }
 0x3f9   : > { %v2913_v63 = vpop.f32.mrf.mxu3 }
 0x3fa   : > { %v2914_v6 = vadd.f32 %v2913_v63, %v2824_v62  ;;  %v6468_v62 = vld [vmem:[%s9247_s3 + $0x54] sm:$0xf0] }
 0x3fc   : > { %v2947_v30 = vpack.c.bf16 %v2914_v6, %v2912_v16  ;;  %v5808_v16 = vld [vmem:[%s9247_s3 + $0x50] sm:$0xf]  ;;  %v5912_v6 = vld [vmem:[%s9249_s5 + $0x20] sm:$0xf] }
 0x3fd   : > { %3072 = vmatmul.bf16.gmra.mxu0 %v5785_v34  ;;  %v5809_v63 = vor.u32 %v6468_v62, %v5808_v16  ;;  %v3300_v34 = vunpack.c.l.b16 %v5839_v19  ;;  %v6490_v16 = vld [vmem:[%s9249_s5 + $0x9c] sm:$0xf0] }
 0x3ff   : > { %v3312_v22 = vpack.c.b16 %v3300_v34, %v3300_v34 }
 0x400   : > { %v2827_v54 = vpop.f32.mrf.mxu2 }
 0x401   : > { %v2916_v53 = vpop.f32.mrf.mxu3  ;;  %v3348_v49 = vsel %vm3346_vm13, %v3312_v22, 0 }
 0x402   : > { %v2917_v14 = vadd.f32 %v2916_v53, %v2827_v54  ;;  %v6463_v54 = vld [vmem:[%s9247_s3 + $0x34] sm:$0xf]  ;;  %v5794_v53 = vld [vmem:[%s9247_s3 + $0x38] sm:$0xf0]  ;;  %3355 = vmatpush.bf16.msrb.mxu2 %v3348_v49 }
 0x408   : > { %v2829_v51 = vpop.f32.mrf.mxu2 }
 0x409   : > { %v2918_v52 = vpop.f32.mrf.mxu3 }
 0x40a   : > { %v2919_v48 = vadd.f32 %v2918_v52, %v2829_v51  ;;  %v5816_v51 = vld [vmem:[%s9247_s3 + $0x60] sm:$0xf]  ;;  %v6470_v52 = vld [vmem:[%s9247_s3 + $0x64] sm:$0xf0] }
 0x40c   : > { %v2948_v56 = vpack.c.bf16 %v2919_v48, %v2917_v14  ;;  %v5797_v14 = vor.u32 %v6463_v54, %v5794_v53  ;;  %v5922_v48 = vld [vmem:[%s9249_s5 + $0x38] sm:$0xf0]  ;;  %v5876_v53 = vld [vmem:[%s9249_s5 + $0xa0] sm:$0xf0] }
 0x40d   : > { %3077 = vmatmul.bf16.gmra.mxu0 %v5793_v8  ;;  %v6489_v54 = vld [vmem:[%s9249_s5 + $0x9c] sm:$0xf] }
 0x410   : > { %v2832_v5 = vpop.f32.mrf.mxu2 }
 0x411   : > { %v2921_v59 = vpop.f32.mrf.mxu3 }
 0x412   : > { %v2922_v31 = vadd.f32 %v2921_v59, %v2832_v5  ;;  %v5817_v5 = vor.u32 %v6470_v52, %v5816_v51  ;;  %v6465_v59 = vld [vmem:[%s9247_s3 + $0x44] sm:$0xf]  ;;  %v5866_v51 = vld [vmem:[%s9249_s5 + $0x88] sm:$0xf]  ;;  %v6488_v52 = vld [vmem:[%s9249_s5 + $0x8c] sm:$0xf0] }
 0x418   : > { %v2834_v4 = vpop.f32.mrf.mxu2 }
 0x419   : > { %v2923_v26 = vpop.f32.mrf.mxu3 }
 0x41a   : > { %v2924_v12 = vadd.f32 %v2923_v26, %v2834_v4  ;;  %v5802_v4 = vld [vmem:[%s9247_s3 + $0x48] sm:$0xf0] }
 0x41b   : > { %v5805_v26 = vor.u32 %v6465_v59, %v5802_v4  ;;  %v5867_v59 = vor.u32 %v6488_v52, %v5866_v51  ;;  %v5868_v4 = vld [vmem:[%s9249_s5 + $0x90] sm:$0xf0] }
 0x41c   : > { %v2949_v10 = vpack.c.bf16 %v2924_v12, %v2922_v31  ;;  %v6478_v12 = vld [vmem:[%s9249_s5 + $0x34] sm:$0xf0] }
 0x41d   : > { %3082 = vmatmul.bf16.gmra.mxu0 %v5801_v13  ;;  %v5921_v31 = vor.u32 %v6478_v12, %v5920_v45  ;;  %v6471_v13 = vld [vmem:[%s9249_s5 + $0x4] sm:$0xf] }
 0x41e   : > { %v5901_v57 = vor.u32 %v6471_v13, %v5898_v0  ;;  %v5844_v45 = vld [vmem:[%s9249_s5 + $0x60] sm:$0xf0] }
 0x420   : > { %v2837_v9 = vpop.f32.mrf.mxu2 }
 0x421   : > { %v2926_v43 = vpop.f32.mrf.mxu3 }
 0x422   : > { %v2927_v17 = vadd.f32 %v2926_v43, %v2837_v9  ;;  %v3201_v9 = vld [vmem:[%s9249_s5 + $0x50] sm:$0x33] }
 0x423   : > { %v3472_v43 = vunpack.c.l.b16 %v3201_v9 }
 0x428   : > { %v2839_v46 = vpop.f32.mrf.mxu2 }
 0x429   : > { %v2928_v58 = vpop.f32.mrf.mxu3 }
 0x42a   : > { %v2929_v50 = vadd.f32 %v2928_v58, %v2839_v46  ;;  %v3473_v46 = vunpack.c.h.b16 %v3201_v9  ;;  %v5928_v58 = vld [vmem:[%s9249_s5 + $0x40] sm:$0xf]  ;;  %v5858_v9 = vld [vmem:[%s9249_s5 + $0x78] sm:$0xf] }
 0x42c   : > { %v2950_v18 = vpack.c.bf16 %v2929_v50, %v2927_v17  ;;  %v5810_v50 = vld [vmem:[%s9247_s3 + $0x58] sm:$0xf0]  ;;  %v6469_v17 = vld [vmem:[%s9247_s3 + $0x64] sm:$0xf] }
 0x42d   : > { %3087 = vmatmul.bf16.gmra.mxu0 %v5809_v63  ;;  %v5821_v35 = vor.u32 %v6469_v17, %v5818_v47 }
 0x430   : > { %v2842_v23 = vpop.f32.mrf.mxu2 }
 0x431   : > { %v2931_v60 = vpop.f32.mrf.mxu3 }
 0x432   : > { %v2932_v61 = vadd.f32 %v2931_v60, %v2842_v23  ;;  %v3484_v23 = vpack.c.b16 %v3472_v43, %v3472_v43  ;;  %v3485_v60 = vpack.c.b16 %v3473_v46, %v3473_v46  ;;  %v6486_v43 = vld [vmem:[%s9249_s5 + $0x7c] sm:$0xf0]  ;;  %v6485_v46 = vld [vmem:[%s9249_s5 + $0x7c] sm:$0xf] }
 0x438   : > { %v2844_v3 = vpop.f32.mrf.mxu2 }
 0x439   : > { %v2933_v36 = vpop.f32.mrf.mxu3 }
 0x43a   : > { %v2934_v40 = vadd.f32 %v2933_v36, %v2844_v3  ;;  %v3511_v3 = vsel %vm3346_vm13, %v3484_v23, 0  ;;  %v3514_v36 = vsel %vm3346_vm13, %v3485_v60, 0  ;;  %v5860_v23 = vld [vmem:[%s9249_s5 + $0x80] sm:$0xf0] }
 0x43b   : > { %3518 = vmatpush.bf16.msra.mxu0 %v3511_v3  ;;  %v5863_v60 = vor.u32 %v6485_v46, %v5860_v23  ;;  %v6483_v3 = vld [vmem:[%s9249_s5 + $0x6c] sm:$0xf] }
 0x43c   : > { %v2951_v20 = vpack.c.bf16 %v2934_v40, %v2932_v61  ;;  %v5929_v61 = vor.u32 %v6480_v41, %v5928_v58  ;;  %v5933_v40 = vor.u32 %v6479_v27, %v5930_v11  ;;  %v5859_v58 = vor.u32 %v6486_v43, %v5858_v9  ;;  %v5850_v27 = vld [vmem:[%s9249_s5 + $0x68] sm:$0xf]  ;;  %v6484_v11 = vld [vmem:[%s9249_s5 + $0x6c] sm:$0xf0] }
 0x43d   : > { %3092 = vmatmul.bf16.gmra.mxu0 %v5817_v5  ;;  %v6487_v5 = vld [vmem:[%s9249_s5 + $0x8c] sm:$0xf] }
 0x43e   : > { %v3052_v55 = vsel %vm807_vm0, %v2951_v20, 0  ;;  %v6467_v20 = vld [vmem:[%s9247_s3 + $0x54] sm:$0xf] }
 0x43f   : > { %3098 = vmatpush.bf16.msrb.mxu1 %v3052_v55  ;;  %3519 = vmatpush.bf16.msra.mxu0 %v5929_v61  ;;  %v5813_v55 = vor.u32 %v6467_v20, %v5810_v50  ;;  %v5852_v61 = vld [vmem:[%s9249_s5 + $0x70] sm:$0xf0]  ;;  %v5842_v20 = vld [vmem:[%s9249_s5 + $0x58] sm:$0xf]  ;;  %v6482_v50 = vld [vmem:[%s9249_s5 + $0x5c] sm:$0xf0] }
 0x440   : > { %v5843_v47 = vor.u32 %v6482_v50, %v5842_v20 }
 0x443   : > { %3099 = vmatpush.bf16.msrb.mxu1 %v2950_v18  ;;  %v6477_v18 = vld [vmem:[%s9249_s5 + $0x34] sm:$0xf]  ;;  %3520 = vmatpush.bf16.msra.mxu0 %v5921_v31 }
 0x447   : > { %3100 = vmatpush.bf16.msrb.mxu1 %v2949_v10  ;;  %v5925_v10 = vor.u32 %v6477_v18, %v5922_v48 }
 0x44b   : > { %3101 = vmatpush.bf16.msrb.mxu1 %v2948_v56  ;;  %v6476_v56 = vld [vmem:[%s9249_s5 + $0x24] sm:$0xf0] }
 0x44f   : > { %3102 = vmatpush.bf16.msrb.mxu1 %v2947_v30  ;;  %v5913_v30 = vor.u32 %v6476_v56, %v5912_v6 }
 0x451   : > { %3521 = vmatpush.bf16.msra.mxu0 %v5913_v30 }
 0x453   : > { %3103 = vmatpush.bf16.msrb.mxu1 %v2946_v28 }
 0x457   : > { %3104 = vmatpush.bf16.msrb.mxu1 %v2945_v32  ;;  %v5904_v32 = vld [vmem:[%s9249_s5 + $0x10] sm:$0xf] }
 0x45a   : > { %v8233_v28 = vpop.f32.mrf.mxu0 }
 0x45b   : > { %3105 = vmatpush.bf16.msrb.mxu1 %v2944_v24  ;;  %v5905_v24 = vor.u32 %v6474_v44, %v5904_v32 }
 0x45d   : > { %3522 = vmatpush.bf16.msra.mxu0 %v5905_v24 }
 0x45e   : > { %5822 = vmatmul.msk.bf16.vlgmr.msrb.gmra.mxu1 %vm3029_vm10, %v5773_v25  ;;  %v5906_v25 = vld [vmem:[%s9249_s5 + $0x18] sm:$0xf0] }
 0x45f   : > { %3562 = vmatpush.bf16.msra.mxu1 %v3514_v36  ;;  %v5909_v8 = vor.u32 %v6473_v39, %v5906_v25  ;;  %v5851_v36 = vor.u32 %v6484_v11, %v5850_v27 }
 0x462   : > { %v3065_v62 = vpop.f32.mrf.mxu0 }
 0x463   : > { %3563 = vmatpush.bf16.msra.mxu1 %v5933_v40  ;;  %v5855_v40 = vor.u32 %v6483_v3, %v5852_v61 }
 0x467   : > { %3564 = vmatpush.bf16.msra.mxu1 %v5925_v10 }
 0x46a   : > { %v3068_v41 = vpop.f32.mrf.mxu0 }
 0x46b   : > { %3565 = vmatpush.bf16.msra.mxu1 %v5917_v42 }
 0x46e   : > { %5823 = vmatmul.msk.bf16.gmra.mxu1 %vm3029_vm10, %v5781_v29  ;;  %v5896_v29 = vld [vmem:[%s9249_s5] sm:$0xf] }
 0x46f   : > { %3566 = vmatpush.bf16.msra.mxu1 %v5909_v8  ;;  %v5897_v37 = vor.u32 %v6472_v2, %v5896_v29 }
 0x471   : > { %3523 = vmatpush.bf16.msra.mxu0 %v5897_v37 }
 0x472   : > { %v3070_v18 = vpop.f32.mrf.mxu0 }
 0x473   : > { %3567 = vmatpush.bf16.msra.mxu1 %v5901_v57 }
 0x47a   : > { %v3073_v33 = vpop.f32.mrf.mxu0 }
 0x47e   : > { %5824 = vmatmul.msk.bf16.gmra.mxu1 %vm3029_vm10, %v5789_v21  ;;  %v5874_v21 = vld [vmem:[%s9249_s5 + $0x98] sm:$0xf] }
 0x47f   : > { %v5875_v63 = vor.u32 %v6490_v16, %v5874_v21 }
 0x481   : > { %3356 = vmatpush.bf16.msrb.mxu2 %v5875_v63 }
 0x482   : > { %v3075_v24 = vpop.f32.mrf.mxu0 }
 0x485   : > { %3357 = vmatpush.bf16.msrb.mxu2 %v5867_v59 }
 0x489   : > { %3358 = vmatpush.bf16.msrb.mxu2 %v5859_v58 }
 0x48d   : > { %3359 = vmatpush.bf16.msrb.mxu2 %v5851_v36 }
 0x48e   : > { %5825 = vmatmul.msk.bf16.gmra.mxu1 %vm3029_vm10, %v5797_v14  ;;  %v5879_v14 = vor.u32 %v6489_v54, %v5876_v53  ;;  %v3078_v54 = vpop.f32.mrf.mxu0 }
 0x490   : > { %3400 = vmatpush.bf16.msrb.mxu3 %v5879_v14 }
 0x491   : > { %3360 = vmatpush.bf16.msrb.mxu2 %v5843_v47 }
 0x496   : > { %v3080_v23 = vpop.f32.mrf.mxu0 }
 0x49e   : > { %5826 = vmatmul.msk.bf16.gmra.mxu1 %vm3029_vm10, %v5805_v26  ;;  %v5871_v26 = vor.u32 %v6487_v5, %v5868_v4 }
 0x4a0   : > { %3401 = vmatpush.bf16.msrb.mxu3 %v5871_v26 }
 0x4a4   : > { %3402 = vmatpush.bf16.msrb.mxu3 %v5863_v60 }
 0x4a8   : > { %3403 = vmatpush.bf16.msrb.mxu3 %v5855_v40 }
 0x4ae   : > { %5827 = vmatmul.msk.bf16.gmra.mxu1 %vm3029_vm10, %v5813_v55  ;;  %v6481_v55 = vld [vmem:[%s9249_s5 + $0x5c] sm:$0xf] }
 0x4af   : > { %v5847_v12 = vor.u32 %v6481_v55, %v5844_v45 }
 0x4b1   : > { %3404 = vmatpush.bf16.msrb.mxu3 %v5847_v12 }
 0x4be   : > { %5828 = vmatmul.msk.bf16.gmra.mxu1 %vm3029_vm10, %v5821_v35 }
 0x4db   : > { %v3107_v17 = vpop.f32.mrf.mxu1 }
 0x4dc   : > { %v3108_v35 = vadd.f32 %v3107_v17, %v8233_v28 }
 0x4de   : > { %v3156_v48 = vmul.f32 0.01, %v3108_v35  ;;  %vm3142_vm14 = vcmp.ge.f32.partialorder %v3108_v35, 0.0 }
 0x4e0   : > { %v3170_v56 = vsel %vm3142_vm14, %v3108_v35, %v3156_v48 }
 0x4e3   : > { %v3109_v31 = vpop.f32.mrf.mxu1 }
 0x4e4   : > { %v3110_v10 = vadd.f32 %v3109_v31, %v3065_v62  ;;  %v3083_v31 = vpop.f32.mrf.mxu0 }
 0x4e6   : > { %vm3143_vm15 = vcmp.ge.f32.partialorder %v3110_v10, 0.0  ;;  %v3157_v6 = vmul.f32 0.01, %v3110_v10 }
 0x4e8   : > { %v3171_v7 = vsel %vm3143_vm15, %v3110_v10, %v3157_v6 }
 0x4e9   : > { %v3184_v30 = vpack.c.bf16 %v3171_v7, %v3170_v56 }
 0x4eb   : > { %v3112_v42 = vpop.f32.mrf.mxu1  ;;  %5934 = vmatmul.msk.bf16.vlgmr.msra.gmra.mxu0 %vm3324_vm6, %v3184_v30  ;;  %5941 = vmatmul.msk.bf16.vlgmr.msra.gmra.mxu1 %vm3324_vm6, %v3184_v30  ;;  %v3215_v19 = vshrl.u32 %v3184_v30, 16  ;;  %v3217_v34 = vshll.u32 %v3184_v30, 16  ;;  %v3623_v2 = vrot.slane %v3184_v30, 1  ;;  %v4083_v62 = vrot.slane %v3184_v30, 2 }
 0x4ec   : > { %v3113_v44 = vadd.f32 %v3112_v42, %v3068_v41 }
 0x4ed   : > { %v3846_v1 = vrot.slane %v3215_v19, 1  ;;  %v3847_v28 = vrot.slane %v3217_v34, 2  ;;  %v3219_v15 = vrot.slane %v3217_v34, 1 }
 0x4ee   : > { %v3158_v25 = vmul.f32 0.01, %v3113_v44  ;;  %vm3144_vm1 = vcmp.ge.f32.partialorder %v3113_v44, 0.0 }
 0x4ef   : > { %v3848_v32 = vor.u32 %v3847_v28, %v3846_v1  ;;  %v3220_v16 = vor.u32 %v3219_v15, %v3215_v19  ;;  %v3085_v1 = vpop.f32.mrf.mxu0 }
 0x4f0   : > { %v3172_v8 = vsel %vm3144_vm1, %v3113_v44, %v3158_v25 }
 0x4f3   : > { %v3114_v39 = vpop.f32.mrf.mxu1 }
 0x4f4   : > { %v3115_v22 = vadd.f32 %v3114_v39, %v3070_v18 }
 0x4f6   : > { %vm3145_vm7 = vcmp.ge.f32.partialorder %v3115_v22, 0.0  ;;  %v3159_v38 = vmul.f32 0.01, %v3115_v22 }
 0x4f8   : > { %v3173_v49 = vsel %vm3145_vm7, %v3115_v22, %v3159_v38 }
 0x4f9   : > { %v3185_v29 = vpack.c.bf16 %v3173_v49, %v3172_v8  ;;  %v6023_v8 = vld [vmem:[%s9249_s5 + $0x158] sm:$0x33] }
 0x4fb   : > { %v3117_v37 = vpop.f32.mrf.mxu1  ;;  %5935 = vmatmul.msk.bf16.gmra.mxu0 %vm3324_vm6, %v3185_v29  ;;  %5942 = vmatmul.msk.bf16.gmra.mxu1 %vm3324_vm6, %v3185_v29  ;;  %v3222_v13 = vshll.u32 %v3185_v29, 16  ;;  %v3226_v0 = vshrl.u32 %v3185_v29, 16  ;;  %v3624_v57 = vrot.slane %v3185_v29, 1  ;;  %v4084_v21 = vrot.slane %v3185_v29, 2 }
 0x4fc   : > { %v3118_v4 = vadd.f32 %v3117_v37, %v3073_v33  ;;  %v3904_v29 = vunpack.c.l.b16 %v6023_v8 }
 0x4fd   : > { %v3224_v63 = vrot.slane %v3222_v13, 1  ;;  %v3849_v53 = vrot.slane %v3226_v0, 1  ;;  %v3850_v14 = vrot.slane %v3222_v13, 2  ;;  %v8327_v51 = vsel %vm1247_vm4, %v3623_v2, %v3624_v57 }
 0x4fe   : > { %v8330_v52 = vsel %vm807_vm0, %v4083_v62, %v4084_v21  ;;  %v3160_v43 = vmul.f32 0.01, %v3118_v4  ;;  %vm3146_vm8 = vcmp.ge.f32.partialorder %v3118_v4, 0.0  ;;  %v3905_v2 = vunpack.c.h.b16 %v6023_v8  ;;  %v6036_v8 = vld [vmem:[%s9249_s5 + $0x120] sm:$0xf0] }
 0x4ff   : > { %v3225_v5 = vsel %vm612_vm2, %v3220_v16, %v3224_v63  ;;  %v3851_v59 = vor.u32 %v3850_v14, %v3849_v53  ;;  %v3228_v20 = vor.u32 %v3226_v0, %v3224_v63  ;;  %v3916_v0 = vpack.c.b16 %v3904_v29, %v3904_v29  ;;  %v3088_v14 = vpop.f32.mrf.mxu0  ;;  %v6026_v29 = vld [vmem:[%s9249_s5 + $0x108] sm:$0xf] }
 0x500   : > { %5880 = vmatmul.msk.bf16.vlgmr.msrb.gmra.mxu2 %vm3324_vm6, %v3225_v5  ;;  %5887 = vmatmul.msk.bf16.vlgmr.msrb.gmra.mxu3 %vm3324_vm6, %v3225_v5  ;;  %v3174_v60 = vsel %vm3146_vm8, %v3118_v4, %v3160_v43  ;;  %v6058_v5 = vld [vmem:[%s9249_s5 + $0x148] sm:$0xf]  ;;  %v6509_v4 = vld [vmem:[%s9249_s5 + $0x14c] sm:$0xf] }
 0x501   : > { %v8336_v26 = vsel %vm1598_vm3, %v3848_v32, %v3851_v59  ;;  %v3950_v62 = vsel %vm3346_vm13, %v3916_v0, 0 }
 0x502   : > { %3957 = vmatpush.bf16.msrb.mxu0 %v3950_v62  ;;  %v6028_v62 = vld [vmem:[%s9249_s5 + $0x110] sm:$0xf0] }
 0x503   : > { %v3119_v9 = vpop.f32.mrf.mxu1 }
 0x504   : > { %v3120_v46 = vadd.f32 %v3119_v9, %v3075_v24 }
 0x506   : > { %vm3147_vm9 = vcmp.ge.f32.partialorder %v3120_v46, 0.0  ;;  %v3161_v58 = vmul.f32 0.01, %v3120_v46 }
 0x508   : > { %v3175_v41 = vsel %vm3147_vm9, %v3120_v46, %v3161_v58  ;;  %v6060_v46 = vld [vmem:[%s9249_s5 + $0x150] sm:$0xf0] }
 0x509   : > { %v3186_v27 = vpack.c.bf16 %v3175_v41, %v3174_v60  ;;  %v6063_v58 = vor.u32 %v6509_v4, %v6060_v46 }
 0x50b   : > { %v3122_v11 = vpop.f32.mrf.mxu1  ;;  %5936 = vmatmul.msk.bf16.gmra.mxu0 %vm3324_vm6, %v3186_v27  ;;  %5943 = vmatmul.msk.bf16.gmra.mxu1 %vm3324_vm6, %v3186_v27  ;;  %v3230_v3 = vshll.u32 %v3186_v27, 16  ;;  %v3234_v36 = vshrl.u32 %v3186_v27, 16  ;;  %v3626_v61 = vrot.slane %v3186_v27, 1  ;;  %v4086_v40 = vrot.slane %v3186_v27, 2  ;;  %v6050_v27 = vld [vmem:[%s9249_s5 + $0x138] sm:$0xf] }
 0x50c   : > { %v3123_v35 = vadd.f32 %v3122_v11, %v3078_v54  ;;  %v6508_v11 = vld [vmem:[%s9249_s5 + $0x13c] sm:$0xf0] }
 0x50d   : > { %v3232_v50 = vrot.slane %v3230_v3, 1  ;;  %v3853_v55 = vrot.slane %v3234_v36, 1  ;;  %v3854_v17 = vrot.slane %v3230_v3, 2  ;;  %v8341_v47 = vsel %vm1247_vm4, %v3624_v57, %v3626_v61  ;;  %v6507_v3 = vld [vmem:[%s9249_s5 + $0x13c] sm:$0xf] }
 0x50e   : > { %v8344_v45 = vsel %vm807_vm0, %v4084_v21, %v4086_v40  ;;  %v3162_v6 = vmul.f32 0.01, %v3123_v35  ;;  %vm3148_vm11 = vcmp.ge.f32.partialorder %v3123_v35, 0.0  ;;  %v3917_v57 = vpack.c.b16 %v3905_v2, %v3905_v2  ;;  %v6502_v2 = vld [vmem:[%s9249_s5 + $0x10c] sm:$0xf0] }
 0x50f   : > { %v3233_v12 = vsel %vm612_vm2, %v3228_v20, %v3232_v50  ;;  %v3855_v18 = vor.u32 %v3854_v17, %v3853_v55  ;;  %v3236_v39 = vor.u32 %v3234_v36, %v3232_v50  ;;  %v6051_v36 = vor.u32 %v6508_v11, %v6050_v27  ;;  %v5993_v11 = vld [vmem:[%s9249_s5 + $0xf0] sm:$0xf] }
 0x510   : > { %5881 = vmatmul.msk.bf16.gmra.mxu2 %vm3324_vm6, %v3233_v12  ;;  %5888 = vmatmul.msk.bf16.gmra.mxu3 %vm3324_vm6, %v3233_v12  ;;  %v3176_v30 = vsel %vm3148_vm11, %v3123_v35, %v3162_v6  ;;  %v3953_v63 = vsel %vm3346_vm13, %v3917_v57, 0 }
 0x511   : > { %v8350_v48 = vsel %vm1598_vm3, %v3851_v59, %v3855_v18  ;;  %4001 = vmatpush.bf16.msrb.mxu1 %v3953_v63  ;;  %v6510_v59 = vld [vmem:[%s9249_s5 + $0x14c] sm:$0xf0] }
 0x512   : > { %v6059_v43 = vor.u32 %v6510_v59, %v6058_v5  ;;  %v6027_v5 = vor.u32 %v6502_v2, %v6026_v29 }
 0x513   : > { %v3124_v10 = vpop.f32.mrf.mxu1 }
 0x514   : > { %v3125_v56 = vadd.f32 %v3124_v10, %v3080_v23  ;;  %3958 = vmatpush.bf16.msrb.mxu0 %v6059_v43  ;;  %v6506_v10 = vld [vmem:[%s9249_s5 + $0x12c] sm:$0xf0] }
 0x515   : > { %4002 = vmatpush.bf16.msrb.mxu1 %v6063_v58 }
 0x516   : > { %vm3149_vm12 = vcmp.ge.f32.partialorder %v3125_v56, 0.0  ;;  %v3163_v7 = vmul.f32 0.01, %v3125_v56 }
 0x518   : > { %v3177_v33 = vsel %vm3149_vm12, %v3125_v56, %v3163_v7  ;;  %3959 = vmatpush.bf16.msrb.mxu0 %v6051_v36  ;;  %v6499_v36 = vld [vmem:[%s9249_s5 + $0xf4] sm:$0xf] }
 0x519   : > { %v8352_v42 = vpack.c.bf16 %v3177_v33, %v3176_v30  ;;  %v6505_v30 = vld [vmem:[%s9249_s5 + $0x12c] sm:$0xf] }
 0x51b   : > { %v3127_v19 = vpop.f32.mrf.mxu1  ;;  %5937 = vmatmul.msk.bf16.gmra.mxu0 %vm3324_vm6, %v8352_v42  ;;  %5944 = vmatmul.msk.bf16.gmra.mxu1 %vm3324_vm6, %v8352_v42  ;;  %v3238_v34 = vshll.u32 %v8352_v42, 16  ;;  %v3242_v28 = vshrl.u32 %v8352_v42, 16  ;;  %v3628_v32 = vrot.slane %v8352_v42, 1  ;;  %v4088_v44 = vrot.slane %v8352_v42, 2  ;;  %v6503_v42 = vld [vmem:[%s9249_s5 + $0x11c] sm:$0xf] }
 0x51c   : > { %v3128_v37 = vadd.f32 %v3127_v19, %v3083_v31  ;;  %v6042_v31 = vld [vmem:[%s9249_s5 + $0x128] sm:$0xf] }
 0x51d   : > { %v3240_v24 = vrot.slane %v3238_v34, 1  ;;  %v3857_v25 = vrot.slane %v3242_v28, 1  ;;  %v3858_v22 = vrot.slane %v3238_v34, 2  ;;  %v8363_v38 = vsel %vm1247_vm4, %v3626_v61, %v3628_v32  ;;  %v6052_v61 = vld [vmem:[%s9249_s5 + $0x140] sm:$0xf0]  ;;  %v3090_v34 = vpop.f32.mrf.mxu0 }
 0x51e   : > { %v8371_v49 = vsel %vm807_vm0, %v4086_v40, %v4088_v44  ;;  %vm3150_vm10 = vcmp.ge.f32.partialorder %v3128_v37, 0.0  ;;  %v3164_v54 = vmul.f32 0.01, %v3128_v37  ;;  %v6055_v55 = vor.u32 %v6507_v3, %v6052_v61  ;;  %v6500_v3 = vld [vmem:[%s9249_s5 + $0xf4] sm:$0xf0] }
 0x51f   : > { %v3241_v15 = vsel %vm612_vm2, %v3236_v39, %v3240_v24  ;;  %v8376_v13 = vor.u32 %v3858_v22, %v3857_v25  ;;  %v6043_v7 = vor.u32 %v6506_v10, %v6042_v31  ;;  %v6504_v25 = vld [vmem:[%s9249_s5 + $0x11c] sm:$0xf0] }
 0x520   : > { %5882 = vmatmul.msk.bf16.gmra.mxu2 %vm3324_vm6, %v3241_v15  ;;  %5889 = vmatmul.msk.bf16.gmra.mxu3 %vm3324_vm6, %v3241_v15  ;;  %v3178_v23 = vsel %vm3150_vm10, %v3128_v37, %v3164_v54  ;;  %v6039_v15 = vor.u32 %v6503_v42, %v6036_v8  ;;  %v5958_v37 = vld [vmem:[%s9249_s5 + $0x100] sm:$0x33]  ;;  %v5977_v42 = vld [vmem:[%s9249_s5 + $0xd0] sm:$0xf]  ;;  %v6495_v8 = vld [vmem:[%s9249_s5 + $0xd4] sm:$0xf] }
 0x521   : > { %v8380_v21 = vsel %vm1598_vm3, %v3855_v18, %v8376_v13  ;;  %v3244_v18 = vor.u32 %v3242_v28, %v3240_v24  ;;  %4003 = vmatpush.bf16.msrb.mxu1 %v6055_v55  ;;  %v6034_v24 = vld [vmem:[%s9249_s5 + $0x118] sm:$0xf]  ;;  %3960 = vmatpush.bf16.msrb.mxu0 %v6043_v7  ;;  %v3667_v63 = vunpack.c.l.b16 %v5958_v37  ;;  %v3668_v54 = vunpack.c.h.b16 %v5958_v37 }
 0x522   : > { %v6035_v22 = vor.u32 %v6504_v25, %v6034_v24  ;;  %v5994_v55 = vor.u32 %v6500_v3, %v5993_v11 }
 0x523   : > { %v3129_v16 = vpop.f32.mrf.mxu1  ;;  %v3679_v59 = vpack.c.b16 %v3667_v63, %v3667_v63  ;;  %v3680_v4 = vpack.c.b16 %v3668_v54, %v3668_v54 }
 0x524   : > { %v3130_v53 = vadd.f32 %v3129_v16, %v3085_v1  ;;  %v6044_v1 = vld [vmem:[%s9249_s5 + $0x130] sm:$0xf0]  ;;  %v6501_v16 = vld [vmem:[%s9249_s5 + $0x10c] sm:$0xf] }
 0x525   : > { %v6047_v39 = vor.u32 %v6505_v30, %v6044_v1  ;;  %3961 = vmatpush.bf16.msrb.mxu0 %v6035_v22  ;;  %v3713_v43 = vsel %vm3346_vm13, %v3679_v59, 0  ;;  %v3716_v46 = vsel %vm3346_vm13, %v3680_v4, 0  ;;  %v3093_v27 = vpop.f32.mrf.mxu0  ;;  %v6496_v22 = vld [vmem:[%s9249_s5 + $0xd4] sm:$0xf0] }
 0x526   : > { %vm3151_vm14 = vcmp.ge.f32.partialorder %v3130_v53, 0.0  ;;  %v3165_v9 = vmul.f32 0.01, %v3130_v53  ;;  %3720 = vmatpush.bf16.msra.mxu2 %v3713_v43  ;;  %3764 = vmatpush.bf16.msra.mxu3 %v3716_v46  ;;  %v5978_v2 = vor.u32 %v6496_v22, %v5977_v42  ;;  %v5961_v46 = vld [vmem:[%s9249_s5 + $0xb0] sm:$0xf] }
 0x527   : > { %4004 = vmatpush.bf16.msrb.mxu1 %v6047_v39  ;;  %v5987_v39 = vld [vmem:[%s9249_s5 + $0xe8] sm:$0xf0] }
 0x528   : > { %v3179_v60 = vsel %vm3151_vm14, %v3130_v53, %v3165_v9  ;;  %v6031_v9 = vor.u32 %v6501_v16, %v6028_v62  ;;  %vm4506_vm14 = vcmask 261120  }
 0x529   : > { %v8396_v41 = vpack.c.bf16 %v3179_v60, %v3178_v23  ;;  %3962 = vmatpush.bf16.msrb.mxu0 %v6027_v5  ;;  %v5971_v5 = vld [vmem:[%s9249_s5 + $0xc8] sm:$0xf0] }
 0x52a   : > { %3721 = vmatpush.bf16.msra.mxu2 %v5994_v55 }
 0x52b   : > { %v3132_v40 = vpop.f32.mrf.mxu1  ;;  %5938 = vmatmul.msk.bf16.gmra.mxu0 %vm3324_vm6, %v8396_v41  ;;  %5945 = vmatmul.msk.bf16.gmra.mxu1 %vm3324_vm6, %v8396_v41  ;;  %v3246_v20 = vshll.u32 %v8396_v41, 16  ;;  %v3250_v50 = vshrl.u32 %v8396_v41, 16  ;;  %v3630_v17 = vrot.slane %v8396_v41, 1  ;;  %v4090_v12 = vrot.slane %v8396_v41, 2 }
 0x52c   : > { %4005 = vmatpush.bf16.msrb.mxu1 %v6039_v15  ;;  %v5979_v15 = vld [vmem:[%s9249_s5 + $0xd8] sm:$0xf0] }
 0x52d   : > { %v8418_v35 = vrot.slane %v3246_v20, 1  ;;  %v3861_v6 = vrot.slane %v3250_v50, 1  ;;  %v8431_v56 = vsel %vm1247_vm4, %v3628_v32, %v3630_v17  ;;  %v3862_v33 = vrot.slane %v3246_v20, 2 }
 0x52e   : > { %v8446_v28 = vsel %vm807_vm0, %v4088_v44, %v4090_v12  ;;  %v3133_v32 = vadd.f32 %v3132_v40, %v3088_v14  ;;  %v5982_v37 = vor.u32 %v6495_v8, %v5979_v15 }
 0x52f   : > { %v3249_v19 = vsel %vm612_vm2, %v3244_v18, %v8418_v35  ;;  %v8459_v44 = vor.u32 %v3862_v33, %v3861_v6  ;;  %v5995_v18 = vld [vmem:[%s9249_s5 + $0xf8] sm:$0xf0]  ;;  %v3252_v10 = vor.u32 %v3250_v50, %v8418_v35  ;;  %v5985_v50 = vld [vmem:[%s9249_s5 + $0xe0] sm:$0xf] }
 0x530   : > { %5883 = vmatmul.msk.bf16.gmra.mxu2 %vm3324_vm6, %v3249_v19  ;;  %5890 = vmatmul.msk.bf16.gmra.mxu3 %vm3324_vm6, %v3249_v19  ;;  %v3166_v53 = vmul.f32 0.01, %v3133_v32  ;;  %vm3152_vm15 = vcmp.ge.f32.partialorder %v3133_v32, 0.0  ;;  %v5998_v6 = vor.u32 %v6499_v36, %v5995_v18  ;;  %v5963_v36 = vld [vmem:[%s9249_s5 + $0xb8] sm:$0xf0] }
 0x531   : > { %v8476_v0 = vsel %vm1598_vm3, %v8376_v13, %v8459_v44  ;;  %4006 = vmatpush.bf16.msrb.mxu1 %v6031_v9 }
 0x532   : > { %v3180_v58 = vsel %vm3152_vm15, %v3133_v32, %v3166_v53  ;;  %3765 = vmatpush.bf16.msra.mxu3 %v5998_v6  ;;  %v6498_v32 = vld [vmem:[%s9249_s5 + $0xe4] sm:$0xf0]  ;;  %v5969_v53 = vld [vmem:[%s9249_s5 + $0xc0] sm:$0xf] }
 0x533   : > { %v3134_v57 = vpop.f32.mrf.mxu1  ;;  %v5986_v41 = vor.u32 %v6498_v32, %v5985_v50 }
 0x534   : > { %v3135_v14 = vadd.f32 %v3134_v57, %v3090_v34  ;;  %v3095_v57 = vpop.f32.mrf.mxu0 }
 0x535   : > { %3722 = vmatpush.bf16.msra.mxu2 %v5986_v41 }
 0x536   : > { %vm3153_vm1 = vcmp.ge.f32.partialorder %v3135_v14, 0.0  ;;  %v3167_v13 = vmul.f32 0.01, %v3135_v14 }
 0x538   : > { %v3181_v23 = vsel %vm3153_vm1, %v3135_v14, %v3167_v13  ;;  %v6493_v14 = vld [vmem:[%s9249_s5 + $0xc4] sm:$0xf] }
 0x539   : > { %v8486_v60 = vpack.c.bf16 %v3181_v23, %v3180_v58  ;;  %3723 = vmatpush.bf16.msra.mxu2 %v5978_v2  ;;  %v5974_v9 = vor.u32 %v6493_v14, %v5971_v5  ;;  %v6492_v58 = vld [vmem:[%s9249_s5 + $0xb4] sm:$0xf0]  ;;  %v6491_v23 = vld [vmem:[%s9249_s5 + $0xb4] sm:$0xf] }
 0x53a   : > { %v5962_v3 = vor.u32 %v6492_v58, %v5961_v46  ;;  %v5966_v55 = vor.u32 %v6491_v23, %v5963_v36  ;;  %v6520_v36 = vld [vmem:[%s9249_s5 + $0x1a4] sm:$0xf0] }
 0x53b   : > { %v3137_v61 = vpop.f32.mrf.mxu1  ;;  %5939 = vmatmul.msk.bf16.gmra.mxu0 %vm3324_vm6, %v8486_v60  ;;  %5946 = vmatmul.msk.bf16.gmra.mxu1 %vm3324_vm6, %v8486_v60  ;;  %v3254_v40 = vshll.u32 %v8486_v60, 16  ;;  %v3258_v20 = vshrl.u32 %v8486_v60, 16  ;;  %v3632_v31 = vrot.slane %v8486_v60, 1  ;;  %v4092_v7 = vrot.slane %v8486_v60, 2 }
 0x53c   : > { %v3138_v25 = vadd.f32 %v3137_v61, %v3093_v27 }
 0x53d   : > { %v3256_v30 = vrot.slane %v3254_v40, 1  ;;  %v3865_v33 = vrot.slane %v3258_v20, 1  ;;  %v3866_v19 = vrot.slane %v3254_v40, 2  ;;  %v8518_v34 = vsel %vm1247_vm4, %v3630_v17, %v3632_v31  ;;  %v6497_v17 = vld [vmem:[%s9249_s5 + $0xe4] sm:$0xf] }
 0x53e   : > { %v8528_v35 = vsel %vm807_vm0, %v4090_v12, %v4092_v7  ;;  %v5990_v12 = vor.u32 %v6497_v17, %v5987_v39  ;;  %v3168_v62 = vmul.f32 0.01, %v3138_v25  ;;  %vm3154_vm7 = vcmp.ge.f32.partialorder %v3138_v25, 0.0 }
 0x53f   : > { %v3257_v1 = vsel %vm612_vm2, %v3252_v10, %v3256_v30  ;;  %v3867_v24 = vor.u32 %v3866_v19, %v3865_v33  ;;  %v3260_v40 = vor.u32 %v3258_v20, %v3256_v30 }
 0x540   : > { %5884 = vmatmul.msk.bf16.gmra.mxu2 %vm3324_vm6, %v3257_v1  ;;  %5891 = vmatmul.msk.bf16.gmra.mxu3 %vm3324_vm6, %v3257_v1  ;;  %v3182_v59 = vsel %vm3154_vm7, %v3138_v25, %v3168_v62 }
 0x541   : > { %v8556_v29 = vsel %vm1598_vm3, %v8459_v44, %v3867_v24  ;;  %3766 = vmatpush.bf16.msra.mxu3 %v5990_v12  ;;  %v6494_v44 = vld [vmem:[%s9249_s5 + $0xc4] sm:$0xf0] }
 0x542   : > { %v5970_v13 = vor.u32 %v6494_v44, %v5969_v53 }
 0x543   : > { %v3139_v16 = vpop.f32.mrf.mxu1 }
 0x544   : > { %v3140_v63 = vadd.f32 %v3139_v16, %v3095_v57  ;;  %3724 = vmatpush.bf16.msra.mxu2 %v5970_v13 }
 0x545   : > { %3767 = vmatpush.bf16.msra.mxu3 %v5982_v37 }
 0x546   : > { %vm3155_vm8 = vcmp.ge.f32.partialorder %v3140_v63, 0.0  ;;  %v3169_v54 = vmul.f32 0.01, %v3140_v63 }
 0x548   : > { %v3183_v4 = vsel %vm3155_vm8, %v3140_v63, %v3169_v54  ;;  %3725 = vmatpush.bf16.msra.mxu2 %v5962_v3  ;;  %v6123_v3 = vld [vmem:[%s9249_s5 + $0x1a0] sm:$0xf] }
 0x549   : > { %v3190_v43 = vpack.c.bf16 %v3183_v4, %v3182_v59  ;;  %3768 = vmatpush.bf16.msra.mxu3 %v5974_v9 }
 0x54b   : > { %5940 = vmatmul.msk.bf16.gmra.mxu0 %vm3324_vm6, %v3190_v43  ;;  %5947 = vmatmul.msk.bf16.gmra.mxu1 %vm3324_vm6, %v3190_v43  ;;  %v3262_v27 = vshll.u32 %v3190_v43, 16  ;;  %v3266_v11 = vshrl.u32 %v3190_v43, 16  ;;  %v8584_v61 = vrot.slane %v3190_v43, 1  ;;  %v8588_v18 = vrot.slane %v3190_v43, 2 }
 0x54d   : > { %v3264_v10 = vrot.slane %v3262_v27, 1  ;;  %v3869_v6 = vrot.slane %v3266_v11, 1  ;;  %v3870_v33 = vrot.slane %v3262_v27, 2  ;;  %v8594_v19 = vsel %vm1247_vm4, %v3632_v31, %v8584_v61  ;;  %3769 = vmatpush.bf16.msra.mxu3 %v5966_v55 }
 0x54e   : > { %v8600_v50 = vsel %vm807_vm0, %v4092_v7, %v8588_v18  ;;  %v6124_v55 = vor.u32 %v6520_v36, %v6123_v3 }
 0x54f   : > { %v3265_v20 = vsel %vm612_vm2, %v3260_v40, %v3264_v10  ;;  %v8603_v30 = vor.u32 %v3870_v33, %v3869_v6  ;;  %v3268_v60 = vor.u32 %v3266_v11, %v3264_v10  ;;  %v6519_v40 = vld [vmem:[%s9249_s5 + $0x1a4] sm:$0xf]  ;;  %v6125_v10 = vld [vmem:[%s9249_s5 + $0x1a8] sm:$0xf0]  ;;  %v6115_v33 = vld [vmem:[%s9249_s5 + $0x190] sm:$0xf] }
 0x550   : > { %5885 = vmatmul.msk.bf16.gmra.mxu2 %vm3324_vm6, %v3265_v20  ;;  %5892 = vmatmul.msk.bf16.gmra.mxu3 %vm3324_vm6, %v3265_v20  ;;  %v6128_v6 = vor.u32 %v6519_v40, %v6125_v10  ;;  %v6518_v20 = vld [vmem:[%s9249_s5 + $0x194] sm:$0xf0] }
 0x551   : > { %v8609_v31 = vsel %vm1598_vm3, %v3867_v24, %v8603_v30 }
 0x55b   : > { %6064 = vmatmul.msk.bf16.vlgmr.msrb.gmra.mxu0 %vm3324_vm6, %v8336_v26  ;;  %6071 = vmatmul.msk.bf16.vlgmr.msrb.gmra.mxu1 %vm3324_vm6, %v8336_v26 }
 0x560   : > { %5886 = vmatmul.msk.bf16.gmra.mxu2 %vm3324_vm6, %v3268_v60  ;;  %5893 = vmatmul.msk.bf16.gmra.mxu3 %vm3324_vm6, %v3268_v60 }
 0x568   : > { %v3525_v7 = vpop.f32.mrf.mxu0  ;;  %v3569_v1 = vpop.f32.mrf.mxu1 }
 0x56b   : > { %6065 = vmatmul.msk.bf16.gmra.mxu0 %vm3324_vm6, %v8350_v48  ;;  %6072 = vmatmul.msk.bf16.gmra.mxu1 %vm3324_vm6, %v8350_v48 }
 0x570   : > { %5999 = vmatmul.msk.bf16.vlgmr.msra.gmra.mxu2 %vm3324_vm6, %v8327_v51  ;;  %6006 = vmatmul.msk.bf16.vlgmr.msra.gmra.mxu3 %vm3324_vm6, %v8327_v51  ;;  %v3527_v26 = vpop.f32.mrf.mxu0  ;;  %v3571_v32 = vpop.f32.mrf.mxu1 }
 0x578   : > { %v3530_v17 = vpop.f32.mrf.mxu0  ;;  %v3574_v39 = vpop.f32.mrf.mxu1 }
 0x57b   : > { %6066 = vmatmul.msk.bf16.gmra.mxu0 %vm3324_vm6, %v8380_v21  ;;  %6073 = vmatmul.msk.bf16.gmra.mxu1 %vm3324_vm6, %v8380_v21 }
 0x580   : > { %6000 = vmatmul.msk.bf16.gmra.mxu2 %vm3324_vm6, %v8341_v47  ;;  %6007 = vmatmul.msk.bf16.gmra.mxu3 %vm3324_vm6, %v8341_v47  ;;  %v3532_v41 = vpop.f32.mrf.mxu0  ;;  %v3576_v12 = vpop.f32.mrf.mxu1 }
 0x583   : > { %v3362_v48 = vpop.f32.mrf.mxu2  ;;  %v3406_v24 = vpop.f32.mrf.mxu3 }
 0x584   : > { %v8633_v25 = vadd.f32 %v3525_v7, %v3362_v48  ;;  %v8635_v51 = vadd.f32 %v3569_v1, %v3406_v24  ;;  %v6116_v1 = vor.u32 %v6518_v20, %v6115_v33  ;;  %v6107_v48 = vld [vmem:[%s9249_s5 + $0x180] sm:$0xf]  ;;  %v6516_v24 = vld [vmem:[%s9249_s5 + $0x184] sm:$0xf0] }
 0x588   : > { %v3535_v47 = vpop.f32.mrf.mxu0  ;;  %v3579_v15 = vpop.f32.mrf.mxu1 }
 0x58b   : > { %v3364_v42 = vpop.f32.mrf.mxu2  ;;  %v3408_v22 = vpop.f32.mrf.mxu3  ;;  %6067 = vmatmul.msk.bf16.gmra.mxu0 %vm3324_vm6, %v8476_v0  ;;  %6074 = vmatmul.msk.bf16.gmra.mxu1 %vm3324_vm6, %v8476_v0 }
 0x58c   : > { %v8641_v21 = vadd.f32 %v3527_v26, %v3364_v42  ;;  %v8643_v8 = vadd.f32 %v3571_v32, %v3408_v22  ;;  %v6117_v26 = vld [vmem:[%s9249_s5 + $0x198] sm:$0xf0]  ;;  %v6108_v42 = vor.u32 %v6516_v24, %v6107_v48  ;;  %v6109_v22 = vld [vmem:[%s9249_s5 + $0x188] sm:$0xf0] }
 0x590   : > { %6001 = vmatmul.msk.bf16.gmra.mxu2 %vm3324_vm6, %v8363_v38  ;;  %6008 = vmatmul.msk.bf16.gmra.mxu3 %vm3324_vm6, %v8363_v38  ;;  %v8657_v63 = vpop.f32.mrf.mxu0  ;;  %v8659_v54 = vpop.f32.mrf.mxu1 }
 0x593   : > { %v3367_v2 = vpop.f32.mrf.mxu2  ;;  %v3411_v37 = vpop.f32.mrf.mxu3 }
 0x594   : > { %v8649_v57 = vadd.f32 %v3530_v17, %v3367_v2  ;;  %v8651_v16 = vadd.f32 %v3574_v39, %v3411_v37  ;;  %v6514_v2 = vld [vmem:[%s9249_s5 + $0x174] sm:$0xf0]  ;;  %v6513_v37 = vld [vmem:[%s9249_s5 + $0x174] sm:$0xf] }
 0x598   : > { %v3540_v9 = vpop.f32.mrf.mxu0  ;;  %v3584_v43 = vpop.f32.mrf.mxu1 }
 0x59b   : > { %v3369_v62 = vpop.f32.mrf.mxu2  ;;  %v3413_v0 = vpop.f32.mrf.mxu3  ;;  %6068 = vmatmul.msk.bf16.gmra.mxu0 %vm3324_vm6, %v8556_v29  ;;  %6075 = vmatmul.msk.bf16.gmra.mxu1 %vm3324_vm6, %v8556_v29  ;;  %v6088_v29 = vld [vmem:[%s9249_s5 + $0x1b0] sm:$0x33] }
 0x59c   : > { %v8661_v38 = vadd.f32 %v3532_v41, %v3369_v62  ;;  %v8663_v53 = vadd.f32 %v3576_v12, %v3413_v0  ;;  %v4127_v4 = vunpack.c.l.b16 %v6088_v29  ;;  %v4128_v13 = vunpack.c.h.b16 %v6088_v29  ;;  %v6101_v0 = vld [vmem:[%s9249_s5 + $0x178] sm:$0xf0] }
 0x59e   : > { %v4139_v46 = vpack.c.b16 %v4127_v4, %v4127_v4  ;;  %v4140_v58 = vpack.c.b16 %v4128_v13, %v4128_v13 }
 0x5a0   : > { %6002 = vmatmul.msk.bf16.gmra.mxu2 %vm3324_vm6, %v8431_v56  ;;  %6009 = vmatmul.msk.bf16.gmra.mxu3 %vm3324_vm6, %v8431_v56  ;;  %v4173_v23 = vsel %vm3346_vm13, %v4139_v46, 0  ;;  %v4176_v56 = vsel %vm3346_vm13, %v4140_v58, 0  ;;  %v8707_v60 = vpop.f32.mrf.mxu0  ;;  %v8709_v7 = vpop.f32.mrf.mxu1  ;;  %v6511_v46 = vld [vmem:[%s9249_s5 + $0x164] sm:$0xf] }
 0x5a1   : > { %4180 = vmatpush.bf16.msrb.mxu2 %v4173_v23  ;;  %4224 = vmatpush.bf16.msrb.mxu3 %v4176_v56  ;;  %v6093_v23 = vld [vmem:[%s9249_s5 + $0x168] sm:$0xf0] }
 0x5a2   : > { %v6096_v56 = vor.u32 %v6511_v46, %v6093_v23 }
 0x5a3   : > { %v3372_v44 = vpop.f32.mrf.mxu2  ;;  %v3416_v14 = vpop.f32.mrf.mxu3 }
 0x5a4   : > { %v8669_v5 = vadd.f32 %v3535_v47, %v3372_v44  ;;  %v8671_v59 = vadd.f32 %v3579_v15, %v3416_v14  ;;  %v6099_v15 = vld [vmem:[%s9249_s5 + $0x170] sm:$0xf]  ;;  %v6104_v44 = vor.u32 %v6513_v37, %v6101_v0 }
 0x5a5   : > { %4181 = vmatpush.bf16.msrb.mxu2 %v6124_v55  ;;  %4225 = vmatpush.bf16.msrb.mxu3 %v6128_v6  ;;  %v6100_v62 = vor.u32 %v6514_v2, %v6099_v15 }
 0x5a8   : > { %v3545_v14 = vpop.f32.mrf.mxu0  ;;  %v3589_v29 = vpop.f32.mrf.mxu1 }
 0x5a9   : > { %4182 = vmatpush.bf16.msrb.mxu2 %v6116_v1 }
 0x5ab   : > { %v8678_v27 = vpop.f32.mrf.mxu2  ;;  %v8680_v11 = vpop.f32.mrf.mxu3  ;;  %6069 = vmatmul.msk.bf16.gmra.mxu0 %vm3324_vm6, %v8609_v31  ;;  %6076 = vmatmul.msk.bf16.gmra.mxu1 %vm3324_vm6, %v8609_v31  ;;  %v6517_v31 = vld [vmem:[%s9249_s5 + $0x194] sm:$0xf] }
 0x5ac   : > { %v6120_v32 = vor.u32 %v6517_v31, %v6117_v26 }
 0x5ad   : > { %4183 = vmatpush.bf16.msrb.mxu2 %v6108_v42 }
 0x5ae   : > { %4226 = vmatpush.bf16.msrb.mxu3 %v6120_v32 }
 0x5b0   : > { %6003 = vmatmul.msk.bf16.gmra.mxu2 %vm3324_vm6, %v8518_v34  ;;  %6010 = vmatmul.msk.bf16.gmra.mxu3 %vm3324_vm6, %v8518_v34  ;;  %v6515_v34 = vld [vmem:[%s9249_s5 + $0x184] sm:$0xf]  ;;  %v8770_v36 = vpop.f32.mrf.mxu0  ;;  %v8772_v40 = vpop.f32.mrf.mxu1 }
 0x5b1   : > { %v6112_v47 = vor.u32 %v6515_v34, %v6109_v22  ;;  %4184 = vmatpush.bf16.msrb.mxu2 %v6100_v62 }
 0x5b3   : > { %v3377_v17 = vpop.f32.mrf.mxu2  ;;  %v3421_v39 = vpop.f32.mrf.mxu3  ;;  %4227 = vmatpush.bf16.msrb.mxu3 %v6112_v47 }
 0x5b4   : > { %v8727_v41 = vadd.f32 %v3540_v9, %v3377_v17  ;;  %v8729_v12 = vadd.f32 %v3584_v43, %v3421_v39  ;;  %v6091_v9 = vld [vmem:[%s9249_s5 + $0x160] sm:$0xf]  ;;  %v6512_v43 = vld [vmem:[%s9249_s5 + $0x164] sm:$0xf0] }
 0x5b5   : > { %v6092_v58 = vor.u32 %v6512_v43, %v6091_v9 }
 0x5b7   : > { %4228 = vmatpush.bf16.msrb.mxu3 %v6104_v44  ;;  %4185 = vmatpush.bf16.msrb.mxu2 %v6092_v58 }
 0x5b8   : > { %v3550_v20 = vpop.f32.mrf.mxu0  ;;  %v3594_v31 = vpop.f32.mrf.mxu1 }
 0x5bb   : > { %v8746_v4 = vpop.f32.mrf.mxu2  ;;  %v8748_v13 = vpop.f32.mrf.mxu3  ;;  %6070 = vmatmul.msk.bf16.gmra.mxu0 %vm3324_vm6, %v8603_v30  ;;  %6077 = vmatmul.msk.bf16.gmra.mxu1 %vm3324_vm6, %v8603_v30 }
 0x5bc   : > { %4229 = vmatpush.bf16.msrb.mxu3 %v6096_v56 }
 0x5c0   : > { %6004 = vmatmul.msk.bf16.gmra.mxu2 %vm3324_vm6, %v8594_v19  ;;  %6011 = vmatmul.msk.bf16.gmra.mxu3 %vm3324_vm6, %v8594_v19  ;;  %v8790_v17 = vpop.f32.mrf.mxu0  ;;  %v8792_v39 = vpop.f32.mrf.mxu1 }
 0x5c3   : > { %v3382_v30 = vpop.f32.mrf.mxu2  ;;  %v3426_v3 = vpop.f32.mrf.mxu3 }
 0x5c4   : > { %v8774_v55 = vadd.f32 %v3545_v14, %v3382_v30  ;;  %v8776_v10 = vadd.f32 %v3589_v29, %v3426_v3 }
 0x5c8   : > { %v3599_v34 = vpop.f32.mrf.mxu1 }
 0x5cb   : > { %v8778_v6 = vpop.f32.mrf.mxu2  ;;  %v8780_v33 = vpop.f32.mrf.mxu3 }
 0x5d0   : > { %6005 = vmatmul.msk.bf16.gmra.mxu2 %vm3324_vm6, %v8584_v61  ;;  %6012 = vmatmul.msk.bf16.gmra.mxu3 %vm3324_vm6, %v8584_v61  ;;  %v3555_v61 = vpop.f32.mrf.mxu0 }
 0x5d3   : > { %v3387_v19 = vpop.f32.mrf.mxu2  ;;  %v3431_v1 = vpop.f32.mrf.mxu3 }
 0x5d4   : > { %v8786_v26 = vadd.f32 %v3550_v20, %v3387_v19  ;;  %v8788_v32 = vadd.f32 %v3594_v31, %v3431_v1  ;;  %v6527_v1 = vld [vmem:[%s9252_s8 + $0x30] sm:$0xff] }
 0x5db   : > { %v8794_v48 = vpop.f32.mrf.mxu2  ;;  %v8796_v24 = vpop.f32.mrf.mxu3 }
 0x5e0   : > { %6129 = vmatmul.msk.bf16.vlgmr.msrb.gmra.mxu2 %vm3324_vm6, %v8330_v52  ;;  %6136 = vmatmul.msk.bf16.vlgmr.msrb.gmra.mxu3 %vm3324_vm6, %v8330_v52 }
 0x5e3   : > { %v3392_v42 = vpop.f32.mrf.mxu2  ;;  %v3436_v22 = vpop.f32.mrf.mxu3 }
 0x5e4   : > { %v8802_v47 = vadd.f32 %v3555_v61, %v3392_v42  ;;  %v8804_v15 = vadd.f32 %v3599_v34, %v3436_v22  ;;  %v8890_v34 = vpop.f32.mrf.mxu0  ;;  %v6525_v42 = vld [vmem:[%s9252_s8 + $0x20] sm:$0xff] }
 0x5e5   : > { %9463 = vst [vmem:[#allocation36_spill] sm:$0xff] %v8890_v34 }
 0x5eb   : > { %v8806_v2 = vpop.f32.mrf.mxu2  ;;  %v8808_v37 = vpop.f32.mrf.mxu3 }
 0x5ec   : > { %9461 = vst [vmem:[#allocation35_spill] sm:$0xff] %v8806_v2 }
 0x5ed   : > { %9462 = vst [vmem:[#allocation11_spill] sm:$0xff] %v8808_v37 }
 0x5f0   : > { %6130 = vmatmul.msk.bf16.gmra.mxu2 %vm3324_vm6, %v8344_v45  ;;  %6137 = vmatmul.msk.bf16.gmra.mxu3 %vm3324_vm6, %v8344_v45 }
 0x5f3   : > { %v3727_v62 = vpop.f32.mrf.mxu2  ;;  %v3771_v52 = vpop.f32.mrf.mxu3 }
 0x5f4   : > { %v8815_v0 = vadd.f32 %v3727_v62, %v8633_v25  ;;  %v8818_v44 = vadd.f32 %v3771_v52, %v8635_v51 }
 0x5fb   : > { %v3729_v14 = vpop.f32.mrf.mxu2  ;;  %v3773_v29 = vpop.f32.mrf.mxu3 }
 0x5fc   : > { %v8821_v9 = vadd.f32 %v3729_v14, %v8641_v21  ;;  %v8824_v43 = vadd.f32 %v3773_v29, %v8643_v8  ;;  %v3964_v29 = vpop.f32.mrf.mxu0 }
 0x600   : > { %6131 = vmatmul.msk.bf16.gmra.mxu2 %vm3324_vm6, %v8371_v49  ;;  %6138 = vmatmul.msk.bf16.gmra.mxu3 %vm3324_vm6, %v8371_v49 }
 0x603   : > { %v3732_v45 = vpop.f32.mrf.mxu2  ;;  %v3776_v25 = vpop.f32.mrf.mxu3 }
 0x604   : > { %v8831_v46 = vadd.f32 %v3732_v45, %v8649_v57  ;;  %v8834_v51 = vadd.f32 %v3776_v25, %v8651_v16  ;;  %v6524_v25 = vld [vmem:[%s9252_s8 + $0x18] sm:$0xff] }
 0x60b   : > { %v3734_v58 = vpop.f32.mrf.mxu2  ;;  %v3778_v21 = vpop.f32.mrf.mxu3 }
 0x60c   : > { %v8837_v23 = vadd.f32 %v3734_v58, %v8661_v38  ;;  %v8840_v8 = vadd.f32 %v3778_v21, %v8663_v53 }
 0x610   : > { %6132 = vmatmul.msk.bf16.gmra.mxu2 %vm3324_vm6, %v8446_v28  ;;  %6139 = vmatmul.msk.bf16.gmra.mxu3 %vm3324_vm6, %v8446_v28 }
 0x613   : > { %v3737_v49 = vpop.f32.mrf.mxu2  ;;  %v3781_v57 = vpop.f32.mrf.mxu3 }
 0x614   : > { %v8847_v56 = vadd.f32 %v3737_v49, %v8669_v5  ;;  %v8850_v16 = vadd.f32 %v3781_v57, %v8671_v59  ;;  %v3966_v49 = vpop.f32.mrf.mxu0 }
 0x61b   : > { %v8852_v30 = vpop.f32.mrf.mxu2  ;;  %v8854_v38 = vpop.f32.mrf.mxu3 }
 0x620   : > { %6133 = vmatmul.msk.bf16.gmra.mxu2 %vm3324_vm6, %v8528_v35  ;;  %6140 = vmatmul.msk.bf16.gmra.mxu3 %vm3324_vm6, %v8528_v35 }
 0x623   : > { %v3742_v53 = vpop.f32.mrf.mxu2  ;;  %v3786_v28 = vpop.f32.mrf.mxu3 }
 0x624   : > { %v8861_v3 = vadd.f32 %v3742_v53, %v8727_v41  ;;  %v8864_v5 = vadd.f32 %v3786_v28, %v8729_v12  ;;  %v6528_v12 = vld [vmem:[%s9252_s8 + $0x38] sm:$0xff]  ;;  %v6521_v53 = vld [vmem:[%s9252_s8] sm:$0xff] }
 0x625   : > { %4528 = vmatpush.bf16.msra.mxu0 %v6528_v12  ;;  %v6529_v28 = vld [vmem:[%s9252_s8 + $0x40] sm:$0xff] }
 0x629   : > { %4529 = vmatpush.bf16.msra.mxu0 %v6527_v1 }
 0x62b   : > { %v8866_v59 = vpop.f32.mrf.mxu2  ;;  %v8868_v20 = vpop.f32.mrf.mxu3 }
 0x630   : > { %6134 = vmatmul.msk.bf16.gmra.mxu2 %vm3324_vm6, %v8600_v50  ;;  %6141 = vmatmul.msk.bf16.gmra.mxu3 %vm3324_vm6, %v8600_v50 }
 0x633   : > { %v3747_v31 = vpop.f32.mrf.mxu2  ;;  %v3791_v35 = vpop.f32.mrf.mxu3 }
 0x634   : > { %v8875_v19 = vadd.f32 %v3747_v31, %v8774_v55  ;;  %v8878_v41 = vadd.f32 %v3791_v35, %v8776_v10  ;;  %v8892_v55 = vpop.f32.mrf.mxu1  ;;  %v6526_v10 = vld [vmem:[%s9252_s8 + $0x28] sm:$0xff] }
 0x635   : > { %9464 = vst [vmem:[#allocation37_spill] sm:$0xff] %v8892_v55  ;;  %4530 = vmatpush.bf16.msra.mxu0 %v6526_v10  ;;  %v3969_v10 = vpop.f32.mrf.mxu0 }
 0x639   : > { %4531 = vmatpush.bf16.msra.mxu0 %v6525_v42 }
 0x63b   : > { %v8886_v61 = vpop.f32.mrf.mxu2  ;;  %v8888_v50 = vpop.f32.mrf.mxu3 }
 0x63c   : > { %v4008_v45 = vpop.f32.mrf.mxu1 }
 0x63d   : > { %4532 = vmatpush.bf16.msra.mxu0 %v6524_v25 }
 0x640   : > { %6135 = vmatmul.msk.bf16.gmra.mxu2 %vm3324_vm6, %v8588_v18  ;;  %6142 = vmatmul.msk.bf16.gmra.mxu3 %vm3324_vm6, %v8588_v18  ;;  %v6523_v18 = vld [vmem:[%s9252_s8 + $0x10] sm:$0xff] }
 0x641   : > { %4533 = vmatpush.bf16.msra.mxu0 %v6523_v18  ;;  %v4294_v18 = vld [vmem:[%s9250_s6] sm:$0x3] }
 0x643   : > { %v3752_v22 = vpop.f32.mrf.mxu2  ;;  %v3796_v62 = vpop.f32.mrf.mxu3 }
 0x644   : > { %v8905_v52 = vadd.f32 %v3752_v22, %v8786_v26  ;;  %v8908_v14 = vadd.f32 %v3796_v62, %v8788_v32  ;;  %v6522_v26 = vld [vmem:[%s9252_s8 + $0x8] sm:$0xff]  ;;  %v4010_v57 = vpop.f32.mrf.mxu1 }
 0x645   : > { %v6530_v32 = vld [vmem:[%s9252_s8 + $0x48] sm:$0xff]  ;;  %4534 = vmatpush.bf16.msra.mxu0 %v6522_v26  ;;  %v4046_v55 = vadd.f32 %v4010_v57, %v8824_v43 }
 0x646   : > { %4578 = vmatpush.bf16.msra.mxu1 %v6530_v32  ;;  %v3971_v32 = vpop.f32.mrf.mxu0 }
 0x649   : > { %4535 = vmatpush.bf16.msra.mxu0 %v6521_v53 }
 0x64a   : > { %4579 = vmatpush.bf16.msra.mxu1 %v6529_v28  ;;  %v8947_v28 = vperm.slane %v4294_v18, 0 }
 0x64b   : > { %v8916_v58 = vpop.f32.mrf.mxu2  ;;  %v8918_v21 = vpop.f32.mrf.mxu3 }
 0x64c   : > { %9465 = vst [vmem:[#allocation12_spill] sm:$0xff] %v8916_v58  ;;  %v4013_v42 = vpop.f32.mrf.mxu1 }
 0x64d   : > { %9466 = vst [vmem:[#allocation13_spill] sm:$0xff] %v8918_v21 }
 0x653   : > { %v3757_v31 = vpop.f32.mrf.mxu2  ;;  %v3801_v35 = vpop.f32.mrf.mxu3 }
 0x654   : > { %v8933_v12 = vadd.f32 %v3757_v31, %v8802_v47  ;;  %v8936_v1 = vadd.f32 %v3801_v35, %v8804_v15  ;;  %v4015_v47 = vpop.f32.mrf.mxu1  ;;  %v4043_v31 = vadd.f32 %v3964_v29, %v8815_v0  ;;  %v4044_v15 = vadd.f32 %v4008_v45, %v8818_v44  ;;  %v3974_v29 = vpop.f32.mrf.mxu0 }
 0x656   : > { %9467 = vst [vmem:[#allocation14_spill] sm:$0xff] %v8933_v12  ;;  %v4045_v12 = vadd.f32 %v3966_v49, %v8821_v9 }
 0x657   : > { %9468 = vst [vmem:[#allocation38_spill] sm:$0xff] %v8936_v1  ;;  %v8949_v1 = vperm.slane %v4294_v18, 1 }
 0x65b   : > { %v8938_v22 = vpop.f32.mrf.mxu2  ;;  %v8940_v62 = vpop.f32.mrf.mxu3 }
 0x65c   : > { %9469 = vst [vmem:[#allocation39_spill] sm:$0xff] %v8938_v22  ;;  %v4018_v44 = vpop.f32.mrf.mxu1  ;;  %v3976_v21 = vpop.f32.mrf.mxu0 }
 0x65d   : > { %9470 = vst [vmem:[#allocation15_spill] sm:$0xff] %v8940_v62 }
 0x663   : > { %v4187_v25 = vpop.f32.mrf.mxu2  ;;  %v4231_v26 = vpop.f32.mrf.mxu3 }
 0x664   : > { %v4266_v53 = vadd.f32 %v4187_v25, %v4043_v31  ;;  %v4267_v35 = vadd.f32 %v4231_v26, %v4044_v15  ;;  %v4020_v58 = vpop.f32.mrf.mxu1 }
 0x666   : > { %v4300_v62 = vadd.f32 %v8947_v28, %v4266_v53  ;;  %v4301_v22 = vadd.f32 %v8949_v1, %v4267_v35  ;;  %v4047_v53 = vadd.f32 %v3969_v10, %v8831_v46 }
 0x668   : > { %v4356_v45 = vmul.f32 0.01, %v4300_v62  ;;  %v4357_v25 = vmul.f32 0.01, %v4301_v22  ;;  %vm4328_vm9 = vcmp.ge.f32.partialorder %v4300_v62, 0.0  ;;  %vm4329_vm11 = vcmp.ge.f32.partialorder %v4301_v22, 0.0 }
 0x66a   : > { %v4384_v43 = vsel %vm4328_vm9, %v4300_v62, %v4356_v45  ;;  %v4385_v49 = vsel %vm4329_vm11, %v4301_v22, %v4357_v25  ;;  %v4049_v45 = vadd.f32 %v3971_v32, %v8837_v23  ;;  %v4050_v25 = vadd.f32 %v4015_v47, %v8840_v8 }
 0x66b   : > { %v4189_v37 = vpop.f32.mrf.mxu2  ;;  %v4233_v34 = vpop.f32.mrf.mxu3 }
 0x66c   : > { %v4268_v2 = vadd.f32 %v4189_v37, %v4045_v12  ;;  %v4269_v0 = vadd.f32 %v4233_v34, %v4046_v55  ;;  %v4023_v23 = vpop.f32.mrf.mxu1 }
 0x66e   : > { %v4302_v26 = vadd.f32 %v8947_v28, %v4268_v2  ;;  %v4303_v18 = vadd.f32 %v8949_v1, %v4269_v0  ;;  %v4048_v2 = vadd.f32 %v4013_v42, %v8834_v51 }
 0x670   : > { %vm4330_vm12 = vcmp.ge.f32.partialorder %v4302_v26, 0.0  ;;  %v4358_v31 = vmul.f32 0.01, %v4302_v26  ;;  %vm4331_vm10 = vcmp.ge.f32.partialorder %v4303_v18, 0.0  ;;  %v4359_v9 = vmul.f32 0.01, %v4303_v18 }
 0x672   : > { %v4386_v57 = vsel %vm4330_vm12, %v4302_v26, %v4358_v31  ;;  %v4387_v37 = vsel %vm4331_vm10, %v4303_v18, %v4359_v9 }
 0x673   : > { %v4412_v34 = vpack.c.bf16 %v4386_v57, %v4384_v43  ;;  %v4413_v55 = vpack.c.bf16 %v4387_v37, %v4385_v49  ;;  %v4192_v12 = vpop.f32.mrf.mxu2  ;;  %v4236_v15 = vpop.f32.mrf.mxu3 }
 0x674   : > { %v4270_v35 = vadd.f32 %v4192_v12, %v4047_v53  ;;  %v4271_v0 = vadd.f32 %v4236_v15, %v4048_v2  ;;  %v3979_v57 = vpop.f32.mrf.mxu0  ;;  %v3538_v53 = vadd.f32 %v8657_v63, %v8678_v27  ;;  %v3582_v2 = vadd.f32 %v8659_v54, %v8680_v11 }
 0x675   : > { %4536 = vmatmul.bf16.vlgmr.msra.gmra.mxu0 %v4412_v34  ;;  %6183 = vmatmul.msk.bf16.vlgmr.msra.gmra.mxu1 %vm4506_vm14, %v4413_v55 }
 0x676   : > { %v4304_v62 = vadd.f32 %v8947_v28, %v4270_v35  ;;  %v4305_v22 = vadd.f32 %v8949_v1, %v4271_v0  ;;  %v4051_v35 = vadd.f32 %v3974_v29, %v8847_v56  ;;  %v4052_v0 = vadd.f32 %v4018_v44, %v8850_v16  ;;  %v4025_v29 = vpop.f32.mrf.mxu1 }
 0x678   : > { %v4360_v51 = vmul.f32 0.01, %v4304_v62  ;;  %v4361_v42 = vmul.f32 0.01, %v4305_v22  ;;  %vm4332_vm15 = vcmp.ge.f32.partialorder %v4304_v62, 0.0  ;;  %vm4333_vm1 = vcmp.ge.f32.partialorder %v4305_v22, 0.0 }
 0x67a   : > { %v4389_v32 = vsel %vm4333_vm1, %v4305_v22, %v4361_v42  ;;  %v4388_v47 = vsel %vm4332_vm15, %v4304_v62, %v4360_v51  ;;  %v3816_v62 = vadd.f32 %v8852_v30, %v3538_v53  ;;  %v3817_v22 = vadd.f32 %v8854_v38, %v3582_v2 }
 0x67b   : > { %v4194_v26 = vpop.f32.mrf.mxu2  ;;  %v4238_v18 = vpop.f32.mrf.mxu3 }
 0x67c   : > { %v4272_v46 = vadd.f32 %v4194_v26, %v4049_v45  ;;  %v4273_v10 = vadd.f32 %v4238_v18, %v4050_v25  ;;  %v4053_v27 = vadd.f32 %v3976_v21, %v3816_v62  ;;  %v4054_v18 = vadd.f32 %v4020_v58, %v3817_v22  ;;  %v3981_v56 = vpop.f32.mrf.mxu0 }
 0x67e   : > { %v4306_v31 = vadd.f32 %v8947_v28, %v4272_v46  ;;  %v4307_v9 = vadd.f32 %v8949_v1, %v4273_v10 }
 0x680   : > { %v4362_v43 = vmul.f32 0.01, %v4306_v31  ;;  %vm4335_vm7 = vcmp.ge.f32.partialorder %v4307_v9, 0.0  ;;  %v4363_v49 = vmul.f32 0.01, %v4307_v9  ;;  %vm4334_vm8 = vcmp.ge.f32.partialorder %v4306_v31, 0.0 }
 0x682   : > { %v4391_v8 = vsel %vm4335_vm7, %v4307_v9, %v4363_v49  ;;  %v4390_v37 = vsel %vm4334_vm8, %v4306_v31, %v4362_v43 }
 0x683   : > { %v4197_v34 = vpop.f32.mrf.mxu2  ;;  %v4241_v55 = vpop.f32.mrf.mxu3  ;;  %v4414_v12 = vpack.c.bf16 %v4390_v37, %v4388_v47  ;;  %v4415_v15 = vpack.c.bf16 %v4391_v8, %v4389_v32  ;;  %v3543_v47 = vadd.f32 %v8707_v60, %v8746_v4  ;;  %v3587_v37 = vadd.f32 %v8709_v7, %v8748_v13 }
 0x684   : > { %v4274_v45 = vadd.f32 %v4197_v34, %v4051_v35  ;;  %v4275_v25 = vadd.f32 %v4241_v55, %v4052_v0  ;;  %v4055_v34 = vadd.f32 %v3979_v57, %v8861_v3  ;;  %v4056_v55 = vadd.f32 %v4023_v23, %v8864_v5 }
 0x685   : > { %4541 = vmatmul.bf16.gmra.mxu0 %v4414_v12  ;;  %6184 = vmatmul.msk.bf16.gmra.mxu1 %vm4506_vm14, %v4415_v15  ;;  %v3984_v12 = vpop.f32.mrf.mxu0  ;;  %v4028_v15 = vpop.f32.mrf.mxu1  ;;  %v3820_v53 = vadd.f32 %v8866_v59, %v3543_v47  ;;  %v3821_v2 = vadd.f32 %v8868_v20, %v3587_v37 }
 0x686   : > { %v4308_v26 = vadd.f32 %v8947_v28, %v4274_v45  ;;  %v4309_v63 = vadd.f32 %v8949_v1, %v4275_v25 }
 0x687   : > { %v4057_v7 = vadd.f32 %v3981_v56, %v3820_v53  ;;  %v4058_v13 = vadd.f32 %v4025_v29, %v3821_v2 }
 0x688   : > { %v4364_v46 = vmul.f32 0.01, %v4308_v26  ;;  %v4365_v10 = vmul.f32 0.01, %v4309_v63  ;;  %vm4336_vm9 = vcmp.ge.f32.partialorder %v4308_v26, 0.0  ;;  %vm4337_vm11 = vcmp.ge.f32.partialorder %v4309_v63, 0.0 }
 0x68a   : > { %v4393_v21 = vsel %vm4337_vm11, %v4309_v63, %v4365_v10  ;;  %v4392_v31 = vsel %vm4336_vm9, %v4308_v26, %v4364_v46  ;;  %v3548_v46 = vadd.f32 %v8770_v36, %v8778_v6  ;;  %v3592_v10 = vadd.f32 %v8772_v40, %v8780_v33 }
 0x68b   : > { %v4199_v54 = vpop.f32.mrf.mxu2  ;;  %v4243_v11 = vpop.f32.mrf.mxu3 }
 0x68c   : > { %v4276_v16 = vadd.f32 %v4199_v54, %v4053_v27  ;;  %v4277_v44 = vadd.f32 %v4243_v11, %v4054_v18 }
 0x68d   : > { %v3986_v20 = vpop.f32.mrf.mxu0  ;;  %v4030_v25 = vpop.f32.mrf.mxu1 }
 0x68e   : > { %v4310_v30 = vadd.f32 %v8947_v28, %v4276_v16  ;;  %v4311_v38 = vadd.f32 %v8949_v1, %v4277_v44 }
 0x690   : > { %v4366_v51 = vmul.f32 0.01, %v4310_v30  ;;  %vm4339_vm12 = vcmp.ge.f32.partialorder %v4311_v38, 0.0  ;;  %v4367_v42 = vmul.f32 0.01, %v4311_v38  ;;  %vm4338_vm10 = vcmp.ge.f32.partialorder %v4310_v30, 0.0 }
 0x692   : > { %v4395_v58 = vsel %vm4339_vm12, %v4311_v38, %v4367_v42  ;;  %v4394_v9 = vsel %vm4338_vm10, %v4310_v30, %v4366_v51  ;;  %v4059_v30 = vadd.f32 %v3984_v12, %v8875_v19  ;;  %v4060_v38 = vadd.f32 %v4028_v15, %v8878_v41 }
 0x693   : > { %v4202_v43 = vpop.f32.mrf.mxu2  ;;  %v4246_v49 = vpop.f32.mrf.mxu3  ;;  %v4416_v32 = vpack.c.bf16 %v4394_v9, %v4392_v31  ;;  %v4417_v8 = vpack.c.bf16 %v4395_v58, %v4393_v21  ;;  %v3824_v51 = vadd.f32 %v8886_v61, %v3548_v46  ;;  %v3825_v42 = vadd.f32 %v8888_v50, %v3592_v10 }
 0x694   : > { %v4278_v35 = vadd.f32 %v4202_v43, %v4055_v34  ;;  %v4279_v0 = vadd.f32 %v4246_v49, %v4056_v55 }
 0x695   : > { %4546 = vmatmul.bf16.gmra.mxu0 %v4416_v32  ;;  %6185 = vmatmul.msk.bf16.gmra.mxu1 %vm4506_vm14, %v4417_v8  ;;  %v3989_v31 = vpop.f32.mrf.mxu0  ;;  %v4033_v9 = vpop.f32.mrf.mxu1  ;;  %v4061_v40 = vadd.f32 %v3986_v20, %v3824_v51  ;;  %v4062_v33 = vadd.f32 %v4030_v25, %v3825_v42 }
 0x696   : > { %v4312_v60 = vadd.f32 %v8947_v28, %v4278_v35  ;;  %v4313_v4 = vadd.f32 %v8949_v1, %v4279_v0 }
 0x698   : > { %v4368_v62 = vmul.f32 0.01, %v4312_v60  ;;  %v4369_v22 = vmul.f32 0.01, %v4313_v4  ;;  %vm4340_vm15 = vcmp.ge.f32.partialorder %v4312_v60, 0.0  ;;  %vm4341_vm1 = vcmp.ge.f32.partialorder %v4313_v4, 0.0 }
 0x69a   : > { %v4397_v27 = vsel %vm4341_vm1, %v4313_v4, %v4369_v22  ;;  %v4396_v54 = vsel %vm4340_vm15, %v4312_v60, %v4368_v62  ;;  %v3553_v60 = vadd.f32 %v8790_v17, %v8794_v48  ;;  %v3597_v4 = vadd.f32 %v8792_v39, %v8796_v24  ;;  %v9472_v62 = vld [vmem:[#allocation13_spill] sm:$0xff] }
 0x69b   : > { %v4204_v3 = vpop.f32.mrf.mxu2  ;;  %v4248_v57 = vpop.f32.mrf.mxu3 }
 0x69c   : > { %v4280_v5 = vadd.f32 %v4204_v3, %v4057_v7  ;;  %v4281_v23 = vadd.f32 %v4248_v57, %v4058_v13  ;;  %v4063_v7 = vadd.f32 %v3989_v31, %v8905_v52  ;;  %v4064_v13 = vadd.f32 %v4033_v9, %v8908_v14  ;;  %v9475_v9 = vld [vmem:[#allocation11_spill] sm:$0xff] }
 0x69d   : > { %v3991_v3 = vpop.f32.mrf.mxu0  ;;  %v4035_v57 = vpop.f32.mrf.mxu1  ;;  %v3829_v22 = vadd.f32 %v9472_v62, %v3597_v4 }
 0x69e   : > { %v4314_v45 = vadd.f32 %v8947_v28, %v4280_v5  ;;  %v4315_v59 = vadd.f32 %v8949_v1, %v4281_v23  ;;  %v9471_v5 = vld [vmem:[#allocation12_spill] sm:$0xff] }
 0x69f   : > { %v3828_v23 = vadd.f32 %v9471_v5, %v3553_v60  ;;  %v4066_v24 = vadd.f32 %v4035_v57, %v3829_v22 }
 0x6a0   : > { %v4370_v26 = vmul.f32 0.01, %v4314_v45  ;;  %vm4343_vm7 = vcmp.ge.f32.partialorder %v4315_v59, 0.0  ;;  %v4371_v63 = vmul.f32 0.01, %v4315_v59  ;;  %vm4342_vm8 = vcmp.ge.f32.partialorder %v4314_v45, 0.0 }
 0x6a1   : > { %v4065_v39 = vadd.f32 %v3991_v3, %v3828_v23 }
 0x6a2   : > { %v4399_v18 = vsel %vm4343_vm7, %v4315_v59, %v4371_v63  ;;  %v4398_v11 = vsel %vm4342_vm8, %v4314_v45, %v4370_v26 }
 0x6a3   : > { %v4207_v56 = vpop.f32.mrf.mxu2  ;;  %v4251_v29 = vpop.f32.mrf.mxu3  ;;  %v4418_v16 = vpack.c.bf16 %v4398_v11, %v4396_v54  ;;  %v4419_v44 = vpack.c.bf16 %v4399_v18, %v4397_v27 }
 0x6a4   : > { %v4282_v21 = vadd.f32 %v4207_v56, %v4059_v30  ;;  %v4283_v58 = vadd.f32 %v4251_v29, %v4060_v38 }
 0x6a5   : > { %4551 = vmatmul.bf16.gmra.mxu0 %v4418_v16  ;;  %6186 = vmatmul.msk.bf16.gmra.mxu1 %vm4506_vm14, %v4419_v44  ;;  %v3994_v54 = vpop.f32.mrf.mxu0  ;;  %v4038_v11 = vpop.f32.mrf.mxu1 }
 0x6a6   : > { %v4316_v36 = vadd.f32 %v8947_v28, %v4282_v21  ;;  %v4317_v6 = vadd.f32 %v8949_v1, %v4283_v58  ;;  %v9473_v21 = vld [vmem:[#allocation35_spill] sm:$0xff]  ;;  %v9474_v58 = vld [vmem:[#allocation36_spill] sm:$0xff] }
 0x6a7   : > { %v3558_v31 = vadd.f32 %v9474_v58, %v9473_v21 }
 0x6a8   : > { %v4372_v32 = vmul.f32 0.01, %v4316_v36  ;;  %v4373_v8 = vmul.f32 0.01, %v4317_v6  ;;  %vm4344_vm9 = vcmp.ge.f32.partialorder %v4316_v36, 0.0  ;;  %vm4345_vm11 = vcmp.ge.f32.partialorder %v4317_v6, 0.0 }
 0x6aa   : > { %v4401_v34 = vsel %vm4345_vm11, %v4317_v6, %v4373_v8  ;;  %v4400_v12 = vsel %vm4344_vm9, %v4316_v36, %v4372_v32  ;;  %v9476_v36 = vld [vmem:[#allocation37_spill] sm:$0xff]  ;;  %v9480_v32 = vld [vmem:[#allocation15_spill] sm:$0xff] }
 0x6ab   : > { %v4209_v19 = vpop.f32.mrf.mxu2  ;;  %v4253_v43 = vpop.f32.mrf.mxu3  ;;  %v3602_v6 = vadd.f32 %v9476_v36, %v9475_v9 }
 0x6ac   : > { %v4284_v41 = vadd.f32 %v4209_v19, %v4061_v40  ;;  %v4285_v49 = vadd.f32 %v4253_v43, %v4062_v33  ;;  %v9477_v40 = vld [vmem:[#allocation14_spill] sm:$0xff] }
 0x6ad   : > { %v4067_v33 = vadd.f32 %v3994_v54, %v9477_v40  ;;  %v9478_v19 = vld [vmem:[#allocation38_spill] sm:$0xff]  ;;  %v3833_v8 = vadd.f32 %v9480_v32, %v3602_v6 }
 0x6ae   : > { %v4318_v61 = vadd.f32 %v8947_v28, %v4284_v41  ;;  %v4319_v50 = vadd.f32 %v8949_v1, %v4285_v49  ;;  %v4068_v43 = vadd.f32 %v4038_v11, %v9478_v19  ;;  %v9479_v41 = vld [vmem:[#allocation39_spill] sm:$0xff] }
 0x6af   : > { %v3832_v49 = vadd.f32 %v9479_v41, %v3558_v31 }
 0x6b0   : > { %vm4346_vm12 = vcmp.ge.f32.partialorder %v4318_v61, 0.0  ;;  %v4374_v47 = vmul.f32 0.01, %v4318_v61  ;;  %vm4347_vm10 = vcmp.ge.f32.partialorder %v4319_v50, 0.0  ;;  %v4375_v37 = vmul.f32 0.01, %v4319_v50 }
 0x6b2   : > { %v4403_v55 = vsel %vm4347_vm10, %v4319_v50, %v4375_v37  ;;  %v4402_v15 = vsel %vm4346_vm12, %v4318_v61, %v4374_v47  ;;  %v3996_v47 = vpop.f32.mrf.mxu0  ;;  %v4040_v37 = vpop.f32.mrf.mxu1 }
 0x6b3   : > { %v4212_v53 = vpop.f32.mrf.mxu2  ;;  %v4256_v2 = vpop.f32.mrf.mxu3  ;;  %v4420_v35 = vpack.c.bf16 %v4402_v15, %v4400_v12  ;;  %v4421_v0 = vpack.c.bf16 %v4403_v55, %v4401_v34  ;;  %v4069_v12 = vadd.f32 %v3996_v47, %v3832_v49  ;;  %v4070_v15 = vadd.f32 %v4040_v37, %v3833_v8 }
 0x6b4   : > { %v4286_v45 = vadd.f32 %v4212_v53, %v4063_v7  ;;  %v4287_v59 = vadd.f32 %v4256_v2, %v4064_v13 }
 0x6b5   : > { %4556 = vmatmul.bf16.gmra.mxu0 %v4420_v35  ;;  %6187 = vmatmul.msk.bf16.gmra.mxu1 %vm4506_vm14, %v4421_v0 }
 0x6b6   : > { %v4320_v17 = vadd.f32 %v8947_v28, %v4286_v45  ;;  %v4321_v48 = vadd.f32 %v8949_v1, %v4287_v59 }
 0x6b8   : > { %v4376_v26 = vmul.f32 0.01, %v4320_v17  ;;  %v4377_v63 = vmul.f32 0.01, %v4321_v48  ;;  %vm4348_vm15 = vcmp.ge.f32.partialorder %v4320_v17, 0.0  ;;  %vm4349_vm1 = vcmp.ge.f32.partialorder %v4321_v48, 0.0 }
 0x6ba   : > { %v4405_v16 = vsel %vm4349_vm1, %v4321_v48, %v4377_v63  ;;  %v4404_v46 = vsel %vm4348_vm15, %v4320_v17, %v4376_v26 }
 0x6bb   : > { %v4214_v52 = vpop.f32.mrf.mxu2  ;;  %v4258_v20 = vpop.f32.mrf.mxu3 }
 0x6bc   : > { %v4288_v14 = vadd.f32 %v4214_v52, %v4065_v39  ;;  %v4289_v25 = vadd.f32 %v4258_v20, %v4066_v24 }
 0x6be   : > { %v4322_v27 = vadd.f32 %v8947_v28, %v4288_v14  ;;  %v4323_v18 = vadd.f32 %v8949_v1, %v4289_v25 }
 0x6c0   : > { %vm4350_vm7 = vcmp.ge.f32.partialorder %v4322_v27, 0.0  ;;  %v4378_v56 = vmul.f32 0.01, %v4322_v27  ;;  %vm4351_vm8 = vcmp.ge.f32.partialorder %v4323_v18, 0.0  ;;  %v4379_v29 = vmul.f32 0.01, %v4323_v18 }
 0x6c2   : > { %v4407_v44 = vsel %vm4351_vm8, %v4323_v18, %v4379_v29  ;;  %v4406_v10 = vsel %vm4350_vm7, %v4322_v27, %v4378_v56  ;;  %vm4769_vm7 = vcmask 654336  }
 0x6c3   : > { %v4217_v30 = vpop.f32.mrf.mxu2  ;;  %v4261_v38 = vpop.f32.mrf.mxu3  ;;  %v4422_v51 = vpack.c.bf16 %v4406_v10, %v4404_v46  ;;  %v4423_v42 = vpack.c.bf16 %v4407_v44, %v4405_v16 }
 0x6c4   : > { %v4290_v61 = vadd.f32 %v4217_v30, %v4067_v33  ;;  %v4291_v50 = vadd.f32 %v4261_v38, %v4068_v43 }
 0x6c5   : > { %4561 = vmatmul.bf16.gmra.mxu0 %v4422_v51  ;;  %6188 = vmatmul.msk.bf16.gmra.mxu1 %vm4506_vm14, %v4423_v42 }
 0x6c6   : > { %v4324_v34 = vadd.f32 %v8947_v28, %v4290_v61  ;;  %v4325_v55 = vadd.f32 %v8949_v1, %v4291_v50 }
 0x6c8   : > { %v4380_v60 = vmul.f32 0.01, %v4324_v34  ;;  %v4381_v4 = vmul.f32 0.01, %v4325_v55  ;;  %vm4352_vm9 = vcmp.ge.f32.partialorder %v4324_v34, 0.0  ;;  %vm4353_vm11 = vcmp.ge.f32.partialorder %v4325_v55, 0.0 }
 0x6ca   : > { %v4409_v5 = vsel %vm4353_vm11, %v4325_v55, %v4381_v4  ;;  %v4408_v62 = vsel %vm4352_vm9, %v4324_v34, %v4380_v60  ;;  %v4627_v60 = vld [vmem:[%s9251_s7 + $0x10] sm:$0xf] }
 0x6cb   : > { %v4219_v53 = vpop.f32.mrf.mxu2  ;;  %v4263_v2 = vpop.f32.mrf.mxu3  ;;  %v4637_v4 = vunpack.c.l.b16 %v4627_v60 }
 0x6cc   : > { %v4292_v35 = vadd.f32 %v4219_v53, %v4069_v12  ;;  %v4293_v0 = vadd.f32 %v4263_v2, %v4070_v15 }
 0x6ce   : > { %v4326_v7 = vadd.f32 %v8947_v28, %v4292_v35  ;;  %v4327_v13 = vadd.f32 %v8949_v1, %v4293_v0  ;;  %v6531_v35 = vld [vmem:[%s9251_s7] sm:$0xff]  ;;  %v6532_v0 = vld [vmem:[%s9251_s7 + $0x8] sm:$0xff] }
 0x6d0   : > { %vm4354_vm12 = vcmp.ge.f32.partialorder %v4326_v7, 0.0  ;;  %v4382_v3 = vmul.f32 0.01, %v4326_v7  ;;  %vm4355_vm10 = vcmp.ge.f32.partialorder %v4327_v13, 0.0  ;;  %v4383_v57 = vmul.f32 0.01, %v4327_v13 }
 0x6d2   : > { %v4411_v23 = vsel %vm4355_vm10, %v4327_v13, %v4383_v57  ;;  %v4410_v22 = vsel %vm4354_vm12, %v4326_v7, %v4382_v3  ;;  %v4640_v7 = vpack.c.b16 %v4637_v4, %v4637_v4  ;;  %v6537_v13 = vld [vmem:[%s9253_s9 + $0x20] sm:$0xff]  ;;  %v6536_v3 = vld [vmem:[%s9253_s9 + $0x18] sm:$0xff]  ;;  %v6535_v57 = vld [vmem:[%s9253_s9 + $0x10] sm:$0xff] }
 0x6d3   : > { %v4424_v45 = vpack.c.bf16 %v4410_v22, %v4408_v62  ;;  %v4425_v59 = vpack.c.bf16 %v4411_v23, %v4409_v5  ;;  %v6534_v5 = vld [vmem:[%s9253_s9 + $0x8] sm:$0xff]  ;;  %v6533_v23 = vld [vmem:[%s9253_s9] sm:$0xff] }
 0x6d4   : > { %v6542_v62 = vld [vmem:[%s9253_s9 + $0x48] sm:$0xff]  ;;  %v6541_v22 = vld [vmem:[%s9253_s9 + $0x40] sm:$0xff] }
 0x6d5   : > { %4566 = vmatmul.bf16.gmra.mxu0 %v4424_v45  ;;  %6189 = vmatmul.msk.bf16.gmra.mxu1 %vm4506_vm14, %v4425_v59  ;;  %vm4641_vm14 = vcmask 883712   ;;  %v6540_v45 = vld [vmem:[%s9253_s9 + $0x38] sm:$0xff]  ;;  %v6539_v59 = vld [vmem:[%s9253_s9 + $0x30] sm:$0xff] }
 0x6d6   : > { %4782 = vmatpush.bf16.msra.mxu3 %v6542_v62 }
 0x6da   : > { %4783 = vmatpush.bf16.msra.mxu3 %v6541_v22 }
 0x6de   : > { %4784 = vmatpush.bf16.msra.mxu3 %v6540_v45 }
 0x6e2   : > { %4785 = vmatpush.bf16.msra.mxu3 %v6539_v59 }
 0x6f2   : > { %v4537_v17 = vpop.f32.mrf.mxu0  ;;  %v4581_v48 = vpop.f32.mrf.mxu1 }
 0x6f3   : > { %v4582_v28 = vadd.f32 %v4581_v48, %v4537_v17  ;;  %v6538_v17 = vld [vmem:[%s9253_s9 + $0x28] sm:$0xff] }
 0x6f4   : > { %4786 = vmatpush.bf16.msra.mxu3 %v6538_v17  ;;  %v6556_v17 = vld [vmem:[%s9253_s9 + $0xb8] sm:$0xff] }
 0x6fa   : > { %v4539_v39 = vpop.f32.mrf.mxu0  ;;  %v4583_v1 = vpop.f32.mrf.mxu1 }
 0x6fb   : > { %v4584_v24 = vadd.f32 %v4583_v1, %v4539_v39 }
 0x6fd   : > { %v4616_v52 = vpack.c.bf16 %v4584_v24, %v4582_v28 }
 0x702   : > { %v4542_v20 = vpop.f32.mrf.mxu0  ;;  %v4586_v14 = vpop.f32.mrf.mxu1 }
 0x703   : > { %v4587_v25 = vadd.f32 %v4586_v14, %v4542_v20  ;;  %v6552_v20 = vld [vmem:[%s9253_s9 + $0x98] sm:$0xff] }
 0x70a   : > { %v4544_v26 = vpop.f32.mrf.mxu0  ;;  %v4588_v63 = vpop.f32.mrf.mxu1 }
 0x70b   : > { %v4589_v27 = vadd.f32 %v4588_v63, %v4544_v26  ;;  %v6547_v63 = vld [vmem:[%s9253_s9 + $0x70] sm:$0xff] }
 0x70c   : > { %4922 = vmatpush.bf16.msrb.mxu3 %v6547_v63 }
 0x70d   : > { %v4617_v18 = vpack.c.bf16 %v4589_v27, %v4587_v25  ;;  %v6551_v25 = vld [vmem:[%s9253_s9 + $0x90] sm:$0xff]  ;;  %v6550_v27 = vld [vmem:[%s9253_s9 + $0x88] sm:$0xff] }
 0x712   : > { %v4547_v54 = vpop.f32.mrf.mxu0  ;;  %v4591_v11 = vpop.f32.mrf.mxu1 }
 0x713   : > { %v4592_v56 = vadd.f32 %v4591_v11, %v4547_v54  ;;  %v6549_v54 = vld [vmem:[%s9253_s9 + $0x80] sm:$0xff] }
 0x71a   : > { %v4549_v29 = vpop.f32.mrf.mxu0  ;;  %v4593_v16 = vpop.f32.mrf.mxu1 }
 0x71b   : > { %v4594_v44 = vadd.f32 %v4593_v16, %v4549_v29 }
 0x71d   : > { %v4618_v46 = vpack.c.bf16 %v4594_v44, %v4592_v56 }
 0x722   : > { %v4552_v10 = vpop.f32.mrf.mxu0  ;;  %v4596_v30 = vpop.f32.mrf.mxu1 }
 0x723   : > { %v4597_v38 = vadd.f32 %v4596_v30, %v4552_v10 }
 0x72a   : > { %v4554_v51 = vpop.f32.mrf.mxu0  ;;  %v4598_v42 = vpop.f32.mrf.mxu1 }
 0x72b   : > { %v4599_v15 = vadd.f32 %v4598_v42, %v4554_v51 }
 0x72d   : > { %v4619_v2 = vpack.c.bf16 %v4599_v15, %v4597_v38 }
 0x732   : > { %v4557_v21 = vpop.f32.mrf.mxu0  ;;  %v4601_v58 = vpop.f32.mrf.mxu1 }
 0x733   : > { %v4602_v12 = vadd.f32 %v4601_v58, %v4557_v21 }
 0x73a   : > { %v4559_v31 = vpop.f32.mrf.mxu0  ;;  %v4603_v9 = vpop.f32.mrf.mxu1 }
 0x73b   : > { %v4604_v34 = vadd.f32 %v4603_v9, %v4559_v31 }
 0x73d   : > { %v4620_v53 = vpack.c.bf16 %v4604_v34, %v4602_v12 }
 0x742   : > { %v4562_v36 = vpop.f32.mrf.mxu0  ;;  %v4606_v6 = vpop.f32.mrf.mxu1 }
 0x743   : > { %v4607_v37 = vadd.f32 %v4606_v6, %v4562_v36 }
 0x74a   : > { %v4564_v40 = vpop.f32.mrf.mxu0  ;;  %v4608_v33 = vpop.f32.mrf.mxu1 }
 0x74b   : > { %v4609_v50 = vadd.f32 %v4608_v33, %v4564_v40 }
 0x74d   : > { %v4621_v55 = vpack.c.bf16 %v4609_v50, %v4607_v37 }
 0x752   : > { %v4567_v19 = vpop.f32.mrf.mxu0  ;;  %v4611_v43 = vpop.f32.mrf.mxu1 }
 0x753   : > { %v4612_v32 = vadd.f32 %v4611_v43, %v4567_v19  ;;  %v6546_v19 = vld [vmem:[%s9253_s9 + $0x68] sm:$0xff] }
 0x754   : > { %4923 = vmatpush.bf16.msrb.mxu3 %v6546_v19 }
 0x75a   : > { %v4569_v41 = vpop.f32.mrf.mxu0  ;;  %v4613_v49 = vpop.f32.mrf.mxu1 }
 0x75b   : > { %v4614_v8 = vadd.f32 %v4613_v49, %v4569_v41  ;;  %v6545_v41 = vld [vmem:[%s9253_s9 + $0x60] sm:$0xff] }
 0x75c   : > { %4924 = vmatpush.bf16.msrb.mxu3 %v6545_v41 }
 0x75d   : > { %v4622_v61 = vpack.c.bf16 %v4614_v8, %v4612_v32  ;;  %v6544_v8 = vld [vmem:[%s9253_s9 + $0x58] sm:$0xff] }
 0x75f   : > { %v4652_v47 = vsel %vm807_vm0, %v4622_v61, 0 }
 0x760   : > { %4655 = vmatpush.bf16.msra.mxu2 %v4652_v47  ;;  %4925 = vmatpush.bf16.msrb.mxu3 %v6544_v8  ;;  %v6543_v47 = vld [vmem:[%s9253_s9 + $0x50] sm:$0xff] }
 0x764   : > { %4656 = vmatpush.bf16.msra.mxu2 %v4621_v55  ;;  %4926 = vmatpush.bf16.msrb.mxu3 %v6543_v47 }
 0x768   : > { %4657 = vmatpush.bf16.msra.mxu2 %v4620_v53 }
 0x76c   : > { %4658 = vmatpush.bf16.msra.mxu2 %v4619_v2 }
 0x770   : > { %4659 = vmatpush.bf16.msra.mxu2 %v4618_v46  ;;  %v6548_v46 = vld [vmem:[%s9253_s9 + $0x78] sm:$0xff] }
 0x774   : > { %4660 = vmatpush.bf16.msra.mxu2 %v4617_v18 }
 0x778   : > { %4661 = vmatpush.bf16.msra.mxu2 %v4616_v52 }
 0x77b   : > { %6198 = vmatmul.msk.bf16.vlgmr.msra.gmra.mxu2 %vm4641_vm14, %v6531_v35 }
 0x77c   : > { %4841 = vmatpush.bf16.msrb.mxu2 %v6537_v13 }
 0x780   : > { %4842 = vmatpush.bf16.msrb.mxu2 %v6536_v3  ;;  %v6557_v3 = vld [vmem:[%s9253_s9 + $0xc0] sm:$0xff] }
 0x784   : > { %4843 = vmatpush.bf16.msrb.mxu2 %v6535_v57 }
 0x788   : > { %4844 = vmatpush.bf16.msrb.mxu2 %v6534_v5 }
 0x78b   : > { %6199 = vmatmul.msk.bf16.gmra.mxu2 %vm4641_vm14, %v6532_v0 }
 0x78c   : > { %4845 = vmatpush.bf16.msrb.mxu2 %v6533_v23 }
 0x790   : > { %5011 = vmatpush.bf16.msra.mxu2 %v6552_v20 }
 0x794   : > { %5012 = vmatpush.bf16.msra.mxu2 %v6551_v25 }
 0x798   : > { %5013 = vmatpush.bf16.msra.mxu2 %v6550_v27 }
 0x79b   : > { %6200 = vmatmul.msk.bf16.gmra.mxu2 %vm4641_vm14, %v4640_v7 }
 0x79c   : > { %5014 = vmatpush.bf16.msra.mxu2 %v6549_v54 }
 0x7a0   : > { %5015 = vmatpush.bf16.msra.mxu2 %v6548_v46 }
 0x7fe   : > { %v4663_v48 = vpop.f32.mrf.mxu2 }
 0x7ff   : > { %v4682_v28 = vmul.f32 0.01, %v4663_v48  ;;  %vm4677_vm15 = vcmp.ge.f32.partialorder %v4663_v48, 0.0 }
 0x801   : > { %v4687_v24 = vsel %vm4677_vm15, %v4663_v48, %v4682_v28  ;;  %v6555_v48 = vld [vmem:[%s9253_s9 + $0xb0] sm:$0xff]  ;;  %v6554_v28 = vld [vmem:[%s9253_s9 + $0xa8] sm:$0xff] }
 0x806   : > { %v4665_v39 = vpop.f32.mrf.mxu2 }
 0x807   : > { %vm4678_vm1 = vcmp.ge.f32.partialorder %v4665_v39, 0.0  ;;  %v4683_v1 = vmul.f32 0.01, %v4665_v39 }
 0x809   : > { %v4688_v52 = vsel %vm4678_vm1, %v4665_v39, %v4683_v1  ;;  %v6553_v39 = vld [vmem:[%s9253_s9 + $0xa0] sm:$0xff] }
 0x80a   : > { %v9075_v14 = vpack.c.bf16 %v4688_v52, %v4687_v24 }
 0x80c   : > { %6254 = vmatmul.msk.bf16.vlgmr.msrb.gmra.mxu2 %vm4769_vm7, %v9075_v14  ;;  %v4719_v56 = vshll.u32 %v9075_v14, 16  ;;  %v4717_v38 = vshrl.u32 %v9075_v14, 16  ;;  %v5047_v21 = vrot.slane %v9075_v14, 2  ;;  %v4875_v45 = vrot.slane %v9075_v14, 1 }
 0x80e   : > { %v4668_v26 = vpop.f32.mrf.mxu2  ;;  %v4721_v30 = vrot.slane %v4719_v56, 1  ;;  %v4958_v2 = vrot.slane %v4717_v38, 1  ;;  %v4959_v35 = vrot.slane %v4719_v56, 2 }
 0x80f   : > { %v4684_v18 = vmul.f32 0.01, %v4668_v26  ;;  %vm4679_vm8 = vcmp.ge.f32.partialorder %v4668_v26, 0.0 }
 0x810   : > { %v4722_v58 = vor.u32 %v4721_v30, %v4717_v38  ;;  %v4960_v60 = vor.u32 %v4959_v35, %v4958_v2 }
 0x811   : > { %v4689_v16 = vsel %vm4679_vm8, %v4668_v26, %v4684_v18 }
 0x816   : > { %v4670_v11 = vpop.f32.mrf.mxu2 }
 0x817   : > { %vm4680_vm9 = vcmp.ge.f32.partialorder %v4670_v11, 0.0  ;;  %v4685_v29 = vmul.f32 0.01, %v4670_v11 }
 0x819   : > { %v4690_v44 = vsel %vm4680_vm9, %v4670_v11, %v4685_v29 }
 0x81a   : > { %v9095_v10 = vpack.c.bf16 %v4690_v44, %v4689_v16 }
 0x81c   : > { %v4724_v51 = vshll.u32 %v9095_v10, 16  ;;  %6255 = vmatmul.msk.bf16.gmra.mxu2 %vm4769_vm7, %v9095_v10  ;;  %v5048_v42 = vrot.slane %v9095_v10, 2  ;;  %v4728_v37 = vshrl.u32 %v9095_v10, 16  ;;  %v4876_v22 = vrot.slane %v9095_v10, 1 }
 0x81e   : > { %v4726_v31 = vrot.slane %v4724_v51, 1  ;;  %v4673_v9 = vpop.f32.mrf.mxu2  ;;  %v5049_v6 = vsel %vm807_vm0, %v5047_v21, %v5048_v42  ;;  %v4961_v15 = vrot.slane %v4728_v37, 1  ;;  %v4962_v53 = vrot.slane %v4724_v51, 2 }
 0x81f   : > { %vm4681_vm11 = vcmp.ge.f32.partialorder %v4673_v9, 0.0  ;;  %v4686_v36 = vmul.f32 0.01, %v4673_v9  ;;  %v4877_v59 = vsel %vm1247_vm4, %v4875_v45, %v4876_v22 }
 0x820   : > { %v4727_v40 = vsel %vm612_vm2, %v4722_v58, %v4726_v31  ;;  %v4730_v55 = vor.u32 %v4728_v37, %v4726_v31  ;;  %v4963_v0 = vor.u32 %v4962_v53, %v4961_v15 }
 0x821   : > { %6231 = vmatmul.msk.bf16.vlgmr.msra.gmra.mxu3 %vm4769_vm7, %v4727_v40  ;;  %v4691_v33 = vsel %vm4681_vm11, %v4673_v9, %v4686_v36 }
 0x822   : > { %v4694_v43 = vpack.c.bf16 %v4691_v33, %v4691_v33  ;;  %v4964_v4 = vsel %vm1598_vm3, %v4960_v60, %v4963_v0  ;;  %5094 = vmatpush.bf16.msra.mxu3 %v6557_v3 }
 0x824   : > { %v5050_v49 = vrot.slane %v4694_v43, 2  ;;  %v4732_v50 = vshll.u32 %v4694_v43, 16  ;;  %v4736_v7 = vshrl.u32 %v4694_v43, 16  ;;  %v4878_v1 = vrot.slane %v4694_v43, 1 }
 0x826   : > { %v4675_v32 = vpop.f32.mrf.mxu2  ;;  %v5051_v61 = vsel %vm807_vm0, %v5048_v42, %v5050_v49  ;;  %v4734_v34 = vrot.slane %v4732_v50, 1  ;;  %v4965_v57 = vrot.slane %v4736_v7, 1  ;;  %v4966_v5 = vrot.slane %v4732_v50, 2  ;;  %5095 = vmatpush.bf16.msra.mxu3 %v6556_v17 }
 0x827   : > { %v4879_v24 = vsel %vm1247_vm4, %v4876_v22, %v4878_v1  ;;  %v6562_v22 = vld [vmem:[%s9256_s12 + $0x20] sm:$0xff]  ;;  %vm5127_vm0 = vcmask 293888  }
 0x828   : > { %v4735_v12 = vsel %vm612_vm2, %v4730_v55, %v4734_v34  ;;  %v4738_v13 = vor.u32 %v4736_v7, %v4734_v34  ;;  %v4967_v23 = vor.u32 %v4966_v5, %v4965_v57 }
 0x82a   : > { %v4968_v62 = vsel %vm1598_vm3, %v4963_v0, %v4967_v23  ;;  %5096 = vmatpush.bf16.msra.mxu3 %v6555_v48  ;;  %v5165_v0 = vld [vmem:[%s9256_s12 + $0x38] sm:$0xf]  ;;  %vm5215_vm3 = vcmask 982016  }
 0x82b   : > { %v5199_v60 = vunpack.c.l.b16 %v5165_v0  ;;  %v6561_v48 = vld [vmem:[%s9256_s12 + $0x18] sm:$0xff] }
 0x82c   : > { %6256 = vmatmul.msk.bf16.gmra.mxu2 %vm4769_vm7, %v4694_v43 }
 0x82e   : > { %5097 = vmatpush.bf16.msra.mxu3 %v6554_v28 }
 0x831   : > { %6232 = vmatmul.msk.bf16.gmra.mxu3 %vm4769_vm7, %v4735_v12 }
 0x832   : > { %5098 = vmatpush.bf16.msra.mxu3 %v6553_v39  ;;  %v6560_v39 = vld [vmem:[%s9256_s12 + $0x10] sm:$0xff] }
 0x83c   : > { %6320 = vmatmul.msk.bf16.vlgmr.msra.gmra.mxu2 %vm4769_vm7, %v4964_v4  ;;  %v5207_v4 = vpack.c.b16 %v5199_v60, %v5199_v60 }
 0x83e   : > { %v5220_v7 = vsel %vm2754_vm5, %v5207_v4, 0  ;;  %vm5306_vm5 = vcmask 80896  }
 0x83f   : > { %5222 = vmatpush.bf16.msrb.mxu1 %v5220_v7 }
 0x841   : > { %6233 = vmatmul.msk.bf16.gmra.mxu3 %vm4769_vm7, %v4738_v13  ;;  %v6564_v13 = vld [vmem:[%s9256_s12 + $0x30] sm:$0xff] }
 0x843   : > { %5223 = vmatpush.bf16.msrb.mxu1 %v6564_v13 }
 0x84c   : > { %6321 = vmatmul.msk.bf16.gmra.mxu2 %vm4769_vm7, %v4968_v62  ;;  %v6563_v62 = vld [vmem:[%s9256_s12 + $0x28] sm:$0xff] }
 0x84d   : > { %5224 = vmatpush.bf16.msrb.mxu1 %v6563_v62 }
 0x851   : > { %6287 = vmatmul.msk.bf16.vlgmr.msrb.gmra.mxu3 %vm4769_vm7, %v4877_v59  ;;  %5225 = vmatpush.bf16.msrb.mxu1 %v6562_v22 }
 0x855   : > { %5226 = vmatpush.bf16.msrb.mxu1 %v6561_v48 }
 0x859   : > { %5227 = vmatpush.bf16.msrb.mxu1 %v6560_v39 }
 0x85c   : > { %6322 = vmatmul.msk.bf16.gmra.mxu2 %vm4769_vm7, %v4967_v23 }
 0x861   : > { %6288 = vmatmul.msk.bf16.gmra.mxu3 %vm4769_vm7, %v4879_v24  ;;  %v6559_v24 = vld [vmem:[%s9256_s12 + $0x8] sm:$0xff] }
 0x862   : > { %5228 = vmatpush.bf16.msrb.mxu1 %v6559_v24 }
 0x871   : > { %6289 = vmatmul.msk.bf16.gmra.mxu3 %vm4769_vm7, %v4878_v1 }
 0x881   : > { %6353 = vmatmul.msk.bf16.vlgmr.msra.gmra.mxu3 %vm4769_vm7, %v5049_v6 }
 0x88f   : > { %v4847_v52 = vpop.f32.mrf.mxu2 }
 0x891   : > { %6354 = vmatmul.msk.bf16.gmra.mxu3 %vm4769_vm7, %v5051_v61 }
 0x897   : > { %v4849_v20 = vpop.f32.mrf.mxu2 }
 0x89f   : > { %v4852_v14 = vpop.f32.mrf.mxu2 }
 0x8a1   : > { %6355 = vmatmul.msk.bf16.gmra.mxu3 %vm4769_vm7, %v5050_v49 }
 0x8a4   : > { %v4788_v25 = vpop.f32.mrf.mxu3 }
 0x8a5   : > { %v4848_v26 = vadd.f32 %v4847_v52, %v4788_v25  ;;  %v5119_v52 = vld [vmem:[%s9255_s11] sm:$0xf] }
 0x8a7   : > { %v4854_v63 = vpop.f32.mrf.mxu2 }
 0x8ac   : > { %v4790_v27 = vpop.f32.mrf.mxu3 }
 0x8ad   : > { %v4850_v18 = vadd.f32 %v4849_v20, %v4790_v27  ;;  %v6558_v20 = vld [vmem:[%s9256_s12] sm:$0xff] }
 0x8ae   : > { %5229 = vmatpush.bf16.msrb.mxu1 %v6558_v20  ;;  %v6569_v27 = vld [vmem:[%s9258_s14 + $0x20] sm:$0xff] }
 0x8af   : > { %v4857_v54 = vpop.f32.mrf.mxu2 }
 0x8b4   : > { %v4793_v11 = vpop.f32.mrf.mxu3 }
 0x8b5   : > { %v4853_v56 = vadd.f32 %v4852_v14, %v4793_v11  ;;  %v5249_v14 = vld [vmem:[%s9258_s14 + $0x28] sm:$0x3]  ;;  %v6609_v11 = vld [vmem:[%s9254_s10] ss:$0 sm:$0xff] }
 0x8b6   : > { %v5275_v25 = vunpack.c.l.b16 %v5249_v14 }
 0x8b7   : > { %v4859_v29 = vpop.f32.mrf.mxu2 }
 0x8bc   : > { %v4795_v16 = vpop.f32.mrf.mxu3 }
 0x8bd   : > { %v4855_v44 = vadd.f32 %v4854_v63, %v4795_v16 }
 0x8bf   : > { %v5017_v46 = vpop.f32.mrf.mxu2 }
 0x8c4   : > { %v4798_v10 = vpop.f32.mrf.mxu3 }
 0x8c5   : > { %v4858_v30 = vadd.f32 %v4857_v54, %v4798_v10  ;;  %v6567_v54 = vld [vmem:[%s9258_s14 + $0x10] sm:$0xff] }
 0x8c7   : > { %v5019_v38 = vpop.f32.mrf.mxu2 }
 0x8cc   : > { %v4800_v51 = vpop.f32.mrf.mxu3 }
 0x8cd   : > { %v6610_v51 = vld [vmem:[%s9257_s13] ss:$0 sm:$0xff] }
 0x8cf   : > { %v5022_v42 = vpop.f32.mrf.mxu2 }
 0x8d4   : > { %v4928_v21 = vpop.f32.mrf.mxu3 }
 0x8d5   : > { %v4942_v58 = vadd.f32 %v4928_v21, %v4848_v26  ;;  %v5281_v26 = vpack.c.b16 %v5275_v25, %v5275_v25 }
 0x8d7   : > { %v5031_v31 = vadd.f32 %v5017_v46, %v4942_v58  ;;  %v5024_v9 = vpop.f32.mrf.mxu2  ;;  %v5291_v63 = vsel %vm3346_vm13, %v5281_v26, 0 }
 0x8dc   : > { %v4930_v36 = vpop.f32.mrf.mxu3 }
 0x8dd   : > { %v4943_v6 = vadd.f32 %v4930_v36, %v4850_v18  ;;  %v6568_v18 = vld [vmem:[%s9258_s14 + $0x18] sm:$0xff] }
 0x8df   : > { %v5032_v40 = vadd.f32 %v5019_v38, %v4943_v6  ;;  %v5027_v33 = vpop.f32.mrf.mxu2  ;;  %v6565_v38 = vld [vmem:[%s9258_s14] sm:$0xff] }
 0x8e0   : > { %v6611_v6 = vld [vmem:[%s9259_s15] ss:$0 sm:$0xff] }
 0x8e4   : > { %v4933_v19 = vpop.f32.mrf.mxu3 }
 0x8e5   : > { %v4944_v43 = vadd.f32 %v4933_v19, %v4853_v56 }
 0x8e7   : > { %v5033_v41 = vadd.f32 %v5022_v42, %v4944_v43  ;;  %v5029_v49 = vpop.f32.mrf.mxu2 }
 0x8ec   : > { %v4935_v32 = vpop.f32.mrf.mxu3 }
 0x8ed   : > { %v4945_v8 = vadd.f32 %v4935_v32, %v4855_v44 }
 0x8ef   : > { %v5034_v61 = vadd.f32 %v5024_v9, %v4945_v8 }
 0x8f4   : > { %v4938_v50 = vpop.f32.mrf.mxu3 }
 0x8f5   : > { %v4946_v47 = vadd.f32 %v4938_v50, %v4858_v30  ;;  %v6566_v30 = vld [vmem:[%s9258_s14 + $0x8] sm:$0xff] }
 0x8f7   : > { %v5035_v37 = vadd.f32 %v5027_v33, %v4946_v47 }
 0x8fc   : > { %v4940_v34 = vpop.f32.mrf.mxu3 }
 0x904   : > { %v5100_v55 = vpop.f32.mrf.mxu3 }
 0x905   : > { %v5114_v15 = vadd.f32 %v5100_v55, %v5031_v31 }
 0x90c   : > { %v5102_v12 = vpop.f32.mrf.mxu3 }
 0x90d   : > { %v5115_v53 = vadd.f32 %v5102_v12, %v5032_v40 }
 0x90f   : > { %v5120_v2 = vpack.c.bf16 %v5115_v53, %v5114_v15 }
 0x914   : > { %v5105_v35 = vpop.f32.mrf.mxu3 }
 0x915   : > { %v5116_v57 = vadd.f32 %v5105_v35, %v5033_v41 }
 0x91c   : > { %v5107_v3 = vpop.f32.mrf.mxu3 }
 0x91d   : > { %v5117_v5 = vadd.f32 %v5107_v3, %v5034_v61 }
 0x91f   : > { %v5121_v23 = vpack.c.bf16 %v5117_v5, %v5116_v57 }
 0x924   : > { %v5110_v45 = vpop.f32.mrf.mxu3 }
 0x925   : > { %v5118_v59 = vadd.f32 %v5110_v45, %v5035_v37 }
 0x927   : > { %v5122_v17 = vpack.c.bf16 %v5118_v59, %v5118_v59 }
 0x929   : > { %v5132_v28 = vsel %vm3346_vm13, %v5122_v17, 0 }
 0x92a   : > { %5139 = vmatpush.bf16.msrb.mxu0 %v5132_v28 }
 0x92c   : > { %v5112_v1 = vpop.f32.mrf.mxu3 }
 0x92e   : > { %5140 = vmatpush.bf16.msrb.mxu0 %v5121_v23 }
 0x932   : > { %5141 = vmatpush.bf16.msrb.mxu0 %v5120_v2 }
 0x935   : > { %6356 = vmatmul.msk.bf16.vlgmr.msrb.gmra.mxu0 %vm5127_vm0, %v5119_v52 }
 0x936   : > { %5295 = vmatpush.bf16.msra.mxu0 %v5291_v63 }
 0x93a   : > { %5296 = vmatpush.bf16.msra.mxu0 %v6569_v27 }
 0x93e   : > { %5297 = vmatpush.bf16.msra.mxu0 %v6568_v18 }
 0x942   : > { %5298 = vmatpush.bf16.msra.mxu0 %v6567_v54 }
 0x946   : > { %5299 = vmatpush.bf16.msra.mxu0 %v6566_v30 }
 0x94a   : > { %5300 = vmatpush.bf16.msra.mxu0 %v6565_v38 }
 0x9b2   : > { %v5143_v56 = vpop.f32.mrf.mxu0 }
 0x9b3   : > { %v5144_v29 = vadd.f32 %v6609_v11, %v5143_v56 }
 0x9b5   : > { %vm5147_vm2 = vcmp.ge.f32.partialorder %v5144_v29, 0.0  ;;  %v5148_v16 = vmul.f32 0.01, %v5144_v29 }
 0x9b7   : > { %v5149_v44 = vsel %vm5147_vm2, %v5144_v29, %v5148_v16 }
 0x9b8   : > { %v5150_v46 = vpack.c.bf16 %v5149_v44, %v5149_v44 }
 0x9ba   : > { %6385 = vmatmul.msk.bf16.vlgmr.msrb.gmra.mxu1 %vm5215_vm3, %v5150_v46  ;;  %v5145_v10 = vpop.f32.mrf.mxu0 }
 0xa37   : > { %v5231_v42 = vpop.f32.mrf.mxu1 }
 0xa38   : > { %v5232_v21 = vadd.f32 %v6610_v51, %v5231_v42 }
 0xa3a   : > { %vm5235_vm4 = vcmp.ge.f32.partialorder %v5232_v21, 0.0  ;;  %v5236_v58 = vmul.f32 0.01, %v5232_v21 }
 0xa3c   : > { %v5237_v31 = vsel %vm5235_vm4, %v5232_v21, %v5236_v58 }
 0xa3d   : > { %v5238_v9 = vpack.c.bf16 %v5237_v31, %v5237_v31 }
 0xa3f   : > { %6406 = vmatmul.msk.bf16.vlgmr.msra.gmra.mxu0 %vm3324_vm6, %v5238_v9  ;;  %v5233_v36 = vpop.f32.mrf.mxu1 }
 0xabc   : > { %v5302_v40 = vpop.f32.mrf.mxu0 }
 0xabd   : > { %v5303_v33 = vadd.f32 %v6611_v6, %v5302_v40 }
 0xabf   : > { %5307 = vst.msk [vmem:[%s515_s18] sm:$0xff] %vm5306_vm5, %v5303_v33 }
 0xac0   : > { %6655 = shalt.err (!%p6652_p3)
}
 0xac1   : > { %6570 = dma.vmem_to_hbm [thread:$0]  (%p6815_p5), %s5322_s24, 128, %s5324_s19, %s5309_s25  }
 0xac4   : > { %v5304_v19 = vpop.f32.mrf.mxu0 }
 0xac5 PF: > { %s9481_s28 = sld [smem:[#allocation7_spill]] }
 0xac6   : > { %s9482_s26 = sld [smem:[#allocation5_spill]] }
 0xacb   : > { %p6576_p4 = scmp.ge.s32.totalorder %s9481_s28, 2 }
 0xacc   : > { %s5335_s18 = sand.u32 1, %s9482_s26  }
 0xacd   : > { %p6573_p7 = pnand %p6576_p4, %p6819_p6  ;;  %s5336_s30 = scalar_lea.sflag [#allocation3], %s5335_s18 }
 0xacf   : > { %p6574_p8 = pneg %p6573_p7 }
 0xad1   : > { %6673 = dma.done.wait (%p6574_p8), %s5336_s30, 128  }
 0xad2   : > { %6675 = vsyncadd (%p6574_p8), %s5336_s30, 4294967168  ;;  %s9484_s24 = sld [smem:[#allocation8_spill]]  ;;  %s9487_s21 = smov %s6682_s22 }
 0xad3   : > { %s9485_s1 = sld [smem:[#allocation6_spill]] }
 0xad4   : > { %s9486_s23 = sld [smem:[#allocation9_spill]] }
 0xad8   : > { %p26_p9 = scmp.ge.s32.totalorder %s9484_s24, 4  }
 0xad9   : > { %s9488_s22 = smov %s9485_s1 }
 0xada   :  { %28 = sbr.rel (!%p26_p9) target bundleno = 6 (0x6), region = 131 }
 0xadf   :  { %5342 = vsyncpa [#allocation3], 1 }
 0xae0   :  { %5344 = vsyncpa [#allocation3 + $0x1], 1 }

</bundles_post_ra>
